<compile_context>
chip_gen: v5e
topology: v5e:2x2
jax: 0.10.0
libtpu: 0.0.40
codegen_flags: <defaults>
</compile_context>

<pallas_src>
import jax
import jax.numpy as jnp
from jax.experimental import pallas as pl
from jax.experimental.pallas import tpu as pltpu


NEG_SLOPE = 0.01          # PyTorch default for F.leaky_relu
LATENT, H1, H2, OUT = 64, 128, 256, 784   # 784 = 28*28


def _round_up(x, m):
    return ((x + m - 1) // m) * m


def _leaky_relu(x):
    return jnp.where(x > 0, x, NEG_SLOPE * x)


def generator_kernel(x_ref, w1_ref, b1_ref, w2_ref, b2_ref, w3_ref, b3_ref,
                     o_ref):
    # x is bf16 [TB, 64]; weights bf16; biases f32; f32 MXU accumulation.
    x = x_ref[...]

    # fc1 + leaky_relu
    h1 = jnp.dot(x, w1_ref[...], preferred_element_type=jnp.float32)
    h1 = _leaky_relu(h1 + b1_ref[...])

    # fc2 + leaky_relu
    h2 = jnp.dot(h1.astype(jnp.bfloat16), w2_ref[...],
                 preferred_element_type=jnp.float32)
    h2 = _leaky_relu(h2 + b2_ref[...])

    # fc3 + tanh, stored directly at the logical 784 width in bf16.
    h3 = jnp.dot(h2.astype(jnp.bfloat16), w3_ref[...],
                 preferred_element_type=jnp.float32)
    o_ref[...] = jnp.tanh(h3 + b3_ref[...]).astype(o_ref.dtype)


def _choose_tb(bp, batch_tile):
    """Largest multiple-of-8 divisor of bp that is <= batch_tile and leaves
    grid >= 2 (megacore sharding on v7x), falling back to the whole batch."""
    cap = min(batch_tile, max(8, bp // 2))
    best = None
    for tb in range(8, cap + 1, 8):
        if bp % tb == 0:
            best = tb
    return best if best is not None else bp


def generator_forward(x, params, *, batch_tile=1024):
    """x: [B, 64] (any float dtype) -> [B, 784] bfloat16."""
    w1, b1, w2, b2, w3, b3 = params
    B = x.shape[0]

    # bf16 input halves the input DMA bytes and removes an in-kernel cast.
    x = x.astype(jnp.bfloat16)

    Bp = _round_up(B, 8)
    if Bp != B:
        x = jnp.pad(x, ((0, Bp - B), (0, 0)))
    TB = _choose_tb(Bp, batch_tile)
    grid = (Bp // TB,)

    # Weight/bias blocks use a constant index_map -> fetched once, then
    # VMEM-resident across all batch tiles (~0.5 MB total; far from the
    # VMEM limit even if the compiler double-buffers them).
    const2 = lambda i: (0, 0)
    cost = pl.CostEstimate(
        flops=2 * Bp * (LATENT * H1 + H1 * H2 + H2 * OUT),
        transcendentals=Bp * OUT,
        bytes_accessed=(x.size * 2                               # bf16 input
                        + (w1.size + w2.size + w3.size) * 2      # bf16 weights
                        + (b1.size + b2.size + b3.size) * 4      # f32 biases
                        + Bp * OUT * 2),                         # bf16 output
    )

    out = pl.pallas_call(
        generator_kernel,
        out_shape=jax.ShapeDtypeStruct((Bp, OUT), jnp.bfloat16),
        grid=grid,
        in_specs=[
            pl.BlockSpec((TB, LATENT), lambda i: (i, 0)),
            pl.BlockSpec(w1.shape, const2), pl.BlockSpec(b1.shape, const2),
            pl.BlockSpec(w2.shape, const2), pl.BlockSpec(b2.shape, const2),
            pl.BlockSpec(w3.shape, const2), pl.BlockSpec(b3.shape, const2),
        ],
        out_specs=pl.BlockSpec((TB, OUT), lambda i: (i, 0)),
        compiler_params=pltpu.CompilerParams(
            dimension_semantics=("parallel",)),   # megacore sharding on v7x
        cost_estimate=cost,
    )(x, w1, b1, w2, b2, w3, b3)

    # No-op when B is already a multiple of 8 (TB always divides Bp).
    return out if Bp == B else out[:B]


def init_params(key):
    """PyTorch nn.Linear-style init (U(-k, k), k = 1/sqrt(fan_in)).

    Weights stored as [in, out] in bf16; biases as [1, out] in f32.
    """
    dims = [(LATENT, H1), (H1, H2), (H2, OUT)]
    params = []
    for fan_in, fan_out in dims:
        kw, kb, key = jax.random.split(key, 3)
        bound = 1.0 / (fan_in ** 0.5)
        w = jax.random.uniform(kw, (fan_in, fan_out), jnp.float32,
                               minval=-bound, maxval=bound)
        b = jax.random.uniform(kb, (1, fan_out), jnp.float32,
                               minval=-bound, maxval=bound)
        params.extend([w.astype(jnp.bfloat16), b])
    return tuple(params)


def reference_forward(x, params):
    """Pure-JAX f32 reference using the same (bf16-stored) weights."""
    w1, b1, w2, b2, w3, b3 = params
    w1, w2, w3 = (w.astype(jnp.float32) for w in (w1, w2, w3))
    h = jax.nn.leaky_relu(x @ w1 + b1, NEG_SLOPE)
    h = jax.nn.leaky_relu(h @ w2 + b2, NEG_SLOPE)
    return jnp.tanh(h @ w3 + b3)


if __name__ == "__main__":
    key = jax.random.PRNGKey(0)
    k_x, k_p = jax.random.split(key)

    B = 512   # -> TB=256, grid=2: exercises grid, megacore split, residency
    x = jax.random.normal(k_x, (B, LATENT), jnp.float32)
    params = init_params(k_p)

    out = generator_forward(x, params)
    out = jax.block_until_ready(out)

    ref = reference_forward(x, params)
    assert out.shape == (B, OUT), out.shape
    assert out.dtype == jnp.bfloat16, out.dtype
    # bf16 input/activations/output vs f32 reference -> loosened tolerance.
    assert jnp.allclose(out.astype(jnp.float32), ref, atol=3e-2, rtol=3e-2), \
        "mismatch vs. reference"

    print("KERNEL_OK")
</pallas_src>

<mosaic_0001>
module attributes {stable_mosaic.version = 11 : i64} {
  func.func @generator_kernel(%arg0: i32, %arg1: memref<256x64xbf16, #tpu.memory_space<vmem>>, %arg2: memref<64x128xbf16, #tpu.memory_space<vmem>>, %arg3: memref<1x128xf32, #tpu.memory_space<vmem>>, %arg4: memref<128x256xbf16, #tpu.memory_space<vmem>>, %arg5: memref<1x256xf32, #tpu.memory_space<vmem>>, %arg6: memref<256x784xbf16, #tpu.memory_space<vmem>>, %arg7: memref<1x784xf32, #tpu.memory_space<vmem>>, %arg8: memref<256x784xbf16, #tpu.memory_space<vmem>>) attributes {dimension_semantics = [#tpu.dimension_semantics<parallel>], iteration_bounds = array<i64: 2>, scalar_prefetch = 0 : i64, scratch_operands = 0 : i64, tpu.core_type = #tpu.core_type<tc>, window_params = [{transform_indices = @transform_0, window_bounds = array<i64: 256, 64>}, {pipeline_mode = #tpu.pipeline_mode<synchronous>, transform_indices = @transform_1, window_bounds = array<i64: 64, 128>}, {pipeline_mode = #tpu.pipeline_mode<synchronous>, transform_indices = @transform_2, window_bounds = array<i64: 1, 128>}, {pipeline_mode = #tpu.pipeline_mode<synchronous>, transform_indices = @transform_3, window_bounds = array<i64: 128, 256>}, {pipeline_mode = #tpu.pipeline_mode<synchronous>, transform_indices = @transform_4, window_bounds = array<i64: 1, 256>}, {pipeline_mode = #tpu.pipeline_mode<synchronous>, transform_indices = @transform_5, window_bounds = array<i64: 256, 784>}, {pipeline_mode = #tpu.pipeline_mode<synchronous>, transform_indices = @transform_6, window_bounds = array<i64: 1, 784>}, {transform_indices = @transform_7, window_bounds = array<i64: 256, 784>}]} {
    %c0 = arith.constant 0 : index
    %c0_0 = arith.constant 0 : index
    %0 = vector.load %arg1[%c0, %c0_0] : memref<256x64xbf16, #tpu.memory_space<vmem>>, vector<256x64xbf16>
    %c0_1 = arith.constant 0 : index
    %c0_2 = arith.constant 0 : index
    %1 = vector.load %arg2[%c0_1, %c0_2] : memref<64x128xbf16, #tpu.memory_space<vmem>>, vector<64x128xbf16>
    %cst = arith.constant dense<0.000000e+00> : vector<256x128xf32>
    %2 = tpu.matmul %0, %1, %cst {dimension_numbers = #tpu.dot_dimension_numbers<[1], [0], [0], [1], [0, 0, 1, 1], [], []>} : vector<256x64xbf16>, vector<64x128xbf16>, vector<256x128xf32> -> vector<256x128xf32>
    %c0_3 = arith.constant 0 : index
    %c0_4 = arith.constant 0 : index
    %3 = vector.load %arg3[%c0_3, %c0_4] : memref<1x128xf32, #tpu.memory_space<vmem>>, vector<1x128xf32>
    %4 = vector.broadcast %3 : vector<1x128xf32> to vector<256x128xf32>
    %5 = arith.addf %2, %4 : vector<256x128xf32>
    %cst_5 = arith.constant 0.000000e+00 : f32
    %6 = vector.broadcast %cst_5 : f32 to vector<256x128xf32>
    %7 = arith.cmpf ogt, %5, %6 : vector<256x128xf32>
    %cst_6 = arith.constant 0.00999999977 : f32
    %8 = vector.broadcast %cst_6 : f32 to vector<256x128xf32>
    %9 = arith.mulf %8, %5 : vector<256x128xf32>
    %10 = arith.select %7, %5, %9 : vector<256x128xi1>, vector<256x128xf32>
    %11 = arith.truncf %10 : vector<256x128xf32> to vector<256x128xbf16>
    %c0_7 = arith.constant 0 : index
    %c0_8 = arith.constant 0 : index
    %12 = vector.load %arg4[%c0_7, %c0_8] : memref<128x256xbf16, #tpu.memory_space<vmem>>, vector<128x256xbf16>
    %cst_9 = arith.constant dense<0.000000e+00> : vector<256x256xf32>
    %13 = tpu.matmul %11, %12, %cst_9 {dimension_numbers = #tpu.dot_dimension_numbers<[1], [0], [0], [1], [0, 0, 1, 1], [], []>} : vector<256x128xbf16>, vector<128x256xbf16>, vector<256x256xf32> -> vector<256x256xf32>
    %c0_10 = arith.constant 0 : index
    %c0_11 = arith.constant 0 : index
    %14 = vector.load %arg5[%c0_10, %c0_11] : memref<1x256xf32, #tpu.memory_space<vmem>>, vector<1x256xf32>
    %15 = vector.broadcast %14 : vector<1x256xf32> to vector<256x256xf32>
    %16 = arith.addf %13, %15 : vector<256x256xf32>
    %cst_12 = arith.constant 0.000000e+00 : f32
    %17 = vector.broadcast %cst_12 : f32 to vector<256x256xf32>
    %18 = arith.cmpf ogt, %16, %17 : vector<256x256xf32>
    %cst_13 = arith.constant 0.00999999977 : f32
    %19 = vector.broadcast %cst_13 : f32 to vector<256x256xf32>
    %20 = arith.mulf %19, %16 : vector<256x256xf32>
    %21 = arith.select %18, %16, %20 : vector<256x256xi1>, vector<256x256xf32>
    %22 = arith.truncf %21 : vector<256x256xf32> to vector<256x256xbf16>
    %c0_14 = arith.constant 0 : index
    %c0_15 = arith.constant 0 : index
    %23 = vector.load %arg6[%c0_14, %c0_15] : memref<256x784xbf16, #tpu.memory_space<vmem>>, vector<256x784xbf16>
    %cst_16 = arith.constant dense<0.000000e+00> : vector<256x784xf32>
    %24 = tpu.matmul %22, %23, %cst_16 {dimension_numbers = #tpu.dot_dimension_numbers<[1], [0], [0], [1], [0, 0, 1, 1], [], []>} : vector<256x256xbf16>, vector<256x784xbf16>, vector<256x784xf32> -> vector<256x784xf32>
    %c0_17 = arith.constant 0 : index
    %c0_18 = arith.constant 0 : index
    %25 = vector.load %arg7[%c0_17, %c0_18] : memref<1x784xf32, #tpu.memory_space<vmem>>, vector<1x784xf32>
    %26 = vector.broadcast %25 : vector<1x784xf32> to vector<256x784xf32>
    %27 = arith.addf %24, %26 : vector<256x784xf32>
    %28 = math.tanh %27 : vector<256x784xf32>
    %29 = arith.truncf %28 : vector<256x784xf32> to vector<256x784xbf16>
    %c0_19 = arith.constant 0 : index
    %c0_20 = arith.constant 0 : index
    %30 = vector.load %arg8[%c0_19, %c0_20] : memref<256x784xbf16, #tpu.memory_space<vmem>>, vector<256x784xbf16>
    tpu.vector_store %arg8[%c0_19, %c0_20], %29 {strides = array<i32>} : memref<256x784xbf16, #tpu.memory_space<vmem>>, vector<256x784xbf16>,
    return
  }
  func.func @transform_0(%arg0: i32) -> (i32, i32) {
    %c0_i32 = arith.constant 0 : i32
    %c0_i32_0 = arith.constant 0 : i32
    return %arg0, %c0_i32 : i32, i32
  }
  func.func @transform_1(%arg0: i32) -> (i32, i32) {
    %c0_i32 = arith.constant 0 : i32
    %c0_i32_0 = arith.constant 0 : i32
    %c0_i32_1 = arith.constant 0 : i32
    return %c0_i32, %c0_i32_0 : i32, i32
  }
  func.func @transform_2(%arg0: i32) -> (i32, i32) {
    %c0_i32 = arith.constant 0 : i32
    %c0_i32_0 = arith.constant 0 : i32
    %c0_i32_1 = arith.constant 0 : i32
    return %c0_i32, %c0_i32_0 : i32, i32
  }
  func.func @transform_3(%arg0: i32) -> (i32, i32) {
    %c0_i32 = arith.constant 0 : i32
    %c0_i32_0 = arith.constant 0 : i32
    %c0_i32_1 = arith.constant 0 : i32
    return %c0_i32, %c0_i32_0 : i32, i32
  }
  func.func @transform_4(%arg0: i32) -> (i32, i32) {
    %c0_i32 = arith.constant 0 : i32
    %c0_i32_0 = arith.constant 0 : i32
    %c0_i32_1 = arith.constant 0 : i32
    return %c0_i32, %c0_i32_0 : i32, i32
  }
  func.func @transform_5(%arg0: i32) -> (i32, i32) {
    %c0_i32 = arith.constant 0 : i32
    %c0_i32_0 = arith.constant 0 : i32
    %c0_i32_1 = arith.constant 0 : i32
    return %c0_i32, %c0_i32_0 : i32, i32
  }
  func.func @transform_6(%arg0: i32) -> (i32, i32) {
    %c0_i32 = arith.constant 0 : i32
    %c0_i32_0 = arith.constant 0 : i32
    %c0_i32_1 = arith.constant 0 : i32
    return %c0_i32, %c0_i32_0 : i32, i32
  }
  func.func @transform_7(%arg0: i32) -> (i32, i32) {
    %c0_i32 = arith.constant 0 : i32
    %c0_i32_0 = arith.constant 0 : i32
    return %arg0, %c0_i32 : i32, i32
  }
}

</mosaic_0001>

<bundles_post_ra>
// kernel: tpu_custom_call.1
= control target key start
LH: loop header
LB: loop body
LE: loop exit
PB: predicated region body
PF: predicated region fallthrough
CT: control target
= control target key end

     0   :  { %s4988_s24 = smov 0   ;;  %s6969_s0 = inlined_call_operand.vmem [shape: bf16[512,64], index: 0, kind: input, shape index: {}]   ;;  %s6970_s1 = inlined_call_operand.vmem [shape: bf16[64,128], index: 1, kind: input, shape index: {}]   ;;  %s6971_s2 = inlined_call_operand.vmem [shape: f32[1,128], index: 2, kind: input, shape index: {}]   ;;  %s6972_s3 = inlined_call_operand.vmem [shape: bf16[128,256], index: 3, kind: input, shape index: {}]   ;;  %s6973_s4 = inlined_call_operand.vmem [shape: f32[1,256], index: 4, kind: input, shape index: {}]   ;;  %s6974_s5 = inlined_call_operand.vmem [shape: bf16[256,784], index: 5, kind: input, shape index: {}]   ;;  %s6975_s6 = inlined_call_operand.vmem [shape: f32[1,784], index: 6, kind: input, shape index: {}]   ;;  %s6976_s7 = inlined_call_operand.vmem [shape: bf16[512,784], index: 7, kind: output, shape index: {}]  }
   0x1 LB: > { %s3692_s25 = sadd.s32 4294967295, %s4946_s24   ;;  %p3696_p0 = scmp.ge.s32.totalorder %s4946_s24, 1  ;;  %s4946_s24 = sphi %s4988_s24, %s17_s24  }
   0x2   : > { %p238_p1 = scmp.lt.s32.totalorder %s4946_s24, 3 }
   0x4   : > { %p239_p2 = pnand %p3696_p0, %p238_p1 }
   0x6   : > { %242 = sbr.rel (%p239_p2) target bundleno = 1471 (0x5bf), region = 48 }
   0xb   : > { %v4330_v0 = vld [vmem:[%s6970_s1 + $0x18] sm:$0xff]  ;;  %s3697_s28 = sshll.u32 %s3692_s25, 5  ;;  %v4329_v1 = vld [vmem:[%s6970_s1 + $0x10] sm:$0xff]  ;;  %v4328_v2 = vld [vmem:[%s6970_s1 + $0x8] sm:$0xff]  ;;  %vm433_vm0 = vcmask 523264  }
   0xc   : > { %p272_p3 = scmp.lt.s32.totalorder %s3697_s28, 63  ;;  %486 = vmatpush.bf16.msra.mxu0 %v4330_v0  ;;  %4459 = vmatpush.bf16.msra.mxu1 %v4330_v0  ;;  %v4327_v3 = vld [vmem:[%s6970_s1] sm:$0xff]  ;;  %v3855_v7 = vld [vmem:[%s6972_s3 + $0x70] sm:$0xf]  ;;  %v4346_v8 = vld [vmem:[%s6972_s3 + $0x74] sm:$0xf0] }
   0xd   : > { %4460 = vmatpush.bf16.msra.mxu2 %v4330_v0  ;;  %4461 = vmatpush.bf16.msra.mxu3 %v4330_v0  ;;  %v3856_v9 = vor.u32 %v4346_v8, %v3855_v7  ;;  %v3847_v12 = vld [vmem:[%s6972_s3 + $0x60] sm:$0xf]  ;;  %v4344_v13 = vld [vmem:[%s6972_s3 + $0x64] sm:$0xf0]  ;;  %v3839_v15 = vld [vmem:[%s6972_s3 + $0x50] sm:$0xf] }
   0xe   : > { %s7016_s28 = smov (!%p272_p3, %s3697_s28), 63  ;;  %v3848_v14 = vor.u32 %v4344_v13, %v3847_v12  ;;  %v4342_v16 = vld [vmem:[%s6972_s3 + $0x54] sm:$0xf0]  ;;  %v3831_v18 = vld [vmem:[%s6972_s3 + $0x40] sm:$0xf] }
   0xf   : > { %s3698_s10 = sshll.u32 %s7016_s28, 2  ;;  %v3840_v17 = vor.u32 %v4342_v16, %v3839_v15  ;;  %v4340_v20 = vld [vmem:[%s6972_s3 + $0x44] sm:$0xf0]  ;;  %v4345_v21 = vld [vmem:[%s6972_s3 + $0x74] sm:$0xf]  ;;  %s4479_s25 = smul.u32 28, %s7016_s28 }
  0x10   : > { %487 = vmatpush.bf16.msra.mxu0 %v4329_v1  ;;  %4462 = vmatpush.bf16.msra.mxu1 %v4329_v1  ;;  %s5014_s15 = scalar_lea.vmem %s6969_s0, %s3698_s10  ;;  %v3857_v22 = vld [vmem:[%s6972_s3 + $0x78] sm:$0xf0]  ;;  %v4343_v24 = vld [vmem:[%s6972_s3 + $0x64] sm:$0xf]  ;;  %v3849_v25 = vld [vmem:[%s6972_s3 + $0x68] sm:$0xf0]  ;;  %v3832_v26 = vor.u32 %v4340_v20, %v3831_v18 }
  0x11   : > { %4463 = vmatpush.bf16.msra.mxu2 %v4329_v1  ;;  %4464 = vmatpush.bf16.msra.mxu3 %v4329_v1  ;;  %v4311_v4 = vld [vmem:[%s5014_s15] sm:$0xff]  ;;  %v4312_v5 = vld [vmem:[%s5014_s15 + $0x8] sm:$0xff]  ;;  %v4313_v10 = vld [vmem:[%s5014_s15 + $0x10] sm:$0xff]  ;;  %v3860_v23 = vor.u32 %v4345_v21, %v3857_v22  ;;  %v3852_v27 = vor.u32 %v4343_v24, %v3849_v25  ;;  %s5770_s29 = scalar_lea.vmem %s6976_s7, %s4479_s25 }
  0x12   : > { %v4316_v6 = vld [vmem:[%s5014_s15 + $0x28] sm:$0xff]  ;;  %v4317_v11 = vld [vmem:[%s5014_s15 + $0x30] sm:$0xff]  ;;  %v4338_v29 = vld [vmem:[%s6972_s3 + $0x34] sm:$0xf0] }
  0x13   : > { %v4321_v19 = vld [vmem:[%s5014_s15 + $0x50] sm:$0xff]  ;;  %v4314_v31 = vld [vmem:[%s5014_s15 + $0x18] sm:$0xff]  ;;  %v3815_v32 = vld [vmem:[%s6972_s3 + $0x20] sm:$0xf] }
  0x14   : > { %488 = vmatpush.bf16.msra.mxu0 %v4328_v2  ;;  %4465 = vmatpush.bf16.msra.mxu1 %v4328_v2  ;;  %v3823_v28 = vld [vmem:[%s6972_s3 + $0x30] sm:$0xf]  ;;  %v4336_v33 = vld [vmem:[%s6972_s3 + $0x24] sm:$0xf0]  ;;  %v4318_v34 = vld [vmem:[%s5014_s15 + $0x38] sm:$0xff] }
  0x15   : > { %4466 = vmatpush.bf16.msra.mxu2 %v4328_v2  ;;  %4467 = vmatpush.bf16.msra.mxu3 %v4328_v2  ;;  %v3824_v30 = vor.u32 %v4338_v29, %v3823_v28  ;;  %v3816_v35 = vor.u32 %v4336_v33, %v3815_v32  ;;  %v4341_v36 = vld [vmem:[%s6972_s3 + $0x54] sm:$0xf]  ;;  %v3841_v37 = vld [vmem:[%s6972_s3 + $0x58] sm:$0xf0]  ;;  %v3807_v38 = vld [vmem:[%s6972_s3 + $0x10] sm:$0xf] }
  0x16   : > { %v3844_v39 = vor.u32 %v4341_v36, %v3841_v37  ;;  %v4334_v40 = vld [vmem:[%s6972_s3 + $0x14] sm:$0xf0]  ;;  %v4339_v41 = vld [vmem:[%s6972_s3 + $0x44] sm:$0xf]  ;;  %v3833_v42 = vld [vmem:[%s6972_s3 + $0x48] sm:$0xf0] }
  0x17   : > { %v3808_v43 = vor.u32 %v4334_v40, %v3807_v38  ;;  %v3836_v44 = vor.u32 %v4339_v41, %v3833_v42  ;;  %v4315_v45 = vld [vmem:[%s5014_s15 + $0x20] sm:$0xff]  ;;  %v4320_v47 = vld [vmem:[%s5014_s15 + $0x48] sm:$0xff]  ;;  %v4322_v48 = vld [vmem:[%s5014_s15 + $0x58] sm:$0xff] }
  0x18   : > { %489 = vmatpush.bf16.msra.mxu0 %v4327_v3  ;;  %4468 = vmatpush.bf16.msra.mxu1 %v4327_v3  ;;  %v4319_v46 = vld [vmem:[%s5014_s15 + $0x40] sm:$0xff]  ;;  %v4337_v49 = vld [vmem:[%s6972_s3 + $0x34] sm:$0xf]  ;;  %v3825_v50 = vld [vmem:[%s6972_s3 + $0x38] sm:$0xf0] }
  0x19   : > { %4469 = vmatpush.bf16.msra.mxu2 %v4327_v3  ;;  %4470 = vmatpush.bf16.msra.mxu3 %v4327_v3  ;;  %v3828_v51 = vor.u32 %v4337_v49, %v3825_v50  ;;  %v4335_v52 = vld [vmem:[%s6972_s3 + $0x24] sm:$0xf]  ;;  %v3817_v53 = vld [vmem:[%s6972_s3 + $0x28] sm:$0xf0]  ;;  %v3799_v55 = vld [vmem:[%s6972_s3] sm:$0xf] }
  0x1a   : > { %v3820_v54 = vor.u32 %v4335_v52, %v3817_v53  ;;  %v4332_v56 = vld [vmem:[%s6972_s3 + $0x4] sm:$0xf0]  ;;  %v4333_v58 = vld [vmem:[%s6972_s3 + $0x14] sm:$0xf]  ;;  %v3809_v59 = vld [vmem:[%s6972_s3 + $0x18] sm:$0xf0] }
  0x1b   : > { %3781 = vmatmul.msk.bf16.vlgmr.msra.gmra.mxu0 %vm433_vm0, %v4311_v4  ;;  %3786 = vmatmul.msk.bf16.vlgmr.msra.gmra.mxu1 %vm433_vm0, %v4316_v6  ;;  %v3800_v57 = vor.u32 %v4332_v56, %v3799_v55  ;;  %v3812_v60 = vor.u32 %v4333_v58, %v3809_v59  ;;  %v4331_v61 = vld [vmem:[%s6972_s3 + $0x4] sm:$0xf]  ;;  %v3801_v62 = vld [vmem:[%s6972_s3 + $0x8] sm:$0xf0]  ;;  %v5139_v1 = vld [vmem:[%s6971_s2] ss:$0 sm:$0xff] }
  0x1c   : > { %785 = vmatpush.bf16.msrb.mxu1 %v3856_v9  ;;  %3791 = vmatmul.msk.bf16.vlgmr.msra.gmra.mxu2 %vm433_vm0, %v4321_v19  ;;  %v3804_v63 = vor.u32 %v4331_v61, %v3801_v62  ;;  %v4324_v21 = vld [vmem:[%s5014_s15 + $0x68] sm:$0xff]  ;;  %v4325_v32 = vld [vmem:[%s5014_s15 + $0x70] sm:$0xff]  ;;  %v4455_v52 = vld [vmem:[%s6974_s5 + $0x360] sm:$0xf0] }
  0x1d   : > { %874 = vmatpush.bf16.msrb.mxu2 %v3860_v23  ;;  %v4059_v33 = vld [vmem:[%s6974_s5 + $0x188] sm:$0xf]  ;;  %v4392_v49 = vld [vmem:[%s6974_s5 + $0x168] sm:$0xf0]  ;;  %v4003_v53 = vld [vmem:[%s6974_s5 + $0x118] sm:$0xf] }
  0x1e   : > { %v4385_v55 = vld [vmem:[%s6974_s5 + $0x130] sm:$0xf0]  ;;  %v4255_v56 = vld [vmem:[%s6974_s5 + $0x310] sm:$0xf] }
  0x1f   : > { %v4004_v58 = vor.u32 %v4385_v55, %v4003_v53  ;;  %v4420_v53 = vld [vmem:[%s6974_s5 + $0x248] sm:$0xf0] }
  0x20   : > { %786 = vmatpush.bf16.msrb.mxu1 %v3848_v14 }
  0x21   : > { %875 = vmatpush.bf16.msrb.mxu2 %v3852_v27 }
  0x24   : > { %787 = vmatpush.bf16.msrb.mxu1 %v3840_v17 }
  0x25   : > { %876 = vmatpush.bf16.msrb.mxu2 %v3844_v39 }
  0x28   : > { %788 = vmatpush.bf16.msrb.mxu1 %v3832_v26 }
  0x29   : > { %877 = vmatpush.bf16.msrb.mxu2 %v3836_v44 }
  0x2b   : > { %3782 = vmatmul.msk.bf16.gmra.mxu0 %vm433_vm0, %v4312_v5  ;;  %3787 = vmatmul.msk.bf16.gmra.mxu1 %vm433_vm0, %v4317_v11  ;;  %v4323_v11 = vld [vmem:[%s5014_s15 + $0x60] sm:$0xff] }
  0x2c   : > { %789 = vmatpush.bf16.msrb.mxu1 %v3824_v30  ;;  %3792 = vmatmul.msk.bf16.gmra.mxu2 %vm433_vm0, %v4322_v48  ;;  %v4031_v48 = vld [vmem:[%s6974_s5 + $0x150] sm:$0xf] }
  0x2d   : > { %878 = vmatpush.bf16.msrb.mxu2 %v3828_v51  ;;  %3793 = vmatmul.msk.bf16.vlgmr.msra.gmra.mxu3 %vm433_vm0, %v4323_v11  ;;  %v4032_v50 = vor.u32 %v4392_v49, %v4031_v48  ;;  %v4283_v51 = vld [vmem:[%s6974_s5 + $0x348] sm:$0xf] }
  0x2e   : > { %v3947_v11 = vld [vmem:[%s6974_s5 + $0xa8] sm:$0xf] }
  0x2f   : > { %v4285_v49 = vld [vmem:[%s6974_s5 + $0x364] sm:$0xf0] }
  0x30   : > { %790 = vmatpush.bf16.msrb.mxu1 %v3816_v35 }
  0x31   : > { %879 = vmatpush.bf16.msrb.mxu2 %v3820_v54  ;;  %v4284_v54 = vor.u32 %v4455_v52, %v4283_v51  ;;  %v4143_v52 = vld [vmem:[%s6974_s5 + $0x230] sm:$0xf] }
  0x32   : > { %v4144_v55 = vor.u32 %v4420_v53, %v4143_v52 }
  0x33   : > { %1996 = vmatpush.bf16.msrb.mxu0 %v4284_v54 }
  0x34   : > { %791 = vmatpush.bf16.msrb.mxu1 %v3808_v43 }
  0x35   : > { %880 = vmatpush.bf16.msrb.mxu2 %v3812_v60 }
  0x38   : > { %792 = vmatpush.bf16.msrb.mxu1 %v3800_v57  ;;  %v4448_v57 = vld [vmem:[%s6974_s5 + $0x328] sm:$0xf0] }
  0x39   : > { %881 = vmatpush.bf16.msrb.mxu2 %v3804_v63  ;;  %v4256_v59 = vor.u32 %v4448_v57, %v4255_v56  ;;  %v3863_v57 = vld [vmem:[%s6974_s5] sm:$0xf] }
  0x3b   : > { %3783 = vmatmul.msk.bf16.gmra.mxu0 %vm433_vm0, %v4313_v10  ;;  %3788 = vmatmul.msk.bf16.gmra.mxu1 %vm433_vm0, %v4318_v34  ;;  %v4399_v34 = vld [vmem:[%s6974_s5 + $0x1a0] sm:$0xf0] }
  0x3c   : > { %v4060_v35 = vor.u32 %v4399_v34, %v4059_v33  ;;  %1997 = vmatpush.bf16.msrb.mxu0 %v4256_v59 }
  0x3d   : > { %3794 = vmatmul.msk.bf16.gmra.mxu3 %vm433_vm0, %v4324_v21 }
  0x3e   : > { %1907 = vmatpush.bf16.msrb.mxu3 %v4060_v35 }
  0x42   : > { %1908 = vmatpush.bf16.msrb.mxu3 %v4032_v50 }
  0x46   : > { %1909 = vmatpush.bf16.msrb.mxu3 %v4004_v58  ;;  %v4350_v58 = vld [vmem:[%s6974_s5 + $0x18] sm:$0xf0] }
  0x47   : > { %v3864_v59 = vor.u32 %v4350_v58, %v3863_v57 }
  0x4b   : > { %3784 = vmatmul.msk.bf16.gmra.mxu0 %vm433_vm0, %v4314_v31  ;;  %3789 = vmatmul.msk.bf16.gmra.mxu1 %vm433_vm0, %v4319_v46 }
  0x4d   : > { %3795 = vmatmul.msk.bf16.gmra.mxu3 %vm433_vm0, %v4325_v32 }
  0x5b   : > { %3785 = vmatmul.msk.bf16.gmra.mxu0 %vm433_vm0, %v4315_v45  ;;  %3790 = vmatmul.msk.bf16.gmra.mxu1 %vm433_vm0, %v4320_v47  ;;  %v4326_v47 = vld [vmem:[%s5014_s15 + $0x78] sm:$0xff] }
  0x5d   : > { %3796 = vmatmul.msk.bf16.gmra.mxu3 %vm433_vm0, %v4326_v47 }
  0x98   : > { %v491_v0 = vpop.f32.mrf.mxu0  ;;  %v5151_v27 = vpop.f32.mrf.mxu1 }
  0x99   : > { %v492_v2 = vadd.f32 %v5139_v1, %v491_v0 }
  0x9b   : > { %v603_v4 = vmul.f32 0.01, %v492_v2  ;;  %vm571_vm1 = vcmp.gt.f32.partialorder %v492_v2, 0.0 }
  0x9d   : > { %v635_v7 = vsel %vm571_vm1, %v492_v2, %v603_v4 }
  0xa0   : > { %v493_v3 = vpop.f32.mrf.mxu0  ;;  %v518_v37 = vpop.f32.mrf.mxu1 }
  0xa1   : > { %v494_v5 = vadd.f32 %v5139_v1, %v493_v3 }
  0xa3   : > { %vm572_vm2 = vcmp.gt.f32.partialorder %v494_v5, 0.0  ;;  %v604_v6 = vmul.f32 0.01, %v494_v5 }
  0xa5   : > { %v636_v8 = vsel %vm572_vm2, %v494_v5, %v604_v6  ;;  %v3975_v6 = vld [vmem:[%s6974_s5 + $0xe0] sm:$0xf] }
  0xa6   : > { %v667_v9 = vpack.c.bf16 %v636_v8, %v635_v7  ;;  %v4378_v7 = vld [vmem:[%s6974_s5 + $0xf8] sm:$0xf0]  ;;  %v4227_v8 = vld [vmem:[%s6974_s5 + $0x2d8] sm:$0xf] }
  0xa8   : > { %v496_v10 = vpop.f32.mrf.mxu0  ;;  %793 = vmatmul.bf16.vlgmr.msrb.gmra.mxu1 %v667_v9  ;;  %882 = vmatmul.bf16.vlgmr.msrb.gmra.mxu2 %v667_v9  ;;  %v5163_v45 = vpop.f32.mrf.mxu1  ;;  %v3976_v9 = vor.u32 %v4378_v7, %v3975_v6 }
  0xa9   : > { %v497_v12 = vadd.f32 %v5139_v1, %v496_v10  ;;  %v4441_v10 = vld [vmem:[%s6974_s5 + $0x2f0] sm:$0xf0] }
  0xaa   : > { %1910 = vmatpush.bf16.msrb.mxu3 %v3976_v9  ;;  %v4400_v9 = vld [vmem:[%s6974_s5 + $0x1a8] sm:$0xf0] }
  0xab   : > { %v605_v14 = vmul.f32 0.01, %v497_v12  ;;  %vm573_vm3 = vcmp.gt.f32.partialorder %v497_v12, 0.0 }
  0xad   : > { %v637_v17 = vsel %vm573_vm3, %v497_v12, %v605_v14  ;;  %v4371_v12 = vld [vmem:[%s6974_s5 + $0xc0] sm:$0xf0]  ;;  %v517_v14 = vadd.f32 %v5139_v1, %v5151_v27 }
  0xaf   : > { %vm581_vm11 = vcmp.gt.f32.partialorder %v517_v14, 0.0 }
  0xb0   : > { %v498_v13 = vpop.f32.mrf.mxu0  ;;  %v523_v0 = vpop.f32.mrf.mxu1 }
  0xb1   : > { %v499_v15 = vadd.f32 %v5139_v1, %v498_v13  ;;  %v4228_v13 = vor.u32 %v4441_v10, %v4227_v8  ;;  %v4067_v8 = vld [vmem:[%s6974_s5 + $0x190] sm:$0xf] }
  0xb3   : > { %v606_v16 = vmul.f32 0.01, %v499_v15  ;;  %vm574_vm4 = vcmp.gt.f32.partialorder %v499_v15, 0.0  ;;  %1998 = vmatpush.bf16.msrb.mxu0 %v4228_v13 }
  0xb5   : > { %v638_v18 = vsel %vm574_vm4, %v499_v15, %v606_v16  ;;  %v519_v15 = vadd.f32 %v5139_v1, %v518_v37  ;;  %v5229_v37 = vpop.f32.mrf.mxu2 }
  0xb6   : > { %v668_v19 = vpack.c.bf16 %v638_v18, %v637_v17  ;;  %v3948_v17 = vor.u32 %v4371_v12, %v3947_v11  ;;  %v613_v18 = vmul.f32 0.01, %v517_v14  ;;  %v4068_v12 = vor.u32 %v4400_v9, %v4067_v8 }
  0xb7   : > { %vm582_vm12 = vcmp.gt.f32.partialorder %v519_v15, 0.0 }
  0xb8   : > { %v501_v20 = vpop.f32.mrf.mxu0  ;;  %798 = vmatmul.bf16.gmra.mxu1 %v668_v19  ;;  %887 = vmatmul.bf16.gmra.mxu2 %v668_v19  ;;  %v526_v16 = vpop.f32.mrf.mxu1  ;;  %v614_v19 = vmul.f32 0.01, %v519_v15 }
  0xb9   : > { %v502_v22 = vadd.f32 %v5139_v1, %v501_v20  ;;  %1911 = vmatpush.bf16.msrb.mxu3 %v3948_v17  ;;  %v645_v20 = vsel %vm581_vm11, %v517_v14, %v613_v18  ;;  %v4061_v17 = vld [vmem:[%s6974_s5 + $0x1a4] sm:$0xf0] }
  0xba   : > { %v646_v21 = vsel %vm582_vm12, %v519_v15, %v614_v19 }
  0xbb   : > { %v607_v24 = vmul.f32 0.01, %v502_v22  ;;  %vm575_vm5 = vcmp.gt.f32.partialorder %v502_v22, 0.0 }
  0xbd   : > { %v639_v28 = vsel %vm575_vm5, %v502_v22, %v607_v24  ;;  %v4199_v24 = vld [vmem:[%s6974_s5 + $0x2a0] sm:$0xf]  ;;  %v5251_v51 = vpop.f32.mrf.mxu2 }
  0xc0   : > { %v503_v23 = vpop.f32.mrf.mxu0  ;;  %v528_v22 = vpop.f32.mrf.mxu1 }
  0xc1   : > { %v504_v25 = vadd.f32 %v5139_v1, %v503_v23  ;;  %v672_v23 = vpack.c.bf16 %v646_v21, %v645_v20  ;;  %v529_v47 = vadd.f32 %v5139_v1, %v528_v22  ;;  %v699_v20 = vld [vmem:[%s6973_s4] sm:$0x3] }
  0xc3   : > { %v608_v26 = vmul.f32 0.01, %v504_v25  ;;  %vm576_vm6 = vcmp.gt.f32.partialorder %v504_v25, 0.0  ;;  %v618_v56 = vmul.f32 0.01, %v529_v47  ;;  %vm586_vm0 = vcmp.gt.f32.partialorder %v529_v47, 0.0 }
  0xc5   : > { %v640_v29 = vsel %vm576_vm6, %v504_v25, %v608_v26  ;;  %v4434_v25 = vld [vmem:[%s6974_s5 + $0x2b8] sm:$0xf0]  ;;  %v3919_v26 = vld [vmem:[%s6974_s5 + $0x70] sm:$0xf]  ;;  %v5277_v7 = vpop.f32.mrf.mxu2 }
  0xc6   : > { %v669_v30 = vpack.c.bf16 %v640_v29, %v639_v28  ;;  %v4200_v27 = vor.u32 %v4434_v25, %v4199_v24  ;;  %v4364_v28 = vld [vmem:[%s6974_s5 + $0x88] sm:$0xf0]  ;;  %v5298_v24 = vperm.slane %v699_v20, 0 }
  0xc7   : > { %v3920_v29 = vor.u32 %v4364_v28, %v3919_v26  ;;  %v4257_v28 = vld [vmem:[%s6974_s5 + $0x32c] sm:$0xf0] }
  0xc8   : > { %v506_v31 = vpop.f32.mrf.mxu0  ;;  %803 = vmatmul.bf16.gmra.mxu1 %v669_v30  ;;  %892 = vmatmul.bf16.gmra.mxu2 %v669_v30  ;;  %v522_v30 = vadd.f32 %v5139_v1, %v5163_v45  ;;  %v531_v34 = vpop.f32.mrf.mxu1 }
  0xc9   : > { %v507_v36 = vadd.f32 %v5139_v1, %v506_v31  ;;  %v524_v31 = vadd.f32 %v5139_v1, %v523_v0  ;;  %1999 = vmatpush.bf16.msrb.mxu0 %v4200_v27  ;;  %1912 = vmatpush.bf16.msrb.mxu3 %v3920_v29  ;;  %v532_v10 = vadd.f32 %v5139_v1, %v531_v34  ;;  %v4445_v27 = vld [vmem:[%s6974_s5 + $0x314] sm:$0xf] }
  0xca   : > { %v615_v32 = vmul.f32 0.01, %v522_v30  ;;  %vm583_vm13 = vcmp.gt.f32.partialorder %v522_v30, 0.0 }
  0xcb   : > { %v609_v39 = vmul.f32 0.01, %v507_v36  ;;  %vm577_vm7 = vcmp.gt.f32.partialorder %v507_v36, 0.0  ;;  %v616_v33 = vmul.f32 0.01, %v524_v31  ;;  %vm584_vm14 = vcmp.gt.f32.partialorder %v524_v31, 0.0 }
  0xcc   : > { %v647_v35 = vsel %vm583_vm13, %v522_v30, %v615_v32  ;;  %v619_v14 = vmul.f32 0.01, %v532_v10  ;;  %vm587_vm1 = vcmp.gt.f32.partialorder %v532_v10, 0.0  ;;  %v4260_v32 = vor.u32 %v4445_v27, %v4257_v28 }
  0xcd   : > { %v641_v42 = vsel %vm577_vm7, %v507_v36, %v609_v39  ;;  %v648_v36 = vsel %vm584_vm14, %v524_v31, %v616_v33  ;;  %v5293_v18 = vpop.f32.mrf.mxu2  ;;  %v5309_v33 = vperm.slane %v699_v20, 1 }
  0xce   : > { %v651_v21 = vsel %vm587_vm1, %v532_v10, %v619_v14  ;;  %v5345_v14 = vpop.f32.mrf.mxu3 }
  0xd0   : > { %v508_v38 = vpop.f32.mrf.mxu0  ;;  %v533_v39 = vpop.f32.mrf.mxu1 }
  0xd1   : > { %v509_v40 = vadd.f32 %v5139_v1, %v508_v38  ;;  %v673_v38 = vpack.c.bf16 %v648_v36, %v647_v35  ;;  %v534_v11 = vadd.f32 %v5139_v1, %v533_v39 }
  0xd3   : > { %v610_v41 = vmul.f32 0.01, %v509_v40  ;;  %vm578_vm8 = vcmp.gt.f32.partialorder %v509_v40, 0.0  ;;  %v620_v15 = vmul.f32 0.01, %v534_v11  ;;  %vm588_vm2 = vcmp.gt.f32.partialorder %v534_v11, 0.0 }
  0xd5   : > { %v642_v43 = vsel %vm578_vm8, %v509_v40, %v610_v41  ;;  %v4171_v40 = vld [vmem:[%s6974_s5 + $0x268] sm:$0xf]  ;;  %v4427_v41 = vld [vmem:[%s6974_s5 + $0x280] sm:$0xf0]  ;;  %v652_v22 = vsel %vm588_vm2, %v534_v11, %v620_v15  ;;  %v4033_v11 = vld [vmem:[%s6974_s5 + $0x16c] sm:$0xf0] }
  0xd6   : > { %v670_v44 = vpack.c.bf16 %v642_v43, %v641_v42  ;;  %v527_v42 = vadd.f32 %v5139_v1, %v526_v16  ;;  %v3891_v43 = vld [vmem:[%s6974_s5 + $0x38] sm:$0xf]  ;;  %v4172_v45 = vor.u32 %v4427_v41, %v4171_v40  ;;  %v4396_v16 = vld [vmem:[%s6974_s5 + $0x18c] sm:$0xf]  ;;  %v675_v25 = vpack.c.bf16 %v652_v22, %v651_v21 }
  0xd7   : > { %v4064_v19 = vor.u32 %v4396_v16, %v4061_v17 }
  0xd8   : > { %v511_v46 = vpop.f32.mrf.mxu0  ;;  %808 = vmatmul.bf16.gmra.mxu1 %v670_v44  ;;  %897 = vmatmul.bf16.gmra.mxu2 %v670_v44  ;;  %v4357_v44 = vld [vmem:[%s6974_s5 + $0x50] sm:$0xf0]  ;;  %v617_v54 = vmul.f32 0.01, %v527_v42  ;;  %vm585_vm15 = vcmp.gt.f32.partialorder %v527_v42, 0.0 }
  0xd9   : > { %v512_v60 = vadd.f32 %v5139_v1, %v511_v46  ;;  %v4452_v46 = vld [vmem:[%s6974_s5 + $0x34c] sm:$0xf]  ;;  %v3892_v48 = vor.u32 %v4357_v44, %v3891_v43  ;;  %2000 = vmatpush.bf16.msrb.mxu0 %v4172_v45  ;;  %2085 = vmatpush.bf16.msra.mxu1 %v4064_v19 }
  0xda   : > { %v4288_v50 = vor.u32 %v4452_v46, %v4285_v49  ;;  %v649_v0 = vsel %vm585_vm15, %v527_v42, %v617_v54  ;;  %v4456_v49 = vld [vmem:[%s6974_s5 + $0x368] sm:$0xf0] }
  0xdb   : > { %v611_v62 = vmul.f32 0.01, %v512_v60  ;;  %vm579_vm9 = vcmp.gt.f32.partialorder %v512_v60, 0.0  ;;  %1913 = vmatpush.bf16.msrb.mxu3 %v3892_v48  ;;  %v4291_v48 = vld [vmem:[%s6974_s5 + $0x350] sm:$0xf] }
  0xdc   : > { %2174 = vmatpush.bf16.msra.mxu2 %v4288_v50  ;;  %v4292_v53 = vor.u32 %v4456_v49, %v4291_v48 }
  0xdd   : > { %v643_v3 = vsel %vm579_vm9, %v512_v60, %v611_v62  ;;  %2001 = vmatpush.bf16.msrb.mxu0 %v4144_v55  ;;  %v4115_v60 = vld [vmem:[%s6974_s5 + $0x1f8] sm:$0xf] }
  0xdf   : > { %1914 = vmatpush.bf16.msrb.mxu3 %v3864_v59 }
  0xe0   : > { %v513_v61 = vpop.f32.mrf.mxu0  ;;  %2175 = vmatpush.bf16.msra.mxu2 %v4260_v32  ;;  %v4229_v32 = vld [vmem:[%s6974_s5 + $0x2f4] sm:$0xf0] }
  0xe1   : > { %v514_v63 = vadd.f32 %v5139_v1, %v513_v61  ;;  %v4413_v61 = vld [vmem:[%s6974_s5 + $0x210] sm:$0xf0] }
  0xe2   : > { %v4116_v62 = vor.u32 %v4413_v61, %v4115_v60  ;;  %v4039_v61 = vld [vmem:[%s6974_s5 + $0x158] sm:$0xf] }
  0xe3   : > { %v612_v2 = vmul.f32 0.01, %v514_v63  ;;  %vm580_vm10 = vcmp.gt.f32.partialorder %v514_v63, 0.0  ;;  %2263 = vmatpush.bf16.msra.mxu3 %v4068_v12 }
  0xe4   : > { %2002 = vmatpush.bf16.msrb.mxu0 %v4116_v62  ;;  %v4393_v62 = vld [vmem:[%s6974_s5 + $0x170] sm:$0xf0] }
  0xe5   : > { %v644_v4 = vsel %vm580_vm10, %v514_v63, %v612_v2  ;;  %v536_v63 = vpop.f32.mrf.mxu1  ;;  %v650_v2 = vsel %vm586_vm0, %v529_v47, %v618_v56 }
  0xe6   : > { %v671_v5 = vpack.c.bf16 %v644_v4, %v643_v3  ;;  %v4087_v3 = vld [vmem:[%s6974_s5 + $0x1c0] sm:$0xf]  ;;  %v4406_v4 = vld [vmem:[%s6974_s5 + $0x1d8] sm:$0xf0]  ;;  %v537_v29 = vadd.f32 %v5139_v1, %v536_v63  ;;  %v542_v63 = vadd.f32 %v5139_v1, %v5229_v37 }
  0xe7   : > { %v4088_v6 = vor.u32 %v4406_v4, %v4087_v3  ;;  %v4040_v3 = vor.u32 %v4393_v62, %v4039_v61 }
  0xe8   : > { %813 = vmatmul.bf16.gmra.mxu1 %v671_v5  ;;  %902 = vmatmul.bf16.gmra.mxu2 %v671_v5  ;;  %v674_v5 = vpack.c.bf16 %v650_v2, %v649_v0  ;;  %vm589_vm3 = vcmp.gt.f32.partialorder %v537_v29, 0.0  ;;  %v544_v0 = vadd.f32 %v5139_v1, %v5251_v51  ;;  %vm591_vm9 = vcmp.gt.f32.partialorder %v542_v63, 0.0  ;;  %v4389_v51 = vld [vmem:[%s6974_s5 + $0x154] sm:$0xf] }
  0xe9   : > { %2003 = vmatpush.bf16.msrb.mxu0 %v4088_v6  ;;  %2264 = vmatpush.bf16.msra.mxu3 %v4040_v3  ;;  %v623_v8 = vmul.f32 0.01, %v542_v63  ;;  %v4036_v15 = vor.u32 %v4389_v51, %v4033_v11 }
  0xea   : > { %v624_v9 = vmul.f32 0.01, %v544_v0  ;;  %vm592_vm11 = vcmp.gt.f32.partialorder %v544_v0, 0.0 }
  0xeb   : > { %v655_v19 = vsel %vm591_vm9, %v542_v63, %v623_v8  ;;  %2086 = vmatpush.bf16.msra.mxu1 %v4036_v15 }
  0xec   : > { %v656_v20 = vsel %vm592_vm11, %v544_v0, %v624_v9 }
  0xed   : > { %v538_v13 = vpop.f32.mrf.mxu1  ;;  %2352 = vmatpush.bf16.msra.mxu0 %v4292_v53  ;;  %v4263_v53 = vld [vmem:[%s6974_s5 + $0x318] sm:$0xf] }
  0xee   : > { %v539_v30 = vadd.f32 %v5139_v1, %v538_v13 }
  0xf0   : > { %v622_v39 = vmul.f32 0.01, %v539_v30  ;;  %vm590_vm5 = vcmp.gt.f32.partialorder %v539_v30, 0.0 }
  0xf2   : > { %v654_v47 = vsel %vm590_vm5, %v539_v30, %v622_v39  ;;  %v553_v39 = vpop.f32.mrf.mxu3 }
  0xf3   : > { %v554_v8 = vadd.f32 %v5139_v1, %v553_v39 }
  0xf8   : > { %818 = vmatmul.bf16.gmra.mxu1 %v672_v23  ;;  %907 = vmatmul.bf16.gmra.mxu2 %v672_v23 }
  0xfa   : > { %v556_v62 = vpop.f32.mrf.mxu3 }
 0x108   : > { %823 = vmatmul.bf16.gmra.mxu1 %v673_v38  ;;  %912 = vmatmul.bf16.gmra.mxu2 %v673_v38  ;;  %v621_v38 = vmul.f32 0.01, %v537_v29 }
 0x10a   : > { %v653_v46 = vsel %vm589_vm3, %v537_v29, %v621_v38 }
 0x10b   : > { %v676_v56 = vpack.c.bf16 %v654_v47, %v653_v46 }
 0x118   : > { %828 = vmatmul.bf16.gmra.mxu1 %v674_v5  ;;  %917 = vmatmul.bf16.gmra.mxu2 %v674_v5 }
 0x125   : > { %v794_v23 = vpop.f32.mrf.mxu1 }
 0x126   : > { %v795_v26 = vadd.f32 %v794_v23, %v5298_v24 }
 0x128   : > { %833 = vmatmul.bf16.gmra.mxu1 %v675_v25  ;;  %922 = vmatmul.bf16.gmra.mxu2 %v675_v25  ;;  %v1027_v35 = vmul.f32 0.01, %v795_v26  ;;  %vm963_vm4 = vcmp.gt.f32.partialorder %v795_v26, 0.0 }
 0x12a   : > { %v1091_v42 = vsel %vm963_vm4, %v795_v26, %v1027_v35  ;;  %v677_v26 = vpack.c.bf16 %v656_v20, %v655_v19  ;;  %v549_v35 = vadd.f32 %v5139_v1, %v5293_v18  ;;  %v4382_v19 = vld [vmem:[%s6974_s5 + $0x11c] sm:$0xf]  ;;  %v4005_v20 = vld [vmem:[%s6974_s5 + $0x134] sm:$0xf0] }
 0x12b   : > { %v883_v31 = vpop.f32.mrf.mxu2 }
 0x12c   : > { %v884_v40 = vadd.f32 %v883_v31, %v5309_v33  ;;  %v4438_v31 = vld [vmem:[%s6974_s5 + $0x2dc] sm:$0xf]  ;;  %vm594_vm1 = vcmp.gt.f32.partialorder %v549_v35, 0.0 }
 0x12d   : > { %v796_v34 = vpop.f32.mrf.mxu1  ;;  %v4232_v38 = vor.u32 %v4438_v31, %v4229_v32 }
 0x12e   : > { %v797_v36 = vadd.f32 %v796_v34, %v5298_v24  ;;  %v1028_v50 = vmul.f32 0.01, %v884_v40  ;;  %vm964_vm7 = vcmp.gt.f32.partialorder %v884_v40, 0.0  ;;  %v547_v34 = vadd.f32 %v5139_v1, %v5277_v7 }
 0x12f   : > { %2176 = vmatpush.bf16.msra.mxu2 %v4232_v38 }
 0x130   : > { %vm965_vm6 = vcmp.gt.f32.partialorder %v797_v36, 0.0  ;;  %v1029_v41 = vmul.f32 0.01, %v797_v36  ;;  %v1092_v57 = vsel %vm964_vm7, %v884_v40, %v1028_v50  ;;  %vm593_vm15 = vcmp.gt.f32.partialorder %v547_v34, 0.0 }
 0x131   : > { %vm596_vm7 = vcmp.gt.f32.partialorder %v554_v8, 0.0 }
 0x132   : > { %v1093_v43 = vsel %vm965_vm6, %v797_v36, %v1029_v41 }
 0x133   : > { %v5313_v44 = vpack.c.bf16 %v1093_v43, %v1091_v42  ;;  %v885_v45 = vpop.f32.mrf.mxu2  ;;  %v625_v43 = vmul.f32 0.01, %v547_v34 }
 0x134   : > { %v886_v52 = vadd.f32 %v885_v45, %v5309_v33  ;;  %v626_v45 = vmul.f32 0.01, %v549_v35 }
 0x135   : > { %v799_v54 = vpop.f32.mrf.mxu1  ;;  %1915 = vmatmul.bf16.vlgmr.msrb.gmra.mxu3 %v5313_v44  ;;  %v657_v50 = vsel %vm593_vm15, %v547_v34, %v625_v43  ;;  %v4201_v43 = vld [vmem:[%s6974_s5 + $0x2bc] sm:$0xf0] }
 0x136   : > { %vm966_vm8 = vcmp.gt.f32.partialorder %v886_v52, 0.0  ;;  %v1030_v55 = vmul.f32 0.01, %v886_v52  ;;  %v800_v60 = vadd.f32 %v799_v54, %v5298_v24  ;;  %v4449_v54 = vld [vmem:[%s6974_s5 + $0x330] sm:$0xf0] }
 0x138   : > { %v1094_v58 = vsel %vm966_vm8, %v886_v52, %v1030_v55  ;;  %838 = vmatmul.bf16.gmra.mxu1 %v676_v56  ;;  %927 = vmatmul.bf16.gmra.mxu2 %v676_v56  ;;  %v1031_v5 = vmul.f32 0.01, %v800_v60  ;;  %vm967_vm10 = vcmp.gt.f32.partialorder %v800_v60, 0.0  ;;  %v658_v52 = vsel %vm594_vm1, %v549_v35, %v626_v45 }
 0x139   : > { %v5323_v59 = vpack.c.bf16 %v1094_v58, %v1092_v57  ;;  %v4264_v57 = vor.u32 %v4449_v54, %v4263_v53  ;;  %v678_v61 = vpack.c.bf16 %v658_v52, %v657_v50  ;;  %v557_v45 = vadd.f32 %v5139_v1, %v556_v62 }
 0x13a   : > { %v1095_v12 = vsel %vm967_vm10, %v800_v60, %v1031_v5  ;;  %v4386_v5 = vld [vmem:[%s6974_s5 + $0x138] sm:$0xf0] }
 0x13b   : > { %6995 = vst [vmem:[#allocation2_spill] sm:$0xff] %v5323_v59  ;;  %v888_v2 = vpop.f32.mrf.mxu2  ;;  %2004 = vmatmul.bf16.vlgmr.msrb.gmra.mxu0 %v5323_v59  ;;  %vm597_vm11 = vcmp.gt.f32.partialorder %v557_v45, 0.0  ;;  %v629_v52 = vmul.f32 0.01, %v557_v45 }
 0x13c   : > { %v889_v10 = vadd.f32 %v888_v2, %v5309_v33  ;;  %2353 = vmatpush.bf16.msra.mxu0 %v4264_v57 }
 0x13d   : > { %v801_v4 = vpop.f32.mrf.mxu1 }
 0x13e   : > { %v802_v6 = vadd.f32 %v801_v4, %v5298_v24  ;;  %v1032_v21 = vmul.f32 0.01, %v889_v10  ;;  %vm968_vm13 = vcmp.gt.f32.partialorder %v889_v10, 0.0  ;;  %v4011_v4 = vld [vmem:[%s6974_s5 + $0x120] sm:$0xf] }
 0x140   : > { %vm969_vm12 = vcmp.gt.f32.partialorder %v802_v6, 0.0  ;;  %v1033_v37 = vmul.f32 0.01, %v802_v6  ;;  %v1096_v27 = vsel %vm968_vm13, %v889_v10, %v1032_v21  ;;  %v4012_v10 = vor.u32 %v4386_v5, %v4011_v4  ;;  %v4442_v4 = vld [vmem:[%s6974_s5 + $0x2f8] sm:$0xf0] }
 0x142   : > { %v1097_v13 = vsel %vm969_vm12, %v802_v6, %v1033_v37  ;;  %v552_v6 = vadd.f32 %v5139_v1, %v5345_v14  ;;  %2265 = vmatpush.bf16.msra.mxu3 %v4012_v10 }
 0x143   : > { %v5347_v16 = vpack.c.bf16 %v1097_v13, %v1095_v12  ;;  %v890_v17 = vpop.f32.mrf.mxu2  ;;  %v628_v13 = vmul.f32 0.01, %v554_v8 }
 0x144   : > { %v891_v22 = vadd.f32 %v890_v17, %v5309_v33  ;;  %vm595_vm5 = vcmp.gt.f32.partialorder %v552_v6, 0.0  ;;  %v627_v12 = vmul.f32 0.01, %v552_v6  ;;  %v558_v17 = vpop.f32.mrf.mxu3 }
 0x145   : > { %v804_v23 = vpop.f32.mrf.mxu1  ;;  %1920 = vmatmul.bf16.gmra.mxu3 %v5347_v16 }
 0x146   : > { %vm970_vm14 = vcmp.gt.f32.partialorder %v891_v22, 0.0  ;;  %v1034_v25 = vmul.f32 0.01, %v891_v22  ;;  %v805_v30 = vadd.f32 %v804_v23, %v5298_v24  ;;  %v4008_v23 = vor.u32 %v4382_v19, %v4005_v20 }
 0x148   : > { %v1098_v28 = vsel %vm970_vm14, %v891_v22, %v1034_v25  ;;  %843 = vmatmul.bf16.gmra.mxu1 %v677_v26  ;;  %932 = vmatmul.bf16.gmra.mxu2 %v677_v26  ;;  %v1035_v41 = vmul.f32 0.01, %v805_v30  ;;  %vm971_vm0 = vcmp.gt.f32.partialorder %v805_v30, 0.0 }
 0x149   : > { %v5352_v29 = vpack.c.bf16 %v1098_v28, %v1096_v27  ;;  %v659_v27 = vsel %vm595_vm5, %v552_v6, %v627_v12  ;;  %v660_v28 = vsel %vm596_vm7, %v554_v8, %v628_v13  ;;  %2087 = vmatpush.bf16.msra.mxu1 %v4008_v23  ;;  %v4368_v12 = vld [vmem:[%s6974_s5 + $0xac] sm:$0xf]  ;;  %v3949_v13 = vld [vmem:[%s6974_s5 + $0xc4] sm:$0xf0] }
 0x14a   : > { %v1099_v18 = vsel %vm971_vm0, %v805_v30, %v1035_v41  ;;  %v679_v35 = vpack.c.bf16 %v660_v28, %v659_v27  ;;  %v3952_v20 = vor.u32 %v4368_v12, %v3949_v13  ;;  %v3983_v28 = vld [vmem:[%s6974_s5 + $0xe8] sm:$0xf] }
 0x14b   : > { %v893_v36 = vpop.f32.mrf.mxu2  ;;  %2009 = vmatmul.bf16.gmra.mxu0 %v5352_v29 }
 0x14c   : > { %v894_v7 = vadd.f32 %v893_v36, %v5309_v33  ;;  %v561_v41 = vpop.f32.mrf.mxu3 }
 0x14d   : > { %v806_v40 = vpop.f32.mrf.mxu1 }
 0x14e   : > { %v807_v42 = vadd.f32 %v806_v40, %v5298_v24  ;;  %v1036_v55 = vmul.f32 0.01, %v894_v7  ;;  %vm972_vm3 = vcmp.gt.f32.partialorder %v894_v7, 0.0 }
 0x150   : > { %vm973_vm2 = vcmp.gt.f32.partialorder %v807_v42, 0.0  ;;  %v1037_v46 = vmul.f32 0.01, %v807_v42  ;;  %v1100_v63 = vsel %vm972_vm3, %v894_v7, %v1036_v55  ;;  %v559_v7 = vadd.f32 %v5139_v1, %v558_v17 }
 0x152   : > { %v1101_v47 = vsel %vm973_vm2, %v807_v42, %v1037_v46  ;;  %v4431_v42 = vld [vmem:[%s6974_s5 + $0x2a4] sm:$0xf]  ;;  %v630_v53 = vmul.f32 0.01, %v559_v7  ;;  %vm598_vm13 = vcmp.gt.f32.partialorder %v559_v7, 0.0 }
 0x153   : > { %v5368_v48 = vpack.c.bf16 %v1101_v47, %v1099_v18  ;;  %v895_v49 = vpop.f32.mrf.mxu2  ;;  %v4204_v18 = vor.u32 %v4431_v42, %v4201_v43 }
 0x154   : > { %v896_v56 = vadd.f32 %v895_v49, %v5309_v33 }
 0x155   : > { %v809_v58 = vpop.f32.mrf.mxu1  ;;  %1925 = vmatmul.bf16.gmra.mxu3 %v5368_v48  ;;  %2177 = vmatpush.bf16.msra.mxu2 %v4204_v18 }
 0x156   : > { %vm974_vm4 = vcmp.gt.f32.partialorder %v896_v56, 0.0  ;;  %v1038_v60 = vmul.f32 0.01, %v896_v56  ;;  %v810_v3 = vadd.f32 %v809_v58, %v5298_v24  ;;  %v4375_v58 = vld [vmem:[%s6974_s5 + $0xe4] sm:$0xf] }
 0x158   : > { %v1102_v0 = vsel %vm974_vm4, %v896_v56, %v1038_v60  ;;  %848 = vmatmul.bf16.gmra.mxu1 %v678_v61  ;;  %937 = vmatmul.bf16.gmra.mxu2 %v678_v61  ;;  %v1039_v51 = vmul.f32 0.01, %v810_v3  ;;  %vm975_vm6 = vcmp.gt.f32.partialorder %v810_v3, 0.0  ;;  %v3977_v60 = vld [vmem:[%s6974_s5 + $0xfc] sm:$0xf0] }
 0x159   : > { %v5378_v2 = vpack.c.bf16 %v1102_v0, %v1100_v63  ;;  %v661_v63 = vsel %vm597_vm11, %v557_v45, %v629_v52  ;;  %v662_v0 = vsel %vm598_vm13, %v559_v7, %v630_v53  ;;  %v3980_v5 = vor.u32 %v4375_v58, %v3977_v60  ;;  %v4117_v52 = vld [vmem:[%s6974_s5 + $0x214] sm:$0xf0]  ;;  %v4347_v60 = vld [vmem:[%s6974_s5 + $0x4] sm:$0xf] }
 0x15a   : > { %v1103_v21 = vsel %vm975_vm6, %v810_v3, %v1039_v51  ;;  %v4235_v3 = vld [vmem:[%s6974_s5 + $0x2e0] sm:$0xf] }
 0x15b   : > { %6996 = vst [vmem:[#allocation3_spill] sm:$0xff] %v5378_v2  ;;  %v898_v9 = vpop.f32.mrf.mxu2  ;;  %2014 = vmatmul.bf16.gmra.mxu0 %v5378_v2  ;;  %v4236_v10 = vor.u32 %v4442_v4, %v4235_v3  ;;  %2088 = vmatpush.bf16.msra.mxu1 %v3980_v5 }
 0x15c   : > { %v899_v15 = vadd.f32 %v898_v9, %v5309_v33  ;;  %v563_v9 = vpop.f32.mrf.mxu3 }
 0x15d   : > { %v811_v37 = vpop.f32.mrf.mxu1  ;;  %2354 = vmatpush.bf16.msra.mxu0 %v4236_v10  ;;  %v564_v23 = vadd.f32 %v5139_v1, %v563_v9 }
 0x15e   : > { %v812_v11 = vadd.f32 %v811_v37, %v5298_v24  ;;  %v1040_v30 = vmul.f32 0.01, %v899_v15  ;;  %vm976_vm9 = vcmp.gt.f32.partialorder %v899_v15, 0.0 }
 0x15f   : > { %2089 = vmatpush.bf16.msra.mxu1 %v3952_v20  ;;  %v632_v43 = vmul.f32 0.01, %v564_v23  ;;  %vm600_vm3 = vcmp.gt.f32.partialorder %v564_v23, 0.0 }
 0x160   : > { %vm977_vm8 = vcmp.gt.f32.partialorder %v812_v11, 0.0  ;;  %v1041_v14 = vmul.f32 0.01, %v812_v11  ;;  %v1104_v36 = vsel %vm976_vm9, %v899_v15, %v1040_v30  ;;  %v4424_v15 = vld [vmem:[%s6974_s5 + $0x26c] sm:$0xf] }
 0x161   : > { %v4379_v30 = vld [vmem:[%s6974_s5 + $0x100] sm:$0xf0]  ;;  %v664_v5 = vsel %vm600_vm3, %v564_v23, %v632_v43 }
 0x162   : > { %v1105_v22 = vsel %vm977_vm8, %v812_v11, %v1041_v14  ;;  %v680_v11 = vpack.c.bf16 %v662_v0, %v661_v63  ;;  %v4173_v14 = vld [vmem:[%s6974_s5 + $0x284] sm:$0xf0]  ;;  %v4403_v63 = vld [vmem:[%s6974_s5 + $0x1c4] sm:$0xf] }
 0x163   : > { %v5399_v25 = vpack.c.bf16 %v1105_v22, %v1103_v21  ;;  %v900_v26 = vpop.f32.mrf.mxu2  ;;  %v562_v21 = vadd.f32 %v5139_v1, %v561_v41  ;;  %v4435_v43 = vld [vmem:[%s6974_s5 + $0x2c0] sm:$0xf0] }
 0x164   : > { %v901_v31 = vadd.f32 %v900_v26, %v5309_v33  ;;  %v4176_v26 = vor.u32 %v4424_v15, %v4173_v14  ;;  %v566_v18 = vpop.f32.mrf.mxu3 }
 0x165   : > { %v814_v32 = vpop.f32.mrf.mxu1  ;;  %1930 = vmatmul.bf16.gmra.mxu3 %v5399_v25  ;;  %vm599_vm1 = vcmp.gt.f32.partialorder %v562_v21, 0.0  ;;  %v631_v42 = vmul.f32 0.01, %v562_v21  ;;  %v567_v20 = vadd.f32 %v5139_v1, %v566_v18 }
 0x166   : > { %vm978_vm10 = vcmp.gt.f32.partialorder %v901_v31, 0.0  ;;  %v1042_v34 = vmul.f32 0.01, %v901_v31  ;;  %v815_v40 = vadd.f32 %v814_v32, %v5298_v24  ;;  %2178 = vmatpush.bf16.msra.mxu2 %v4176_v26 }
 0x167   : > { %v663_v4 = vsel %vm599_vm1, %v562_v21, %v631_v42  ;;  %vm601_vm7 = vcmp.gt.f32.partialorder %v567_v20, 0.0  ;;  %v4207_v42 = vld [vmem:[%s6974_s5 + $0x2a8] sm:$0xf] }
 0x168   : > { %v1106_v38 = vsel %vm978_vm10, %v901_v31, %v1042_v34  ;;  %853 = vmatmul.bf16.gmra.mxu1 %v679_v35  ;;  %942 = vmatmul.bf16.gmra.mxu2 %v679_v35  ;;  %v1043_v49 = vmul.f32 0.01, %v815_v40  ;;  %vm979_vm12 = vcmp.gt.f32.partialorder %v815_v40, 0.0  ;;  %v4361_v31 = vld [vmem:[%s6974_s5 + $0x74] sm:$0xf]  ;;  %v3984_v34 = vor.u32 %v4379_v30, %v3983_v28 }
 0x169   : > { %v5404_v39 = vpack.c.bf16 %v1106_v38, %v1104_v36  ;;  %v3921_v35 = vld [vmem:[%s6974_s5 + $0x8c] sm:$0xf0]  ;;  %v4417_v36 = vld [vmem:[%s6974_s5 + $0x234] sm:$0xf]  ;;  %v681_v12 = vpack.c.bf16 %v664_v5, %v663_v4  ;;  %v633_v30 = vmul.f32 0.01, %v567_v20 }
 0x16a   : > { %v1107_v56 = vsel %vm979_vm12, %v815_v40, %v1043_v49  ;;  %v4145_v38 = vld [vmem:[%s6974_s5 + $0x24c] sm:$0xf0]  ;;  %v3924_v40 = vor.u32 %v4361_v31, %v3921_v35  ;;  %2266 = vmatpush.bf16.msra.mxu3 %v3984_v34  ;;  %v3893_v49 = vld [vmem:[%s6974_s5 + $0x54] sm:$0xf0] }
 0x16b   : > { %v903_v46 = vpop.f32.mrf.mxu2  ;;  %2019 = vmatmul.bf16.gmra.mxu0 %v5404_v39  ;;  %v4148_v41 = vor.u32 %v4417_v36, %v4145_v38 }
 0x16c   : > { %v904_v54 = vadd.f32 %v903_v46, %v5309_v33  ;;  %2090 = vmatpush.bf16.msra.mxu1 %v3924_v40  ;;  %v568_v14 = vpop.f32.mrf.mxu3  ;;  %v665_v40 = vsel %vm601_vm7, %v567_v20, %v633_v30 }
 0x16d   : > { %v816_v47 = vpop.f32.mrf.mxu1  ;;  %2179 = vmatpush.bf16.msra.mxu2 %v4148_v41  ;;  %v569_v21 = vadd.f32 %v5139_v1, %v568_v14 }
 0x16e   : > { %v817_v50 = vadd.f32 %v816_v47, %v5298_v24  ;;  %v1044_v6 = vmul.f32 0.01, %v904_v54  ;;  %vm980_vm15 = vcmp.gt.f32.partialorder %v904_v54, 0.0  ;;  %v4354_v47 = vld [vmem:[%s6974_s5 + $0x3c] sm:$0xf] }
 0x16f   : > { %v634_v31 = vmul.f32 0.01, %v569_v21  ;;  %vm602_vm9 = vcmp.gt.f32.partialorder %v569_v21, 0.0 }
 0x170   : > { %vm981_vm14 = vcmp.gt.f32.partialorder %v817_v50, 0.0  ;;  %v1045_v55 = vmul.f32 0.01, %v817_v50  ;;  %v1108_v17 = vsel %vm980_vm15, %v904_v54, %v1044_v6 }
 0x171   : > { %v666_v41 = vsel %vm602_vm9, %v569_v21, %v634_v31  ;;  %v5548_v31 = vld [vmem:[%s6975_s6] sm:$0x7f] }
 0x172   : > { %v1109_v57 = vsel %vm981_vm14, %v817_v50, %v1045_v55  ;;  %v4410_v50 = vld [vmem:[%s6974_s5 + $0x1fc] sm:$0xf]  ;;  %v3896_v55 = vor.u32 %v4354_v47, %v3893_v49  ;;  %v682_v49 = vpack.c.bf16 %v666_v41, %v665_v40 }
 0x173   : > { %v5424_v61 = vpack.c.bf16 %v1109_v57, %v1107_v56  ;;  %v905_v62 = vpop.f32.mrf.mxu2  ;;  %v4120_v56 = vor.u32 %v4410_v50, %v4117_v52 }
 0x174   : > { %v906_v8 = vadd.f32 %v905_v62, %v5309_v33  ;;  %2091 = vmatpush.bf16.msra.mxu1 %v3896_v55  ;;  %v3865_v62 = vld [vmem:[%s6974_s5 + $0x1c] sm:$0xf0]  ;;  %v3955_v55 = vld [vmem:[%s6974_s5 + $0xb0] sm:$0xf] }
 0x175   : > { %v819_v37 = vpop.f32.mrf.mxu1  ;;  %1935 = vmatmul.bf16.gmra.mxu3 %v5424_v61  ;;  %2180 = vmatpush.bf16.msra.mxu2 %v4120_v56  ;;  %v3868_v6 = vor.u32 %v4347_v60, %v3865_v62  ;;  %v4372_v56 = vld [vmem:[%s6974_s5 + $0xc8] sm:$0xf0] }
 0x176   : > { %vm982_vm0 = vcmp.gt.f32.partialorder %v906_v8, 0.0  ;;  %v1046_v51 = vmul.f32 0.01, %v906_v8  ;;  %v820_v27 = vadd.f32 %v819_v37, %v5298_v24 }
 0x178   : > { %v1110_v19 = vsel %vm982_vm0, %v906_v8, %v1046_v51  ;;  %858 = vmatmul.bf16.gmra.mxu1 %v680_v11  ;;  %947 = vmatmul.bf16.gmra.mxu2 %v680_v11  ;;  %vm983_vm2 = vcmp.gt.f32.partialorder %v820_v27, 0.0  ;;  %v1047_v7 = vmul.f32 0.01, %v820_v27  ;;  %v4089_v8 = vld [vmem:[%s6974_s5 + $0x1dc] sm:$0xf0] }
 0x179   : > { %v5447_v22 = vpack.c.bf16 %v1110_v19, %v1108_v17  ;;  %v4092_v37 = vor.u32 %v4403_v63, %v4089_v8  ;;  %2092 = vmatpush.bf16.msra.mxu1 %v3868_v6 }
 0x17a   : > { %v1111_v57 = vsel %vm983_vm2, %v820_v27, %v1047_v7 }
 0x17b   : > { %v908_v32 = vpop.f32.mrf.mxu2  ;;  %2024 = vmatmul.bf16.gmra.mxu0 %v5447_v22  ;;  %2181 = vmatpush.bf16.msra.mxu2 %v4092_v37 }
 0x17c   : > { %v909_v53 = vadd.f32 %v908_v32, %v5309_v33 }
 0x17d   : > { %v821_v45 = vpop.f32.mrf.mxu1 }
 0x17e   : > { %v822_v46 = vadd.f32 %v821_v45, %v5298_v24  ;;  %v1048_v9 = vmul.f32 0.01, %v909_v53  ;;  %vm984_vm5 = vcmp.gt.f32.partialorder %v909_v53, 0.0 }
 0x180   : > { %vm985_vm4 = vcmp.gt.f32.partialorder %v822_v46, 0.0  ;;  %v1049_v54 = vmul.f32 0.01, %v822_v46  ;;  %v1112_v13 = vsel %vm984_vm5, %v909_v53, %v1048_v9 }
 0x182   : > { %v1113_v58 = vsel %vm985_vm4, %v822_v46, %v1049_v54  ;;  %v4208_v46 = vor.u32 %v4435_v43, %v4207_v42  ;;  %v5561_v43 = vperm.slane %v5548_v31, 0 }
 0x183   : > { %v5494_v0 = vpack.c.bf16 %v1113_v58, %v1111_v57  ;;  %v910_v3 = vpop.f32.mrf.mxu2  ;;  %v3956_v58 = vor.u32 %v4372_v56, %v3955_v55  ;;  %v4365_v55 = vld [vmem:[%s6974_s5 + $0x90] sm:$0xf0] }
 0x184   : > { %v911_v10 = vadd.f32 %v910_v3, %v5309_v33  ;;  %2355 = vmatpush.bf16.msra.mxu0 %v4208_v46 }
 0x185   : > { %v824_v51 = vpop.f32.mrf.mxu1  ;;  %1940 = vmatmul.bf16.gmra.mxu3 %v5494_v0 }
 0x186   : > { %vm986_vm6 = vcmp.gt.f32.partialorder %v911_v10, 0.0  ;;  %v1050_v11 = vmul.f32 0.01, %v911_v10  ;;  %v825_v19 = vadd.f32 %v824_v51, %v5298_v24  ;;  %2267 = vmatpush.bf16.msra.mxu3 %v3956_v58 }
 0x188   : > { %v1114_v15 = vsel %vm986_vm6, %v911_v10, %v1050_v11  ;;  %863 = vmatmul.bf16.gmra.mxu1 %v681_v12  ;;  %952 = vmatmul.bf16.gmra.mxu2 %v681_v12  ;;  %v1051_v27 = vmul.f32 0.01, %v825_v19  ;;  %vm987_vm8 = vcmp.gt.f32.partialorder %v825_v19, 0.0 }
 0x189   : > { %v5503_v17 = vpack.c.bf16 %v1114_v15, %v1112_v13 }
 0x18a   : > { %v1115_v35 = vsel %vm987_vm8, %v825_v19, %v1051_v27 }
 0x18b   : > { %v913_v23 = vpop.f32.mrf.mxu2  ;;  %2029 = vmatmul.bf16.gmra.mxu0 %v5503_v17 }
 0x18c   : > { %v914_v32 = vadd.f32 %v913_v23, %v5309_v33 }
 0x18d   : > { %v826_v26 = vpop.f32.mrf.mxu1 }
 0x18e   : > { %v827_v28 = vadd.f32 %v826_v26, %v5298_v24  ;;  %v1052_v45 = vmul.f32 0.01, %v914_v32  ;;  %vm988_vm11 = vcmp.gt.f32.partialorder %v914_v32, 0.0 }
 0x190   : > { %vm989_vm10 = vcmp.gt.f32.partialorder %v827_v28, 0.0  ;;  %v1053_v34 = vmul.f32 0.01, %v827_v28  ;;  %v1116_v50 = vsel %vm988_vm11, %v914_v32, %v1052_v45 }
 0x192   : > { %v1117_v36 = vsel %vm989_vm10, %v827_v28, %v1053_v34 }
 0x193   : > { %v5511_v38 = vpack.c.bf16 %v1117_v36, %v1115_v35  ;;  %v915_v1 = vpop.f32.mrf.mxu2  ;;  %v4179_v35 = vld [vmem:[%s6974_s5 + $0x270] sm:$0xf]  ;;  %v4428_v36 = vld [vmem:[%s6974_s5 + $0x288] sm:$0xf0] }
 0x194   : > { %v916_v7 = vadd.f32 %v915_v1, %v5309_v33  ;;  %v4180_v41 = vor.u32 %v4428_v36, %v4179_v35 }
 0x195   : > { %6997 = vst [vmem:[#allocation4_spill] sm:$0xff] %v5511_v38  ;;  %v829_v18 = vpop.f32.mrf.mxu1  ;;  %1945 = vmatmul.bf16.gmra.mxu3 %v5511_v38 }
 0x196   : > { %vm990_vm12 = vcmp.gt.f32.partialorder %v916_v7, 0.0  ;;  %v1054_v47 = vmul.f32 0.01, %v916_v7  ;;  %v830_v54 = vadd.f32 %v829_v18, %v5298_v24  ;;  %2356 = vmatpush.bf16.msra.mxu0 %v4180_v41 }
 0x198   : > { %v1118_v52 = vsel %vm990_vm12, %v916_v7, %v1054_v47  ;;  %868 = vmatmul.bf16.gmra.mxu1 %v682_v49  ;;  %957 = vmatmul.bf16.gmra.mxu2 %v682_v49  ;;  %v1055_v62 = vmul.f32 0.01, %v830_v54  ;;  %vm991_vm13 = vcmp.gt.f32.partialorder %v830_v54, 0.0 }
 0x199   : > { %v5521_v53 = vpack.c.bf16 %v1118_v52, %v1116_v50 }
 0x19a   : > { %v1119_v5 = vsel %vm991_vm13, %v830_v54, %v1055_v62  ;;  %v3927_v54 = vld [vmem:[%s6974_s5 + $0x78] sm:$0xf] }
 0x19b   : > { %6998 = vst [vmem:[#allocation5_spill] sm:$0xff] %v5521_v53  ;;  %v918_v57 = vpop.f32.mrf.mxu2  ;;  %2034 = vmatmul.bf16.gmra.mxu0 %v5521_v53  ;;  %v3928_v58 = vor.u32 %v4365_v55, %v3927_v54 }
 0x19c   : > { %v919_v3 = vadd.f32 %v918_v57, %v5309_v33 }
 0x19d   : > { %v831_v60 = vpop.f32.mrf.mxu1  ;;  %2268 = vmatpush.bf16.msra.mxu3 %v3928_v58  ;;  %v4421_v58 = vld [vmem:[%s6974_s5 + $0x250] sm:$0xf0] }
 0x19e   : > { %v832_v63 = vadd.f32 %v831_v60, %v5298_v24  ;;  %v1056_v10 = vmul.f32 0.01, %v919_v3  ;;  %vm992_vm15 = vcmp.gt.f32.partialorder %v919_v3, 0.0 }
 0x1a0   : > { %vm993_vm14 = vcmp.gt.f32.partialorder %v832_v63, 0.0  ;;  %v1057_v4 = vmul.f32 0.01, %v832_v63  ;;  %v1120_v12 = vsel %vm992_vm15, %v919_v3, %v1056_v10 }
 0x1a2   : > { %v1121_v6 = vsel %vm993_vm14, %v832_v63, %v1057_v4 }
 0x1a3   : > { %v5533_v8 = vpack.c.bf16 %v1121_v6, %v1119_v5  ;;  %v920_v9 = vpop.f32.mrf.mxu2 }
 0x1a4   : > { %v921_v37 = vadd.f32 %v920_v9, %v5309_v33 }
 0x1a5   : > { %6999 = vst [vmem:[#allocation6_spill] sm:$0xff] %v5533_v8  ;;  %v834_v51 = vpop.f32.mrf.mxu1  ;;  %1950 = vmatmul.bf16.gmra.mxu3 %v5533_v8 }
 0x1a6   : > { %vm994_vm0 = vcmp.gt.f32.partialorder %v921_v37, 0.0  ;;  %v1058_v11 = vmul.f32 0.01, %v921_v37  ;;  %v835_v14 = vadd.f32 %v834_v51, %v5298_v24 }
 0x1a8   : > { %v1122_v13 = vsel %vm994_vm0, %v921_v37, %v1058_v11  ;;  %2093 = vmatmul.bf16.vlgmr.msra.gmra.mxu1 %v5313_v44  ;;  %2182 = vmatmul.bf16.vlgmr.msra.gmra.mxu2 %v5323_v59  ;;  %v1059_v21 = vmul.f32 0.01, %v835_v14  ;;  %vm995_vm1 = vcmp.gt.f32.partialorder %v835_v14, 0.0 }
 0x1a9   : > { %v5539_v15 = vpack.c.bf16 %v1122_v13, %v1120_v12 }
 0x1aa   : > { %v1123_v28 = vsel %vm995_vm1, %v835_v14, %v1059_v21 }
 0x1ab   : > { %7000 = vst [vmem:[#allocation7_spill] sm:$0xff] %v5539_v15  ;;  %v923_v19 = vpop.f32.mrf.mxu2  ;;  %2039 = vmatmul.bf16.gmra.mxu0 %v5539_v15 }
 0x1ac   : > { %v924_v26 = vadd.f32 %v923_v19, %v5309_v33 }
 0x1ad   : > { %v836_v20 = vpop.f32.mrf.mxu1 }
 0x1ae   : > { %v837_v23 = vadd.f32 %v836_v20, %v5298_v24  ;;  %v1060_v1 = vmul.f32 0.01, %v924_v26  ;;  %vm996_vm3 = vcmp.gt.f32.partialorder %v924_v26, 0.0 }
 0x1b0   : > { %vm997_vm2 = vcmp.gt.f32.partialorder %v837_v23, 0.0  ;;  %v1061_v27 = vmul.f32 0.01, %v837_v23  ;;  %v1124_v7 = vsel %vm996_vm3, %v924_v26, %v1060_v1 }
 0x1b2   : > { %v1125_v30 = vsel %vm997_vm2, %v837_v23, %v1061_v27 }
 0x1b3   : > { %v5550_v32 = vpack.c.bf16 %v1125_v30, %v1123_v28  ;;  %v925_v34 = vpop.f32.mrf.mxu2 }
 0x1b4   : > { %v926_v40 = vadd.f32 %v925_v34, %v5309_v33 }
 0x1b5   : > { %v839_v42 = vpop.f32.mrf.mxu1  ;;  %1955 = vmatmul.bf16.gmra.mxu3 %v5550_v32 }
 0x1b6   : > { %vm998_vm4 = vcmp.gt.f32.partialorder %v926_v40, 0.0  ;;  %v1062_v45 = vmul.f32 0.01, %v926_v40  ;;  %v840_v52 = vadd.f32 %v839_v42, %v5298_v24 }
 0x1b8   : > { %v1126_v46 = vsel %vm998_vm4, %v926_v40, %v1062_v45  ;;  %v1916_v18 = vpop.f32.mrf.mxu3  ;;  %v2005_v47 = vpop.f32.mrf.mxu0  ;;  %2098 = vmatmul.bf16.gmra.mxu1 %v5347_v16  ;;  %2187 = vmatmul.bf16.gmra.mxu2 %v5352_v29  ;;  %v1063_v62 = vmul.f32 0.01, %v840_v52  ;;  %vm999_vm5 = vcmp.gt.f32.partialorder %v840_v52, 0.0 }
 0x1b9   : > { %v5565_v49 = vpack.c.bf16 %v1126_v46, %v1124_v7  ;;  %v1917_v50 = vadd.f32 %v1916_v18, %v5561_v43 }
 0x1ba   : > { %v1127_v10 = vsel %vm999_vm5, %v840_v52, %v1063_v62 }
 0x1bb   : > { %v5575_v56 = vadd.f32 %v2005_v47, %v1917_v50  ;;  %v928_v57 = vpop.f32.mrf.mxu2  ;;  %2044 = vmatmul.bf16.gmra.mxu0 %v5565_v49 }
 0x1bc   : > { %v929_v3 = vadd.f32 %v928_v57, %v5309_v33  ;;  %v4151_v57 = vld [vmem:[%s6974_s5 + $0x238] sm:$0xf] }
 0x1bd   : > { %v841_v60 = vpop.f32.mrf.mxu1  ;;  %4489 = vtanh.f32 %v5575_v56 }
 0x1be   : > { %v842_v63 = vadd.f32 %v841_v60, %v5298_v24  ;;  %v1064_v13 = vmul.f32 0.01, %v929_v3  ;;  %vm1000_vm7 = vcmp.gt.f32.partialorder %v929_v3, 0.0 }
 0x1c0   : > { %vm1001_vm6 = vcmp.gt.f32.partialorder %v842_v63, 0.0  ;;  %v1065_v4 = vmul.f32 0.01, %v842_v63  ;;  %v1918_v5 = vpop.f32.mrf.mxu3  ;;  %v2007_v6 = vpop.f32.mrf.mxu0  ;;  %v1128_v21 = vsel %vm1000_vm7, %v929_v3, %v1064_v13 }
 0x1c1   : > { %v1919_v9 = vadd.f32 %v1918_v5, %v5561_v43 }
 0x1c2   : > { %v1129_v37 = vsel %vm1001_vm6, %v842_v63, %v1065_v4  ;;  %v4152_v63 = vor.u32 %v4421_v58, %v4151_v57 }
 0x1c3   : > { %v5581_v51 = vpack.c.bf16 %v1129_v37, %v1127_v10  ;;  %v5583_v11 = vadd.f32 %v2007_v6, %v1919_v9  ;;  %v930_v12 = vpop.f32.mrf.mxu2  ;;  %v4490_v56 = vpop.eup %4489 }
 0x1c4   : > { %v931_v14 = vadd.f32 %v930_v12, %v5309_v33  ;;  %2357 = vmatpush.bf16.msra.mxu0 %v4152_v63 }
 0x1c5   : > { %v844_v19 = vpop.f32.mrf.mxu1  ;;  %1960 = vmatmul.bf16.gmra.mxu3 %v5581_v51 }
 0x1c6   : > { %vm1002_vm8 = vcmp.gt.f32.partialorder %v931_v14, 0.0  ;;  %v1066_v20 = vmul.f32 0.01, %v931_v14  ;;  %v845_v34 = vadd.f32 %v844_v19, %v5298_v24  ;;  %v4358_v19 = vld [vmem:[%s6974_s5 + $0x58] sm:$0xf0] }
 0x1c8   : > { %v1130_v23 = vsel %vm1002_vm8, %v931_v14, %v1066_v20  ;;  %v1921_v26 = vpop.f32.mrf.mxu3  ;;  %v2010_v27 = vpop.f32.mrf.mxu0  ;;  %2103 = vmatmul.bf16.gmra.mxu1 %v5368_v48  ;;  %2192 = vmatmul.bf16.gmra.mxu2 %v5378_v2  ;;  %v1067_v40 = vmul.f32 0.01, %v845_v34  ;;  %vm1003_vm9 = vcmp.gt.f32.partialorder %v845_v34, 0.0  ;;  %v3899_v14 = vld [vmem:[%s6974_s5 + $0x40] sm:$0xf] }
 0x1c9   : > { %v5589_v28 = vpack.c.bf16 %v1130_v23, %v1128_v21  ;;  %v1922_v30 = vadd.f32 %v1921_v26, %v5561_v43  ;;  %v3900_v23 = vor.u32 %v4358_v19, %v3899_v14 }
 0x1ca   : > { %v1131_v47 = vsel %vm1003_vm9, %v845_v34, %v1067_v40 }
 0x1cb   : > { %v5593_v35 = vadd.f32 %v2010_v27, %v1922_v30  ;;  %v933_v36 = vpop.f32.mrf.mxu2  ;;  %2049 = vmatmul.bf16.gmra.mxu0 %v5589_v28  ;;  %2269 = vmatpush.bf16.msra.mxu3 %v3900_v23 }
 0x1cc   : > { %v934_v42 = vadd.f32 %v933_v36, %v5309_v33 }
 0x1cd   : > { %v846_v1 = vpop.f32.mrf.mxu1 }
 0x1ce   : > { %v847_v41 = vadd.f32 %v846_v1, %v5298_v24  ;;  %v1068_v60 = vmul.f32 0.01, %v934_v42  ;;  %vm1004_vm11 = vcmp.gt.f32.partialorder %v934_v42, 0.0 }
 0x1d0   : > { %vm1005_vm10 = vcmp.gt.f32.partialorder %v847_v41, 0.0  ;;  %v1069_v45 = vmul.f32 0.01, %v847_v41  ;;  %v1923_v7 = vpop.f32.mrf.mxu3  ;;  %v2012_v46 = vpop.f32.mrf.mxu0  ;;  %v1132_v5 = vsel %vm1004_vm11, %v934_v42, %v1068_v60 }
 0x1d1   : > { %v1924_v18 = vadd.f32 %v1923_v7, %v5561_v43 }
 0x1d2   : > { %v1133_v50 = vsel %vm1005_vm10, %v847_v41, %v1069_v45 }
 0x1d3   : > { %v5599_v52 = vpack.c.bf16 %v1133_v50, %v1131_v47  ;;  %v5601_v54 = vadd.f32 %v2012_v46, %v1924_v18  ;;  %v935_v55 = vpop.f32.mrf.mxu2 }
 0x1d4   : > { %v936_v62 = vadd.f32 %v935_v55, %v5309_v33 }
 0x1d5   : > { %v849_v3 = vpop.f32.mrf.mxu1  ;;  %1965 = vmatmul.bf16.gmra.mxu3 %v5599_v52 }
 0x1d6   : > { %vm1006_vm12 = vcmp.gt.f32.partialorder %v936_v62, 0.0  ;;  %v1070_v4 = vmul.f32 0.01, %v936_v62  ;;  %v850_v13 = vadd.f32 %v849_v3, %v5298_v24 }
 0x1d8   : > { %v1134_v6 = vsel %vm1006_vm12, %v936_v62, %v1070_v4  ;;  %v1926_v9 = vpop.f32.mrf.mxu3  ;;  %v2015_v10 = vpop.f32.mrf.mxu0  ;;  %2108 = vmatmul.bf16.gmra.mxu1 %v5399_v25  ;;  %2197 = vmatmul.bf16.gmra.mxu2 %v5404_v39  ;;  %v1071_v27 = vmul.f32 0.01, %v850_v13  ;;  %vm1007_vm13 = vcmp.gt.f32.partialorder %v850_v13, 0.0 }
 0x1d9   : > { %v5613_v37 = vpack.c.bf16 %v1134_v6, %v1132_v5  ;;  %v1927_v12 = vadd.f32 %v1926_v9, %v5561_v43 }
 0x1da   : > { %v1135_v42 = vsel %vm1007_vm13, %v850_v13, %v1071_v27 }
 0x1db   : > { %v5623_v20 = vadd.f32 %v2015_v10, %v1927_v12  ;;  %v938_v21 = vpop.f32.mrf.mxu2  ;;  %2054 = vmatmul.bf16.gmra.mxu0 %v5613_v37 }
 0x1dc   : > { %v939_v34 = vadd.f32 %v938_v21, %v5309_v33 }
 0x1dd   : > { %v851_v26 = vpop.f32.mrf.mxu1 }
 0x1de   : > { %v852_v30 = vadd.f32 %v851_v26, %v5298_v24  ;;  %v1072_v47 = vmul.f32 0.01, %v939_v34  ;;  %vm1008_vm15 = vcmp.gt.f32.partialorder %v939_v34, 0.0 }
 0x1e0   : > { %vm1009_vm14 = vcmp.gt.f32.partialorder %v852_v30, 0.0  ;;  %v1073_v36 = vmul.f32 0.01, %v852_v30  ;;  %v1928_v1 = vpop.f32.mrf.mxu3  ;;  %v2017_v40 = vpop.f32.mrf.mxu0  ;;  %v1136_v58 = vsel %vm1008_vm15, %v939_v34, %v1072_v47 }
 0x1e1   : > { %v1929_v41 = vadd.f32 %v1928_v1, %v5561_v43 }
 0x1e2   : > { %v1137_v45 = vsel %vm1009_vm14, %v852_v30, %v1073_v36 }
 0x1e3   : > { %v5629_v7 = vpack.c.bf16 %v1137_v45, %v1135_v42  ;;  %v5631_v46 = vadd.f32 %v2017_v40, %v1929_v41  ;;  %v940_v18 = vpop.f32.mrf.mxu2  ;;  %v4123_v40 = vld [vmem:[%s6974_s5 + $0x200] sm:$0xf]  ;;  %v4414_v41 = vld [vmem:[%s6974_s5 + $0x218] sm:$0xf0] }
 0x1e4   : > { %v941_v50 = vadd.f32 %v940_v18, %v5309_v33  ;;  %v4124_v18 = vor.u32 %v4414_v41, %v4123_v40 }
 0x1e5   : > { %v854_v55 = vpop.f32.mrf.mxu1  ;;  %1970 = vmatmul.bf16.gmra.mxu3 %v5629_v7 }
 0x1e6   : > { %vm1010_vm0 = vcmp.gt.f32.partialorder %v941_v50, 0.0  ;;  %v1074_v57 = vmul.f32 0.01, %v941_v50  ;;  %v855_v5 = vadd.f32 %v854_v55, %v5298_v24  ;;  %2358 = vmatpush.bf16.msra.mxu0 %v4124_v18 }
 0x1e8   : > { %v1138_v60 = vsel %vm1010_vm0, %v941_v50, %v1074_v57  ;;  %v1931_v62 = vpop.f32.mrf.mxu3  ;;  %v2020_v63 = vpop.f32.mrf.mxu0  ;;  %2113 = vmatmul.bf16.gmra.mxu1 %v5424_v61  ;;  %2202 = vmatmul.bf16.gmra.mxu2 %v5447_v22  ;;  %v1075_v12 = vmul.f32 0.01, %v855_v5  ;;  %vm1011_vm1 = vcmp.gt.f32.partialorder %v855_v5, 0.0 }
 0x1e9   : > { %v5637_v3 = vpack.c.bf16 %v1138_v60, %v1136_v58  ;;  %v1932_v4 = vadd.f32 %v1931_v62, %v5561_v43 }
 0x1ea   : > { %v1139_v27 = vsel %vm1011_vm1, %v855_v5, %v1075_v12  ;;  %v3871_v5 = vld [vmem:[%s6974_s5 + $0x8] sm:$0xf]  ;;  %vm3508_vm1 = vcmask 125952  }
 0x1eb   : > { %7001 = vst [vmem:[#allocation8_spill] sm:$0xff] %v5637_v3  ;;  %v5641_v6 = vadd.f32 %v2020_v63, %v1932_v4  ;;  %v943_v9 = vpop.f32.mrf.mxu2  ;;  %2059 = vmatmul.bf16.gmra.mxu0 %v5637_v3 }
 0x1ec   : > { %v944_v14 = vadd.f32 %v943_v9, %v5309_v33  ;;  %v4351_v9 = vld [vmem:[%s6974_s5 + $0x20] sm:$0xf0] }
 0x1ed   : > { %v856_v10 = vpop.f32.mrf.mxu1 }
 0x1ee   : > { %v857_v13 = vadd.f32 %v856_v10, %v5298_v24  ;;  %v1076_v42 = vmul.f32 0.01, %v944_v14  ;;  %vm1012_vm3 = vcmp.gt.f32.partialorder %v944_v14, 0.0 }
 0x1f0   : > { %vm1013_vm2 = vcmp.gt.f32.partialorder %v857_v13, 0.0  ;;  %v1077_v19 = vmul.f32 0.01, %v857_v13  ;;  %v1933_v21 = vpop.f32.mrf.mxu3  ;;  %v2022_v23 = vpop.f32.mrf.mxu0  ;;  %v1140_v55 = vsel %vm1012_vm3, %v944_v14, %v1076_v42 }
 0x1f1   : > { %v1934_v26 = vadd.f32 %v1933_v21, %v5561_v43 }
 0x1f2   : > { %v1141_v30 = vsel %vm1013_vm2, %v857_v13, %v1077_v19  ;;  %v3872_v13 = vor.u32 %v4351_v9, %v3871_v5 }
 0x1f3   : > { %v5647_v34 = vpack.c.bf16 %v1141_v30, %v1139_v27  ;;  %v5649_v36 = vadd.f32 %v2022_v23, %v1934_v26  ;;  %v945_v1 = vpop.f32.mrf.mxu2 }
 0x1f4   : > { %v946_v45 = vadd.f32 %v945_v1, %v5309_v33  ;;  %2270 = vmatpush.bf16.msra.mxu3 %v3872_v13  ;;  %v4293_v13 = vld [vmem:[%s6974_s5 + $0x36c] sm:$0xf0] }
 0x1f5   : > { %v859_v47 = vpop.f32.mrf.mxu1  ;;  %1975 = vmatmul.bf16.gmra.mxu3 %v5647_v34 }
 0x1f6   : > { %vm1014_vm4 = vcmp.gt.f32.partialorder %v946_v45, 0.0  ;;  %v1078_v50 = vmul.f32 0.01, %v946_v45  ;;  %v860_v4 = vadd.f32 %v859_v47, %v5298_v24 }
 0x1f8   : > { %v1142_v57 = vsel %vm1014_vm4, %v946_v45, %v1078_v50  ;;  %v1936_v58 = vpop.f32.mrf.mxu3  ;;  %v2025_v60 = vpop.f32.mrf.mxu0  ;;  %2118 = vmatmul.bf16.gmra.mxu1 %v5494_v0  ;;  %2207 = vmatmul.bf16.gmra.mxu2 %v5503_v17  ;;  %v1079_v19 = vmul.f32 0.01, %v860_v4  ;;  %vm1015_vm5 = vcmp.gt.f32.partialorder %v860_v4, 0.0 }
 0x1f9   : > { %v5661_v62 = vpack.c.bf16 %v1142_v57, %v1140_v55  ;;  %v1937_v63 = vadd.f32 %v1936_v58, %v5561_v43 }
 0x1fa   : > { %v1143_v40 = vsel %vm1015_vm5, %v860_v4, %v1079_v19 }
 0x1fb   : > { %7002 = vst [vmem:[#allocation9_spill] sm:$0xff] %v5661_v62  ;;  %v5671_v10 = vadd.f32 %v2025_v60, %v1937_v63  ;;  %v948_v12 = vpop.f32.mrf.mxu2  ;;  %2064 = vmatmul.bf16.gmra.mxu0 %v5661_v62 }
 0x1fc   : > { %v949_v23 = vadd.f32 %v948_v12, %v5309_v33  ;;  %v4453_v12 = vld [vmem:[%s6974_s5 + $0x354] sm:$0xf] }
 0x1fd   : > { %v861_v14 = vpop.f32.mrf.mxu1  ;;  %v4296_v19 = vor.u32 %v4453_v12, %v4293_v13  ;;  %v4095_v12 = vld [vmem:[%s6974_s5 + $0x1c8] sm:$0xf]  ;;  %v4407_v13 = vld [vmem:[%s6974_s5 + $0x1e0] sm:$0xf0] }
 0x1fe   : > { %v862_v21 = vadd.f32 %v861_v14, %v5298_v24  ;;  %v1080_v47 = vmul.f32 0.01, %v949_v23  ;;  %vm1016_vm7 = vcmp.gt.f32.partialorder %v949_v23, 0.0 }
 0x1ff   : > { %2530 = vmatpush.bf16.msrb.mxu2 %v4296_v19  ;;  %v4096_v19 = vor.u32 %v4407_v13, %v4095_v12 }
 0x200   : > { %vm1017_vm6 = vcmp.gt.f32.partialorder %v862_v21, 0.0  ;;  %v1081_v26 = vmul.f32 0.01, %v862_v21  ;;  %v1938_v27 = vpop.f32.mrf.mxu3  ;;  %v2027_v30 = vpop.f32.mrf.mxu0  ;;  %v1144_v58 = vsel %vm1016_vm7, %v949_v23, %v1080_v47 }
 0x201   : > { %v1939_v1 = vadd.f32 %v1938_v27, %v5561_v43  ;;  %2359 = vmatpush.bf16.msra.mxu0 %v4096_v19 }
 0x202   : > { %v1145_v41 = vsel %vm1017_vm6, %v862_v21, %v1081_v26 }
 0x203   : > { %v5677_v42 = vpack.c.bf16 %v1145_v41, %v1143_v40  ;;  %v5679_v45 = vadd.f32 %v2027_v30, %v1939_v1  ;;  %v950_v18 = vpop.f32.mrf.mxu2 }
 0x204   : > { %v951_v50 = vadd.f32 %v950_v18, %v5309_v33 }
 0x205   : > { %7003 = vst [vmem:[#allocation10_spill] sm:$0xff] %v5677_v42  ;;  %v864_v55 = vpop.f32.mrf.mxu1  ;;  %1980 = vmatmul.bf16.gmra.mxu3 %v5677_v42 }
 0x206   : > { %vm1018_vm8 = vcmp.gt.f32.partialorder %v951_v50, 0.0  ;;  %v1082_v57 = vmul.f32 0.01, %v951_v50  ;;  %v865_v14 = vadd.f32 %v864_v55, %v5298_v24 }
 0x208   : > { %v1146_v60 = vsel %vm1018_vm8, %v951_v50, %v1082_v57  ;;  %v1941_v63 = vpop.f32.mrf.mxu3  ;;  %v2030_v5 = vpop.f32.mrf.mxu0  ;;  %2123 = vmatmul.bf16.gmra.mxu1 %v5511_v38  ;;  %2212 = vmatmul.bf16.gmra.mxu2 %v5521_v53  ;;  %v1083_v27 = vmul.f32 0.01, %v865_v14  ;;  %vm1019_vm9 = vcmp.gt.f32.partialorder %v865_v14, 0.0 }
 0x209   : > { %v5685_v4 = vpack.c.bf16 %v1146_v60, %v1144_v58  ;;  %v1942_v9 = vadd.f32 %v1941_v63, %v5561_v43 }
 0x20a   : > { %v1147_v50 = vsel %vm1019_vm9, %v865_v14, %v1083_v27 }
 0x20b   : > { %7004 = vst [vmem:[#allocation11_spill] sm:$0xff] %v5685_v4  ;;  %v5695_v21 = vadd.f32 %v2030_v5, %v1942_v9  ;;  %v953_v23 = vpop.f32.mrf.mxu2  ;;  %2069 = vmatmul.bf16.gmra.mxu0 %v5685_v4 }
 0x20c   : > { %v954_v1 = vadd.f32 %v953_v23, %v5309_v33 }
 0x20d   : > { %v866_v26 = vpop.f32.mrf.mxu1 }
 0x20e   : > { %v867_v30 = vadd.f32 %v866_v26, %v5298_v24  ;;  %v1084_v63 = vmul.f32 0.01, %v954_v1  ;;  %vm1020_vm11 = vcmp.gt.f32.partialorder %v954_v1, 0.0 }
 0x210   : > { %vm1021_vm10 = vcmp.gt.f32.partialorder %v867_v30, 0.0  ;;  %v1085_v40 = vmul.f32 0.01, %v867_v30  ;;  %v1943_v41 = vpop.f32.mrf.mxu3  ;;  %v2032_v18 = vpop.f32.mrf.mxu0  ;;  %v1148_v23 = vsel %vm1020_vm11, %v954_v1, %v1084_v63  ;;  %v4075_v63 = vld [vmem:[%s6974_s5 + $0x198] sm:$0xf] }
 0x211   : > { %v1944_v47 = vadd.f32 %v1943_v41, %v5561_v43 }
 0x212   : > { %v1149_v55 = vsel %vm1021_vm10, %v867_v30, %v1085_v40 }
 0x213   : > { %v5701_v57 = vpack.c.bf16 %v1149_v55, %v1147_v50  ;;  %v5703_v58 = vadd.f32 %v2032_v18, %v1944_v47  ;;  %v955_v60 = vpop.f32.mrf.mxu2 }
 0x214   : > { %v956_v5 = vadd.f32 %v955_v60, %v5309_v33 }
 0x215   : > { %v869_v9 = vpop.f32.mrf.mxu1  ;;  %1985 = vmatmul.bf16.gmra.mxu3 %v5701_v57 }
 0x216   : > { %vm1022_vm12 = vcmp.gt.f32.partialorder %v956_v5, 0.0  ;;  %v1086_v14 = vmul.f32 0.01, %v956_v5  ;;  %v870_v18 = vadd.f32 %v869_v9, %v5298_v24 }
 0x218   : > { %v1150_v26 = vsel %vm1022_vm12, %v956_v5, %v1086_v14  ;;  %v1946_v27 = vpop.f32.mrf.mxu3  ;;  %v2035_v30 = vpop.f32.mrf.mxu0  ;;  %2128 = vmatmul.bf16.gmra.mxu1 %v5533_v8  ;;  %2217 = vmatmul.bf16.gmra.mxu2 %v5539_v15  ;;  %v1087_v55 = vmul.f32 0.01, %v870_v18  ;;  %vm1023_vm13 = vcmp.gt.f32.partialorder %v870_v18, 0.0  ;;  %v4401_v5 = vld [vmem:[%s6974_s5 + $0x1b0] sm:$0xf0] }
 0x219   : > { %v5715_v40 = vpack.c.bf16 %v1150_v26, %v1148_v23  ;;  %v1947_v41 = vadd.f32 %v1946_v27, %v5561_v43  ;;  %v4076_v19 = vor.u32 %v4401_v5, %v4075_v63  ;;  %v5738_v63 = vperm.slane %v5548_v31, 1 }
 0x21a   : > { %v1151_v26 = vsel %vm1023_vm13, %v870_v18, %v1087_v55  ;;  %v4397_v18 = vld [vmem:[%s6974_s5 + $0x194] sm:$0xf]  ;;  %v4069_v55 = vld [vmem:[%s6974_s5 + $0x1ac] sm:$0xf0] }
 0x21b   : > { %v5719_v47 = vadd.f32 %v2035_v30, %v1947_v41  ;;  %v958_v50 = vpop.f32.mrf.mxu2  ;;  %2074 = vmatmul.bf16.gmra.mxu0 %v5715_v40  ;;  %2619 = vmatpush.bf16.msrb.mxu3 %v4076_v19 }
 0x21c   : > { %v959_v9 = vadd.f32 %v958_v50, %v5309_v33 }
 0x21d   : > { %v871_v1 = vpop.f32.mrf.mxu1 }
 0x21e   : > { %v872_v60 = vadd.f32 %v871_v1, %v5298_v24  ;;  %v1088_v1 = vmul.f32 0.01, %v959_v9  ;;  %vm1024_vm15 = vcmp.gt.f32.partialorder %v959_v9, 0.0 }
 0x220   : > { %vm1025_vm14 = vcmp.gt.f32.partialorder %v872_v60, 0.0  ;;  %v1089_v12 = vmul.f32 0.01, %v872_v60  ;;  %v1948_v13 = vpop.f32.mrf.mxu3  ;;  %v2037_v14 = vpop.f32.mrf.mxu0 }
 0x221   : > { %v1949_v23 = vadd.f32 %v1948_v13, %v5561_v43  ;;  %v4072_v13 = vor.u32 %v4397_v18, %v4069_v55 }
 0x222   : > { %v1153_v24 = vsel %vm1025_vm14, %v872_v60, %v1089_v12  ;;  %v1152_v60 = vsel %vm1024_vm15, %v959_v9, %v1088_v1 }
 0x223   : > { %v5731_v27 = vpack.c.bf16 %v1153_v24, %v1151_v26  ;;  %v5733_v30 = vadd.f32 %v2037_v14, %v1949_v23  ;;  %v960_v41 = vpop.f32.mrf.mxu2  ;;  %2441 = vmatpush.bf16.msrb.mxu1 %v4072_v13  ;;  %v4446_v26 = vld [vmem:[%s6974_s5 + $0x31c] sm:$0xf]  ;;  %v4265_v24 = vld [vmem:[%s6974_s5 + $0x334] sm:$0xf0] }
 0x224   : > { %v961_v15 = vadd.f32 %v960_v41, %v5309_v33 }
 0x225   : > { %1990 = vmatmul.bf16.gmra.mxu3 %v5731_v27  ;;  %v2094_v50 = vpop.f32.mrf.mxu1 }
 0x226   : > { %vm1026_vm0 = vcmp.gt.f32.partialorder %v961_v15, 0.0  ;;  %v1090_v8 = vmul.f32 0.01, %v961_v15  ;;  %v2095_v19 = vadd.f32 %v2094_v50, %v5738_v63  ;;  %v4268_v50 = vor.u32 %v4446_v26, %v4265_v24 }
 0x228   : > { %v1154_v5 = vsel %vm1026_vm0, %v961_v15, %v1090_v8  ;;  %v1951_v33 = vpop.f32.mrf.mxu3  ;;  %v2040_v12 = vpop.f32.mrf.mxu0  ;;  %2133 = vmatmul.bf16.gmra.mxu1 %v5550_v32  ;;  %2222 = vmatmul.bf16.gmra.mxu2 %v5565_v49 }
 0x229   : > { %v5748_v31 = vpack.c.bf16 %v1154_v5, %v1152_v60  ;;  %v1952_v14 = vadd.f32 %v1951_v33, %v5561_v43  ;;  %2531 = vmatpush.bf16.msrb.mxu2 %v4268_v50 }
 0x22b   : > { %v5752_v23 = vadd.f32 %v2040_v12, %v1952_v14  ;;  %2079 = vmatmul.bf16.gmra.mxu0 %v5748_v31  ;;  %v2183_v8 = vpop.f32.mrf.mxu2 }
 0x22c   : > { %v2184_v15 = vadd.f32 %v2183_v8, %v2095_v19  ;;  %v4299_v19 = vld [vmem:[%s6974_s5 + $0x358] sm:$0xf]  ;;  %v4457_v8 = vld [vmem:[%s6974_s5 + $0x370] sm:$0xf0] }
 0x22d   : > { %v2096_v9 = vpop.f32.mrf.mxu1 }
 0x22e   : > { %4491 = vtanh.f32 %v2184_v15  ;;  %v2097_v55 = vadd.f32 %v2096_v9, %v5738_v63 }
 0x22f   : > { %4493 = vtanh.f32 %v5583_v11  ;;  %v4300_v11 = vor.u32 %v4457_v8, %v4299_v19 }
 0x230   : > { %v1953_v41 = vpop.f32.mrf.mxu3  ;;  %v2042_v1 = vpop.f32.mrf.mxu0 }
 0x231   : > { %v1954_v18 = vadd.f32 %v1953_v41, %v5561_v43  ;;  %2708 = vmatpush.bf16.msrb.mxu0 %v4300_v11 }
 0x233   : > { %v5765_v60 = vadd.f32 %v2042_v1, %v1954_v18  ;;  %v2185_v5 = vpop.f32.mrf.mxu2 }
 0x234   : > { %v4492_v33 = vpop.eup %4491  ;;  %v2186_v12 = vadd.f32 %v2185_v5, %v2097_v55 }
 0x235   : > { %v3377_v13 = vpack.c.bf16 %v4492_v33, %v4490_v56  ;;  %v2099_v14 = vpop.f32.mrf.mxu1  ;;  %2271 = vmatmul.bf16.vlgmr.msra.gmra.mxu3 %v5313_v44  ;;  %v4494_v41 = vpop.eup %4493  ;;  %v4047_v33 = vld [vmem:[%s6974_s5 + $0x160] sm:$0xf] }
 0x236   : > { %4495 = vtanh.f32 %v2186_v12  ;;  %v2100_v24 = vadd.f32 %v2099_v14, %v5738_v63  ;;  %v4394_v12 = vld [vmem:[%s6974_s5 + $0x178] sm:$0xf0] }
 0x237   : > { %3505 = vst [vmem:[%s5770_s29] sm:$0xff] %v3377_v13  ;;  %4497 = vtanh.f32 %v5593_v35  ;;  %v4048_v19 = vor.u32 %v4394_v12, %v4047_v33 }
 0x238   : > { %v1956_v15 = vpop.f32.mrf.mxu3  ;;  %v2045_v9 = vpop.f32.mrf.mxu0  ;;  %2138 = vmatmul.bf16.gmra.mxu1 %v5581_v51  ;;  %2227 = vmatmul.bf16.gmra.mxu2 %v5589_v28 }
 0x239   : > { %v1957_v26 = vadd.f32 %v1956_v15, %v5561_v43  ;;  %2620 = vmatpush.bf16.msrb.mxu3 %v4048_v19 }
 0x23b   : > { %v5785_v1 = vadd.f32 %v2045_v9, %v1957_v26  ;;  %v2188_v50 = vpop.f32.mrf.mxu2  ;;  %2360 = vmatmul.bf16.vlgmr.msra.gmra.mxu0 %v5323_v59 }
 0x23c   : > { %v4496_v18 = vpop.eup %4495  ;;  %v2189_v55 = vadd.f32 %v2188_v50, %v2100_v24 }
 0x23d   : > { %v3381_v56 = vpack.c.bf16 %v4496_v18, %v4494_v41  ;;  %v2101_v5 = vpop.f32.mrf.mxu1  ;;  %v4498_v15 = vpop.eup %4497  ;;  %v4390_v18 = vld [vmem:[%s6974_s5 + $0x15c] sm:$0xf] }
 0x23e   : > { %4499 = vtanh.f32 %v2189_v55  ;;  %v2102_v35 = vadd.f32 %v2101_v5, %v5738_v63  ;;  %v4041_v55 = vld [vmem:[%s6974_s5 + $0x174] sm:$0xf0] }
 0x23f   : > { %3510 = vst [vmem:[%s5770_s29 + $0x1c] sm:$0xff] %v3381_v56  ;;  %4501 = vtanh.f32 %v5601_v54  ;;  %v4044_v54 = vor.u32 %v4390_v18, %v4041_v55 }
 0x240   : > { %v1958_v13 = vpop.f32.mrf.mxu3  ;;  %v2047_v14 = vpop.f32.mrf.mxu0 }
 0x241   : > { %v1959_v8 = vadd.f32 %v1958_v13, %v5561_v43  ;;  %2442 = vmatpush.bf16.msrb.mxu1 %v4044_v54 }
 0x243   : > { %v5798_v9 = vadd.f32 %v2047_v14, %v1959_v8  ;;  %v2190_v11 = vpop.f32.mrf.mxu2 }
 0x244   : > { %v4500_v26 = vpop.eup %4499  ;;  %v2191_v24 = vadd.f32 %v2190_v11, %v2102_v35 }
 0x245   : > { %v3385_v41 = vpack.c.bf16 %v4500_v26, %v4498_v15  ;;  %v2104_v50 = vpop.f32.mrf.mxu1  ;;  %2276 = vmatmul.bf16.gmra.mxu3 %v5347_v16  ;;  %v4502_v13 = vpop.eup %4501  ;;  %v4439_v26 = vld [vmem:[%s6974_s5 + $0x2e4] sm:$0xf] }
 0x246   : > { %4503 = vtanh.f32 %v2191_v24  ;;  %v2105_v12 = vadd.f32 %v2104_v50, %v5738_v63  ;;  %v4237_v24 = vld [vmem:[%s6974_s5 + $0x2fc] sm:$0xf0] }
 0x247   : > { %3514 = vst [vmem:[%s5770_s29 + $0x38] sm:$0xff] %v3385_v41  ;;  %4505 = vtanh.f32 %v5623_v20  ;;  %v4240_v18 = vor.u32 %v4439_v26, %v4237_v24 }
 0x248   : > { %v1961_v56 = vpop.f32.mrf.mxu3  ;;  %v2050_v5 = vpop.f32.mrf.mxu0  ;;  %2143 = vmatmul.bf16.gmra.mxu1 %v5599_v52  ;;  %2232 = vmatmul.bf16.gmra.mxu2 %v5613_v37 }
 0x249   : > { %v1962_v33 = vadd.f32 %v1961_v56, %v5561_v43  ;;  %2532 = vmatpush.bf16.msrb.mxu2 %v4240_v18 }
 0x24b   : > { %v5813_v14 = vadd.f32 %v2050_v5, %v1962_v33  ;;  %v2193_v19 = vpop.f32.mrf.mxu2  ;;  %2365 = vmatmul.bf16.gmra.mxu0 %v5352_v29 }
 0x24c   : > { %v4504_v8 = vpop.eup %4503  ;;  %v2194_v35 = vadd.f32 %v2193_v19, %v2105_v12 }
 0x24d   : > { %v3389_v15 = vpack.c.bf16 %v4504_v8, %v4502_v13  ;;  %v2106_v11 = vpop.f32.mrf.mxu1  ;;  %v4506_v56 = vpop.eup %4505  ;;  %v4271_v8 = vld [vmem:[%s6974_s5 + $0x320] sm:$0xf] }
 0x24e   : > { %4507 = vtanh.f32 %v2194_v35  ;;  %v2107_v20 = vadd.f32 %v2106_v11, %v5738_v63  ;;  %v4450_v35 = vld [vmem:[%s6974_s5 + $0x338] sm:$0xf0] }
 0x24f   : > { %3518 = vst [vmem:[%s5770_s29 + $0x54] sm:$0xff] %v3389_v15  ;;  %4509 = vtanh.f32 %v5631_v46  ;;  %v4272_v46 = vor.u32 %v4450_v35, %v4271_v8 }
 0x250   : > { %v1963_v41 = vpop.f32.mrf.mxu3  ;;  %v2052_v50 = vpop.f32.mrf.mxu0 }
 0x251   : > { %v1964_v55 = vadd.f32 %v1963_v41, %v5561_v43  ;;  %2709 = vmatpush.bf16.msrb.mxu0 %v4272_v46 }
 0x253   : > { %v5826_v5 = vadd.f32 %v2052_v50, %v1964_v55  ;;  %v2195_v54 = vpop.f32.mrf.mxu2 }
 0x254   : > { %v4508_v33 = vpop.eup %4507  ;;  %v2196_v12 = vadd.f32 %v2195_v54, %v2107_v20 }
 0x255   : > { %v3393_v13 = vpack.c.bf16 %v4508_v33, %v4506_v56  ;;  %v2109_v19 = vpop.f32.mrf.mxu1  ;;  %2281 = vmatmul.bf16.gmra.mxu3 %v5368_v48  ;;  %v4510_v41 = vpop.eup %4509  ;;  %v4019_v33 = vld [vmem:[%s6974_s5 + $0x128] sm:$0xf] }
 0x256   : > { %4511 = vtanh.f32 %v2196_v12  ;;  %v2110_v24 = vadd.f32 %v2109_v19, %v5738_v63  ;;  %v4387_v12 = vld [vmem:[%s6974_s5 + $0x140] sm:$0xf0] }
 0x257   : > { %3522 = vst [vmem:[%s5770_s29 + $0x70] sm:$0xff] %v3393_v13  ;;  %4513 = vtanh.f32 %v5641_v6  ;;  %v4020_v8 = vor.u32 %v4387_v12, %v4019_v33 }
 0x258   : > { %v1966_v15 = vpop.f32.mrf.mxu3  ;;  %v2055_v11 = vpop.f32.mrf.mxu0  ;;  %2148 = vmatmul.bf16.gmra.mxu1 %v5629_v7  ;;  %2237 = vmatmul.bf16.gmra.mxu2 %v5637_v3 }
 0x259   : > { %v1967_v26 = vadd.f32 %v1966_v15, %v5561_v43  ;;  %2621 = vmatpush.bf16.msrb.mxu3 %v4020_v8 }
 0x25b   : > { %v5841_v50 = vadd.f32 %v2055_v11, %v1967_v26  ;;  %v2198_v18 = vpop.f32.mrf.mxu2  ;;  %2370 = vmatmul.bf16.gmra.mxu0 %v5378_v2 }
 0x25c   : > { %v4512_v55 = vpop.eup %4511  ;;  %v2199_v20 = vadd.f32 %v2198_v18, %v2110_v24 }
 0x25d   : > { %v3397_v56 = vpack.c.bf16 %v4512_v55, %v4510_v41  ;;  %v2111_v54 = vpop.f32.mrf.mxu1  ;;  %v4514_v15 = vpop.eup %4513  ;;  %v4383_v55 = vld [vmem:[%s6974_s5 + $0x124] sm:$0xf] }
 0x25e   : > { %4515 = vtanh.f32 %v2199_v20  ;;  %v2112_v6 = vadd.f32 %v2111_v54, %v5738_v63  ;;  %v4013_v20 = vld [vmem:[%s6974_s5 + $0x13c] sm:$0xf0] }
 0x25f   : > { %3526 = vst [vmem:[%s5770_s29 + $0x8c] sm:$0xff] %v3397_v56  ;;  %4517 = vtanh.f32 %v5649_v36  ;;  %v4016_v36 = vor.u32 %v4383_v55, %v4013_v20 }
 0x260   : > { %v1968_v13 = vpop.f32.mrf.mxu3  ;;  %v2057_v19 = vpop.f32.mrf.mxu0 }
 0x261   : > { %v1969_v35 = vadd.f32 %v1968_v13, %v5561_v43  ;;  %2443 = vmatpush.bf16.msrb.mxu1 %v4016_v36 }
 0x263   : > { %v5854_v11 = vadd.f32 %v2057_v19, %v1969_v35  ;;  %v2200_v46 = vpop.f32.mrf.mxu2 }
 0x264   : > { %v4516_v26 = vpop.eup %4515  ;;  %v2201_v24 = vadd.f32 %v2200_v46, %v2112_v6 }
 0x265   : > { %v3401_v41 = vpack.c.bf16 %v4516_v26, %v4514_v15  ;;  %v2114_v18 = vpop.f32.mrf.mxu1  ;;  %2286 = vmatmul.bf16.gmra.mxu3 %v5399_v25  ;;  %v4518_v13 = vpop.eup %4517  ;;  %v4432_v26 = vld [vmem:[%s6974_s5 + $0x2ac] sm:$0xf] }
 0x266   : > { %4519 = vtanh.f32 %v2201_v24  ;;  %v2115_v12 = vadd.f32 %v2114_v18, %v5738_v63  ;;  %v4209_v24 = vld [vmem:[%s6974_s5 + $0x2c4] sm:$0xf0] }
 0x267   : > { %3530 = vst [vmem:[%s5770_s29 + $0xa8] sm:$0xff] %v3401_v41  ;;  %4521 = vtanh.f32 %v5671_v10  ;;  %v4212_v55 = vor.u32 %v4432_v26, %v4209_v24  ;;  %v4376_v10 = vld [vmem:[%s6974_s5 + $0xec] sm:$0xf]  ;;  %v3957_v26 = vld [vmem:[%s6974_s5 + $0xcc] sm:$0xf0] }
 0x268   : > { %v1971_v56 = vpop.f32.mrf.mxu3  ;;  %v2060_v54 = vpop.f32.mrf.mxu0  ;;  %2153 = vmatmul.bf16.gmra.mxu1 %v5647_v34  ;;  %2242 = vmatmul.bf16.gmra.mxu2 %v5661_v62  ;;  %v4425_v24 = vld [vmem:[%s6974_s5 + $0x274] sm:$0xf] }
 0x269   : > { %v1972_v33 = vadd.f32 %v1971_v56, %v5561_v43  ;;  %2533 = vmatpush.bf16.msrb.mxu2 %v4212_v55 }
 0x26b   : > { %v5869_v19 = vadd.f32 %v2060_v54, %v1972_v33  ;;  %v2203_v8 = vpop.f32.mrf.mxu2  ;;  %2375 = vmatmul.bf16.gmra.mxu0 %v5404_v39  ;;  %v3985_v54 = vld [vmem:[%s6974_s5 + $0x104] sm:$0xf0] }
 0x26c   : > { %v4520_v35 = vpop.eup %4519  ;;  %v2204_v6 = vadd.f32 %v2203_v8, %v2115_v12 }
 0x26d   : > { %v3405_v15 = vpack.c.bf16 %v4520_v35, %v4518_v13  ;;  %v2116_v46 = vpop.f32.mrf.mxu1  ;;  %v4522_v36 = vpop.eup %4521  ;;  %v3988_v13 = vor.u32 %v4376_v10, %v3985_v54  ;;  %v4181_v10 = vld [vmem:[%s6974_s5 + $0x28c] sm:$0xf0] }
 0x26e   : > { %4523 = vtanh.f32 %v2204_v6  ;;  %v2117_v56 = vadd.f32 %v2116_v46, %v5738_v63  ;;  %v4369_v46 = vld [vmem:[%s6974_s5 + $0xb4] sm:$0xf] }
 0x26f   : > { %3534 = vst [vmem:[%s5770_s29 + $0xc4] sm:$0xff] %v3405_v15  ;;  %4525 = vtanh.f32 %v5679_v45  ;;  %2444 = vmatpush.bf16.msrb.mxu1 %v3988_v13  ;;  %v4243_v45 = vld [vmem:[%s6974_s5 + $0x2e8] sm:$0xf]  ;;  %v4362_v13 = vld [vmem:[%s6974_s5 + $0x7c] sm:$0xf] }
 0x270   : > { %v1973_v41 = vpop.f32.mrf.mxu3  ;;  %v2062_v18 = vpop.f32.mrf.mxu0 }
 0x271   : > { %v1974_v20 = vadd.f32 %v1973_v41, %v5561_v43  ;;  %v4443_v41 = vld [vmem:[%s6974_s5 + $0x300] sm:$0xf0] }
 0x273   : > { %v5888_v33 = vadd.f32 %v2062_v18, %v1974_v20  ;;  %v2205_v12 = vpop.f32.mrf.mxu2  ;;  %v3960_v18 = vor.u32 %v4369_v46, %v3957_v26 }
 0x274   : > { %v4524_v8 = vpop.eup %4523  ;;  %v2206_v35 = vadd.f32 %v2205_v12, %v2117_v56  ;;  %v4244_v56 = vor.u32 %v4443_v41, %v4243_v45 }
 0x275   : > { %v3409_v6 = vpack.c.bf16 %v4524_v8, %v4522_v36  ;;  %v2119_v15 = vpop.f32.mrf.mxu1  ;;  %2291 = vmatmul.bf16.gmra.mxu3 %v5424_v61  ;;  %2445 = vmatpush.bf16.msrb.mxu1 %v3960_v18  ;;  %v4184_v36 = vor.u32 %v4425_v24, %v4181_v10  ;;  %v3929_v8 = vld [vmem:[%s6974_s5 + $0x94] sm:$0xf0]  ;;  %v3901_v10 = vld [vmem:[%s6974_s5 + $0x5c] sm:$0xf0] }
 0x276   : > { %4527 = vtanh.f32 %v2206_v35  ;;  %v2120_v12 = vadd.f32 %v2119_v15, %v5738_v63  ;;  %2710 = vmatpush.bf16.msrb.mxu0 %v4244_v56  ;;  %v4418_v35 = vld [vmem:[%s6974_s5 + $0x23c] sm:$0xf]  ;;  %v3932_v15 = vor.u32 %v4362_v13, %v3929_v8  ;;  %v4153_v24 = vld [vmem:[%s6974_s5 + $0x254] sm:$0xf0] }
 0x277   : > { %3538 = vst [vmem:[%s5770_s29 + $0xe0] sm:$0xff] %v3409_v6  ;;  %v4526_v6 = vpop.eup %4525  ;;  %2534 = vmatpush.bf16.msrb.mxu2 %v4184_v36  ;;  %v4156_v18 = vor.u32 %v4418_v35, %v4153_v24  ;;  %4529 = vtanh.f32 %v5695_v21  ;;  %v3991_v21 = vld [vmem:[%s6974_s5 + $0xf0] sm:$0xf]  ;;  %v4380_v36 = vld [vmem:[%s6974_s5 + $0x108] sm:$0xf0] }
 0x278   : > { %v1976_v55 = vpop.f32.mrf.mxu3  ;;  %v2065_v20 = vpop.f32.mrf.mxu0  ;;  %2158 = vmatmul.bf16.gmra.mxu1 %v5677_v42  ;;  %2247 = vmatmul.bf16.gmra.mxu2 %v5685_v4  ;;  %v3992_v35 = vor.u32 %v4380_v36, %v3991_v21 }
 0x279   : > { %v1977_v54 = vadd.f32 %v1976_v55, %v5561_v43  ;;  %2446 = vmatpush.bf16.msrb.mxu1 %v3932_v15 }
 0x27a   : > { %2622 = vmatpush.bf16.msrb.mxu3 %v3992_v35 }
 0x27b   : > { %v5924_v46 = vadd.f32 %v2065_v20, %v1977_v54  ;;  %v2208_v26 = vpop.f32.mrf.mxu2  ;;  %2380 = vmatmul.bf16.gmra.mxu0 %v5447_v22  ;;  %v4355_v20 = vld [vmem:[%s6974_s5 + $0x44] sm:$0xf]  ;;  %2535 = vmatpush.bf16.msrb.mxu2 %v4156_v18  ;;  %v4404_v18 = vld [vmem:[%s6974_s5 + $0x1cc] sm:$0xf] }
 0x27c   : > { %v4528_v45 = vpop.eup %4527  ;;  %v2209_v41 = vadd.f32 %v2208_v26, %v2120_v12  ;;  %v4411_v54 = vld [vmem:[%s6974_s5 + $0x204] sm:$0xf]  ;;  %v3904_v12 = vor.u32 %v4355_v20, %v3901_v10 }
 0x27d   : > { %v3413_v55 = vpack.c.bf16 %v4528_v45, %v4526_v6  ;;  %v2121_v56 = vpop.f32.mrf.mxu1  ;;  %v4125_v6 = vld [vmem:[%s6974_s5 + $0x21c] sm:$0xf0]  ;;  %v4348_v45 = vld [vmem:[%s6974_s5 + $0xc] sm:$0xf] }
 0x27e   : > { %4531 = vtanh.f32 %v2209_v41  ;;  %2447 = vmatpush.bf16.msrb.mxu1 %v3904_v12  ;;  %v4128_v15 = vor.u32 %v4411_v54, %v4125_v6  ;;  %v2122_v24 = vadd.f32 %v2121_v56, %v5738_v63  ;;  %v3873_v41 = vld [vmem:[%s6974_s5 + $0x24] sm:$0xf0] }
 0x27f   : > { %3542 = vst [vmem:[%s5770_s29 + $0xfc] sm:$0xff] %v3413_v55  ;;  %v4530_v55 = vpop.eup %4529  ;;  %v3876_v56 = vor.u32 %v4348_v45, %v3873_v41  ;;  %v4097_v54 = vld [vmem:[%s6974_s5 + $0x1e4] sm:$0xf0]  ;;  %4533 = vtanh.f32 %v5703_v58 }
 0x280   : > { %v1978_v13 = vpop.f32.mrf.mxu3  ;;  %v2067_v8 = vpop.f32.mrf.mxu0  ;;  %2536 = vmatpush.bf16.msrb.mxu2 %v4128_v15  ;;  %v4100_v12 = vor.u32 %v4404_v18, %v4097_v54 }
 0x281   : > { %v1979_v26 = vadd.f32 %v1978_v13, %v5561_v43 }
 0x282   : > { %2448 = vmatpush.bf16.msrb.mxu1 %v3876_v56 }
 0x283   : > { %v5961_v20 = vadd.f32 %v2067_v8, %v1979_v26  ;;  %v2210_v10 = vpop.f32.mrf.mxu2 }
 0x284   : > { %v4532_v21 = vpop.eup %4531  ;;  %v2211_v36 = vadd.f32 %v2210_v10, %v2122_v24  ;;  %2537 = vmatpush.bf16.msrb.mxu2 %v4100_v12 }
 0x285   : > { %v3417_v13 = vpack.c.bf16 %v4532_v21, %v4530_v55  ;;  %v2124_v35 = vpop.f32.mrf.mxu1  ;;  %2296 = vmatmul.bf16.gmra.mxu3 %v5494_v0  ;;  %v4534_v58 = vpop.eup %4533 }
 0x286   : > { %4535 = vtanh.f32 %v2211_v36  ;;  %v2125_v15 = vadd.f32 %v2124_v35, %v5738_v63 }
 0x287   : > { %3546 = vst [vmem:[%s5770_s29 + $0x118] sm:$0xff] %v3417_v13  ;;  %4537 = vtanh.f32 %v5719_v47 }
 0x288   : > { %v1981_v8 = vpop.f32.mrf.mxu3  ;;  %v2070_v6 = vpop.f32.mrf.mxu0  ;;  %2163 = vmatmul.bf16.gmra.mxu1 %v5701_v57  ;;  %2252 = vmatmul.bf16.gmra.mxu2 %v5715_v40 }
 0x289   : > { %v1982_v26 = vadd.f32 %v1981_v8, %v5561_v43 }
 0x28b   : > { %v5973_v24 = vadd.f32 %v2070_v6, %v1982_v26  ;;  %v2213_v45 = vpop.f32.mrf.mxu2  ;;  %2385 = vmatmul.bf16.gmra.mxu0 %v5503_v17 }
 0x28c   : > { %v4536_v41 = vpop.eup %4535  ;;  %v2214_v18 = vadd.f32 %v2213_v45, %v2125_v15  ;;  %v4215_v15 = vld [vmem:[%s6974_s5 + $0x2b0] sm:$0xf] }
 0x28d   : > { %v3421_v55 = vpack.c.bf16 %v4536_v41, %v4534_v58  ;;  %v2126_v10 = vpop.f32.mrf.mxu1  ;;  %v4538_v12 = vpop.eup %4537  ;;  %v4436_v58 = vld [vmem:[%s6974_s5 + $0x2c8] sm:$0xf0] }
 0x28e   : > { %4539 = vtanh.f32 %v2214_v18  ;;  %v2127_v36 = vadd.f32 %v2126_v10, %v5738_v63 }
 0x28f   : > { %3550 = vst [vmem:[%s5770_s29 + $0x134] sm:$0xff] %v3421_v55  ;;  %4541 = vtanh.f32 %v5733_v30  ;;  %v4216_v30 = vor.u32 %v4436_v58, %v4215_v15 }
 0x290   : > { %v1983_v56 = vpop.f32.mrf.mxu3  ;;  %v2072_v54 = vpop.f32.mrf.mxu0 }
 0x291   : > { %v1984_v21 = vadd.f32 %v1983_v56, %v5561_v43  ;;  %2711 = vmatpush.bf16.msrb.mxu0 %v4216_v30 }
 0x293   : > { %v5980_v13 = vadd.f32 %v2072_v54, %v1984_v21  ;;  %v2215_v35 = vpop.f32.mrf.mxu2 }
 0x294   : > { %v4540_v8 = vpop.eup %4539  ;;  %v2216_v6 = vadd.f32 %v2215_v35, %v2127_v36 }
 0x295   : > { %v3425_v47 = vpack.c.bf16 %v4540_v8, %v4538_v12  ;;  %v2129_v26 = vpop.f32.mrf.mxu1  ;;  %2301 = vmatmul.bf16.gmra.mxu3 %v5511_v38  ;;  %v4542_v10 = vpop.eup %4541  ;;  %v3963_v8 = vld [vmem:[%s6974_s5 + $0xb8] sm:$0xf] }
 0x296   : > { %4543 = vtanh.f32 %v2216_v6  ;;  %v2130_v55 = vadd.f32 %v2129_v26, %v5738_v63  ;;  %v4373_v6 = vld [vmem:[%s6974_s5 + $0xd0] sm:$0xf0] }
 0x297   : > { %3554 = vst [vmem:[%s5770_s29 + $0x150] sm:$0xff] %v3425_v47  ;;  %4545 = vtanh.f32 %v5752_v23  ;;  %v3964_v15 = vor.u32 %v4373_v6, %v3963_v8 }
 0x298   : > { %v1986_v45 = vpop.f32.mrf.mxu3  ;;  %v2075_v41 = vpop.f32.mrf.mxu0  ;;  %2168 = vmatmul.bf16.gmra.mxu1 %v5731_v27  ;;  %2257 = vmatmul.bf16.gmra.mxu2 %v5748_v31 }
 0x299   : > { %v1987_v18 = vadd.f32 %v1986_v45, %v5561_v43  ;;  %2623 = vmatpush.bf16.msrb.mxu3 %v3964_v15 }
 0x29b   : > { %v5995_v56 = vadd.f32 %v2075_v41, %v1987_v18  ;;  %v2218_v54 = vpop.f32.mrf.mxu2  ;;  %2390 = vmatmul.bf16.gmra.mxu0 %v5521_v53 }
 0x29c   : > { %v4544_v21 = vpop.eup %4543  ;;  %v2219_v36 = vadd.f32 %v2218_v54, %v2130_v55 }
 0x29d   : > { %v3429_v12 = vpack.c.bf16 %v4544_v21, %v4542_v10  ;;  %v2131_v35 = vpop.f32.mrf.mxu1  ;;  %v4546_v45 = vpop.eup %4545  ;;  %v7005_v21 = vld [vmem:[#allocation6_spill] sm:$0xff] }
 0x29e   : > { %4547 = vtanh.f32 %v2219_v36  ;;  %v2132_v23 = vadd.f32 %v2131_v35, %v5738_v63 }
 0x29f   : > { %3558 = vst [vmem:[%s5770_s29 + $0x16c] sm:$0xff] %v3429_v12  ;;  %4549 = vtanh.f32 %v5765_v60 }
 0x2a0   : > { %v1988_v47 = vpop.f32.mrf.mxu3  ;;  %v2077_v26 = vpop.f32.mrf.mxu0 }
 0x2a1   : > { %v1989_v58 = vadd.f32 %v1988_v47, %v5561_v43 }
 0x2a3   : > { %v6008_v41 = vadd.f32 %v2077_v26, %v1989_v58  ;;  %v2220_v30 = vpop.f32.mrf.mxu2  ;;  %v7006_v26 = vld [vmem:[#allocation7_spill] sm:$0xff] }
 0x2a4   : > { %v4548_v18 = vpop.eup %4547  ;;  %v2221_v55 = vadd.f32 %v2220_v30, %v2132_v23 }
 0x2a5   : > { %v3433_v10 = vpack.c.bf16 %v4548_v18, %v4546_v45  ;;  %v2134_v54 = vpop.f32.mrf.mxu1  ;;  %2306 = vmatmul.bf16.gmra.mxu3 %v7005_v21  ;;  %v4550_v6 = vpop.eup %4549 }
 0x2a6   : > { %4551 = vtanh.f32 %v2221_v55  ;;  %v2135_v8 = vadd.f32 %v2134_v54, %v5738_v63 }
 0x2a7   : > { %3562 = vst [vmem:[%s5770_s29 + $0x188] sm:$0xff] %v3433_v10  ;;  %4553 = vtanh.f32 %v5785_v1 }
 0x2a8   : > { %v1991_v36 = vpop.f32.mrf.mxu3  ;;  %v2080_v12 = vpop.f32.mrf.mxu0  ;;  %2449 = vmatmul.bf16.vlgmr.msrb.gmra.mxu1 %v5313_v44  ;;  %2538 = vmatmul.bf16.vlgmr.msrb.gmra.mxu2 %v5323_v59 }
 0x2a9   : > { %v1992_v35 = vadd.f32 %v1991_v36, %v5561_v43 }
 0x2ab   : > { %v6017_v47 = vadd.f32 %v2080_v12, %v1992_v35  ;;  %v2223_v60 = vpop.f32.mrf.mxu2  ;;  %2395 = vmatmul.bf16.gmra.mxu0 %v7006_v26 }
 0x2ac   : > { %v4552_v15 = vpop.eup %4551  ;;  %v2224_v58 = vadd.f32 %v2223_v60, %v2135_v8  ;;  %v4187_v60 = vld [vmem:[%s6974_s5 + $0x278] sm:$0xf] }
 0x2ad   : > { %v3437_v23 = vpack.c.bf16 %v4552_v15, %v4550_v6  ;;  %v2136_v45 = vpop.f32.mrf.mxu1  ;;  %v4554_v54 = vpop.eup %4553  ;;  %v6031_v6 = vld [vmem:[%s6975_s6] sm:$0x7f] }
 0x2ae   : > { %4555 = vtanh.f32 %v2224_v58  ;;  %v2137_v10 = vadd.f32 %v2136_v45, %v5738_v63 }
 0x2af   : > { %3566 = vst [vmem:[%s5770_s29 + $0x1a4] sm:$0xff] %v3437_v23  ;;  %4557 = vtanh.f32 %v5798_v9  ;;  %v4429_v9 = vld [vmem:[%s6974_s5 + $0x290] sm:$0xf0] }
 0x2b0   : > { %v1993_v30 = vpop.f32.mrf.mxu3  ;;  %v2082_v18 = vpop.f32.mrf.mxu0  ;;  %v4188_v23 = vor.u32 %v4429_v9, %v4187_v60 }
 0x2b1   : > { %v1994_v55 = vadd.f32 %v1993_v30, %v5561_v43  ;;  %v6034_v43 = vperm.slane %v6031_v6, 2 }
 0x2b2   : > { %2712 = vmatpush.bf16.msrb.mxu0 %v4188_v23 }
 0x2b3   : > { %v6024_v36 = vadd.f32 %v2082_v18, %v1994_v55  ;;  %v2225_v12 = vpop.f32.mrf.mxu2 }
 0x2b4   : > { %v4556_v35 = vpop.eup %4555  ;;  %v2226_v59 = vadd.f32 %v2225_v12, %v2137_v10 }
 0x2b5   : > { %v3441_v1 = vpack.c.bf16 %v4556_v35, %v4554_v54  ;;  %v2139_v8 = vpop.f32.mrf.mxu1  ;;  %2311 = vmatmul.bf16.gmra.mxu3 %v5550_v32  ;;  %v4558_v30 = vpop.eup %4557 }
 0x2b6   : > { %4559 = vtanh.f32 %v2226_v59  ;;  %v2140_v59 = vadd.f32 %v2139_v8, %v5738_v63  ;;  %v4366_v8 = vld [vmem:[%s6974_s5 + $0x98] sm:$0xf0] }
 0x2b7   : > { %3570 = vst [vmem:[%s5770_s29 + $0x1c0] sm:$0xff] %v3441_v1  ;;  %4561 = vtanh.f32 %v5813_v14  ;;  %v3935_v1 = vld [vmem:[%s6974_s5 + $0x80] sm:$0xf] }
 0x2b8   : > { %v2272_v15 = vpop.f32.mrf.mxu3  ;;  %v2361_v58 = vpop.f32.mrf.mxu0  ;;  %2454 = vmatmul.bf16.gmra.mxu1 %v5347_v16  ;;  %2543 = vmatmul.bf16.gmra.mxu2 %v5352_v29 }
 0x2b9   : > { %v2273_v45 = vadd.f32 %v2272_v15, %v6034_v43  ;;  %v3936_v15 = vor.u32 %v4366_v8, %v3935_v1 }
 0x2bb   : > { %v6047_v18 = vadd.f32 %v2361_v58, %v2273_v45  ;;  %v2228_v55 = vpop.f32.mrf.mxu2  ;;  %2400 = vmatmul.bf16.gmra.mxu0 %v5565_v49  ;;  %2624 = vmatpush.bf16.msrb.mxu3 %v3936_v15 }
 0x2bc   : > { %v4560_v10 = vpop.eup %4559  ;;  %v2229_v54 = vadd.f32 %v2228_v55, %v2140_v59 }
 0x2bd   : > { %v3445_v12 = vpack.c.bf16 %v4560_v10, %v4558_v30  ;;  %v2141_v35 = vpop.f32.mrf.mxu1  ;;  %v4562_v23 = vpop.eup %4561 }
 0x2be   : > { %4563 = vtanh.f32 %v2229_v54  ;;  %v2142_v14 = vadd.f32 %v2141_v35, %v5738_v63 }
 0x2bf   : > { %3574 = vst [vmem:[%s5770_s29 + $0x1dc] sm:$0xff] %v3445_v12  ;;  %4565 = vtanh.f32 %v5826_v5 }
 0x2c0   : > { %v2274_v60 = vpop.f32.mrf.mxu3  ;;  %v2363_v9 = vpop.f32.mrf.mxu0 }
 0x2c1   : > { %v2275_v58 = vadd.f32 %v2274_v60, %v6034_v43 }
 0x2c3   : > { %v6060_v45 = vadd.f32 %v2363_v9, %v2275_v58  ;;  %v2230_v59 = vpop.f32.mrf.mxu2 }
 0x2c4   : > { %v4564_v30 = vpop.eup %4563  ;;  %v2231_v55 = vadd.f32 %v2230_v59, %v2142_v14 }
 0x2c5   : > { %v3449_v10 = vpack.c.bf16 %v4564_v30, %v4562_v23  ;;  %v2144_v54 = vpop.f32.mrf.mxu1  ;;  %2316 = vmatmul.bf16.gmra.mxu3 %v5581_v51  ;;  %v4566_v60 = vpop.eup %4565 }
 0x2c6   : > { %4567 = vtanh.f32 %v2231_v55  ;;  %v2145_v8 = vadd.f32 %v2144_v54, %v5738_v63 }
 0x2c7   : > { %3578 = vst [vmem:[%s5770_s29 + $0x1f8] sm:$0xff] %v3449_v10  ;;  %4569 = vtanh.f32 %v5841_v50 }
 0x2c8   : > { %v2277_v12 = vpop.f32.mrf.mxu3  ;;  %v2366_v1 = vpop.f32.mrf.mxu0  ;;  %2459 = vmatmul.bf16.gmra.mxu1 %v5368_v48  ;;  %2548 = vmatmul.bf16.gmra.mxu2 %v5378_v2 }
 0x2c9   : > { %v2278_v35 = vadd.f32 %v2277_v12, %v6034_v43 }
 0x2cb   : > { %v6069_v9 = vadd.f32 %v2366_v1, %v2278_v35  ;;  %v2233_v5 = vpop.f32.mrf.mxu2  ;;  %2405 = vmatmul.bf16.gmra.mxu0 %v5589_v28 }
 0x2cc   : > { %v4568_v15 = vpop.eup %4567  ;;  %v2234_v58 = vadd.f32 %v2233_v5, %v2145_v8  ;;  %v4422_v5 = vld [vmem:[%s6974_s5 + $0x258] sm:$0xf0] }
 0x2cd   : > { %v3453_v14 = vpack.c.bf16 %v4568_v15, %v4566_v60  ;;  %v2146_v23 = vpop.f32.mrf.mxu1  ;;  %v4570_v54 = vpop.eup %4569  ;;  %v4159_v60 = vld [vmem:[%s6974_s5 + $0x240] sm:$0xf] }
 0x2ce   : > { %4571 = vtanh.f32 %v2234_v58  ;;  %v2147_v10 = vadd.f32 %v2146_v23, %v5738_v63 }
 0x2cf   : > { %3582 = vst [vmem:[%s5770_s29 + $0x214] sm:$0xff] %v3453_v14  ;;  %4573 = vtanh.f32 %v5854_v11  ;;  %v4160_v11 = vor.u32 %v4422_v5, %v4159_v60 }
 0x2d0   : > { %v2279_v59 = vpop.f32.mrf.mxu3  ;;  %v2368_v30 = vpop.f32.mrf.mxu0 }
 0x2d1   : > { %v2280_v55 = vadd.f32 %v2279_v59, %v6034_v43  ;;  %2713 = vmatpush.bf16.msrb.mxu0 %v4160_v11 }
 0x2d3   : > { %v6076_v12 = vadd.f32 %v2368_v30, %v2280_v55  ;;  %v2235_v1 = vpop.f32.mrf.mxu2 }
 0x2d4   : > { %v4572_v35 = vpop.eup %4571  ;;  %v2236_v2 = vadd.f32 %v2235_v1, %v2147_v10 }
 0x2d5   : > { %v3457_v50 = vpack.c.bf16 %v4572_v35, %v4570_v54  ;;  %v2149_v8 = vpop.f32.mrf.mxu1  ;;  %2321 = vmatmul.bf16.gmra.mxu3 %v5599_v52  ;;  %v4574_v23 = vpop.eup %4573  ;;  %v3907_v35 = vld [vmem:[%s6974_s5 + $0x48] sm:$0xf] }
 0x2d6   : > { %4575 = vtanh.f32 %v2236_v2  ;;  %v2150_v2 = vadd.f32 %v2149_v8, %v5738_v63 }
 0x2d7   : > { %3586 = vst [vmem:[%s5770_s29 + $0x230] sm:$0xff] %v3457_v50  ;;  %4577 = vtanh.f32 %v5869_v19  ;;  %v4359_v50 = vld [vmem:[%s6974_s5 + $0x60] sm:$0xf0] }
 0x2d8   : > { %v2282_v15 = vpop.f32.mrf.mxu3  ;;  %v2371_v58 = vpop.f32.mrf.mxu0  ;;  %2464 = vmatmul.bf16.gmra.mxu1 %v5399_v25  ;;  %2553 = vmatmul.bf16.gmra.mxu2 %v5404_v39  ;;  %v3908_v5 = vor.u32 %v4359_v50, %v3907_v35 }
 0x2d9   : > { %v2283_v14 = vadd.f32 %v2282_v15, %v6034_v43 }
 0x2da   : > { %2625 = vmatpush.bf16.msrb.mxu3 %v3908_v5 }
 0x2db   : > { %v6091_v59 = vadd.f32 %v2371_v58, %v2283_v14  ;;  %v2238_v30 = vpop.f32.mrf.mxu2  ;;  %2410 = vmatmul.bf16.gmra.mxu0 %v5613_v37 }
 0x2dc   : > { %v4576_v55 = vpop.eup %4575  ;;  %v2239_v10 = vadd.f32 %v2238_v30, %v2150_v2 }
 0x2dd   : > { %v3461_v54 = vpack.c.bf16 %v4576_v55, %v4574_v23  ;;  %v2151_v1 = vpop.f32.mrf.mxu1  ;;  %v4578_v58 = vpop.eup %4577 }
 0x2de   : > { %4579 = vtanh.f32 %v2239_v10  ;;  %v2152_v19 = vadd.f32 %v2151_v1, %v5738_v63 }
 0x2df   : > { %3590 = vst [vmem:[%s5770_s29 + $0x24c] sm:$0xff] %v3461_v54  ;;  %4581 = vtanh.f32 %v5888_v33 }
 0x2e0   : > { %v2284_v8 = vpop.f32.mrf.mxu3  ;;  %v2373_v60 = vpop.f32.mrf.mxu0 }
 0x2e1   : > { %v2285_v15 = vadd.f32 %v2284_v8, %v6034_v43 }
 0x2e3   : > { %v6104_v11 = vadd.f32 %v2373_v60, %v2285_v15  ;;  %v2240_v14 = vpop.f32.mrf.mxu2 }
 0x2e4   : > { %v4580_v2 = vpop.eup %4579  ;;  %v2241_v23 = vadd.f32 %v2240_v14, %v2152_v19 }
 0x2e5   : > { %v3465_v30 = vpack.c.bf16 %v4580_v2, %v4578_v58  ;;  %v2154_v55 = vpop.f32.mrf.mxu1  ;;  %2326 = vmatmul.bf16.gmra.mxu3 %v5629_v7  ;;  %v4582_v50 = vpop.eup %4581 }
 0x2e6   : > { %4583 = vtanh.f32 %v2241_v23  ;;  %v2155_v35 = vadd.f32 %v2154_v55, %v5738_v63 }
 0x2e7   : > { %3594 = vst [vmem:[%s5770_s29 + $0x268] sm:$0xff] %v3465_v30  ;;  %4585 = vtanh.f32 %v5924_v46 }
 0x2e8   : > { %v2287_v10 = vpop.f32.mrf.mxu3  ;;  %v2376_v54 = vpop.f32.mrf.mxu0  ;;  %2469 = vmatmul.bf16.gmra.mxu1 %v5424_v61  ;;  %2558 = vmatmul.bf16.gmra.mxu2 %v5447_v22 }
 0x2e9   : > { %v2288_v1 = vadd.f32 %v2287_v10, %v6034_v43 }
 0x2eb   : > { %v6113_v8 = vadd.f32 %v2376_v54, %v2288_v1  ;;  %v2243_v33 = vpop.f32.mrf.mxu2  ;;  %2415 = vmatmul.bf16.gmra.mxu0 %v5637_v3 }
 0x2ec   : > { %v4584_v60 = vpop.eup %4583  ;;  %v2244_v5 = vadd.f32 %v2243_v33, %v2155_v35  ;;  %v4415_v33 = vld [vmem:[%s6974_s5 + $0x220] sm:$0xf0] }
 0x2ed   : > { %v3469_v15 = vpack.c.bf16 %v4584_v60, %v4582_v50  ;;  %v2156_v19 = vpop.f32.mrf.mxu1  ;;  %v4586_v30 = vpop.eup %4585  ;;  %v4131_v50 = vld [vmem:[%s6974_s5 + $0x208] sm:$0xf] }
 0x2ee   : > { %4587 = vtanh.f32 %v2244_v5  ;;  %v2157_v23 = vadd.f32 %v2156_v19, %v5738_v63 }
 0x2ef   : > { %3598 = vst [vmem:[%s5770_s29 + $0x284] sm:$0xff] %v3469_v15  ;;  %4589 = vtanh.f32 %v5961_v20  ;;  %v4132_v20 = vor.u32 %v4415_v33, %v4131_v50 }
 0x2f0   : > { %v2289_v58 = vpop.f32.mrf.mxu3  ;;  %v2378_v14 = vpop.f32.mrf.mxu0 }
 0x2f1   : > { %v2290_v2 = vadd.f32 %v2289_v58, %v6034_v43  ;;  %2714 = vmatpush.bf16.msrb.mxu0 %v4132_v20 }
 0x2f3   : > { %v6120_v55 = vadd.f32 %v2378_v14, %v2290_v2  ;;  %v2245_v10 = vpop.f32.mrf.mxu2 }
 0x2f4   : > { %v4588_v54 = vpop.eup %4587  ;;  %v2246_v1 = vadd.f32 %v2245_v10, %v2157_v23 }
 0x2f5   : > { %v3473_v46 = vpack.c.bf16 %v4588_v54, %v4586_v30  ;;  %v2159_v35 = vpop.f32.mrf.mxu1  ;;  %2331 = vmatmul.bf16.gmra.mxu3 %v5647_v34  ;;  %v4590_v58 = vpop.eup %4589 }
 0x2f6   : > { %4591 = vtanh.f32 %v2246_v1  ;;  %v2160_v19 = vadd.f32 %v2159_v35, %v5738_v63  ;;  %v3879_v1 = vld [vmem:[%s6974_s5 + $0x10] sm:$0xf] }
 0x2f7   : > { %3602 = vst [vmem:[%s5770_s29 + $0x2a0] sm:$0xff] %v3473_v46  ;;  %4593 = vtanh.f32 %v5973_v24  ;;  %v4352_v46 = vld [vmem:[%s6974_s5 + $0x28] sm:$0xf0] }
 0x2f8   : > { %v2292_v60 = vpop.f32.mrf.mxu3  ;;  %v2381_v5 = vpop.f32.mrf.mxu0  ;;  %2474 = vmatmul.bf16.gmra.mxu1 %v5494_v0  ;;  %2563 = vmatmul.bf16.gmra.mxu2 %v5503_v17  ;;  %v3880_v33 = vor.u32 %v4352_v46, %v3879_v1 }
 0x2f9   : > { %v2293_v15 = vadd.f32 %v2292_v60, %v6034_v43 }
 0x2fa   : > { %2626 = vmatpush.bf16.msrb.mxu3 %v3880_v33 }
 0x2fb   : > { %v6135_v14 = vadd.f32 %v2381_v5, %v2293_v15  ;;  %v2248_v2 = vpop.f32.mrf.mxu2  ;;  %2420 = vmatmul.bf16.gmra.mxu0 %v5661_v62 }
 0x2fc   : > { %v4592_v23 = vpop.eup %4591  ;;  %v2249_v30 = vadd.f32 %v2248_v2, %v2160_v19 }
 0x2fd   : > { %v3477_v10 = vpack.c.bf16 %v4592_v23, %v4590_v58  ;;  %v2161_v54 = vpop.f32.mrf.mxu1  ;;  %v4594_v5 = vpop.eup %4593 }
 0x2fe   : > { %4595 = vtanh.f32 %v2249_v30  ;;  %v2162_v24 = vadd.f32 %v2161_v54, %v5738_v63 }
 0x2ff   : > { %3606 = vst [vmem:[%s5770_s29 + $0x2bc] sm:$0xff] %v3477_v10  ;;  %4597 = vtanh.f32 %v5980_v13 }
 0x300   : > { %v2294_v35 = vpop.f32.mrf.mxu3  ;;  %v2383_v50 = vpop.f32.mrf.mxu0 }
 0x301   : > { %v2295_v60 = vadd.f32 %v2294_v35, %v6034_v43 }
 0x303   : > { %v6148_v20 = vadd.f32 %v2383_v50, %v2295_v60  ;;  %v2250_v15 = vpop.f32.mrf.mxu2 }
 0x304   : > { %v4596_v19 = vpop.eup %4595  ;;  %v2251_v58 = vadd.f32 %v2250_v15, %v2162_v24  ;;  %v4301_v15 = vld [vmem:[%s6974_s5 + $0x374] sm:$0xf0] }
 0x305   : > { %v3481_v2 = vpack.c.bf16 %v4596_v19, %v4594_v5  ;;  %v2164_v23 = vpop.f32.mrf.mxu1  ;;  %2336 = vmatmul.bf16.gmra.mxu3 %v5677_v42  ;;  %v4598_v46 = vpop.eup %4597  ;;  %v4454_v5 = vld [vmem:[%s6974_s5 + $0x35c] sm:$0xf] }
 0x306   : > { %4599 = vtanh.f32 %v2251_v58  ;;  %v2165_v1 = vadd.f32 %v2164_v23, %v5738_v63 }
 0x307   : > { %3610 = vst [vmem:[%s5770_s29 + $0x2d8] sm:$0xff] %v3481_v2  ;;  %4601 = vtanh.f32 %v5995_v56  ;;  %v4304_v2 = vor.u32 %v4454_v5, %v4301_v15 }
 0x308   : > { %v2297_v30 = vpop.f32.mrf.mxu3  ;;  %v2386_v10 = vpop.f32.mrf.mxu0  ;;  %2479 = vmatmul.bf16.gmra.mxu1 %v5511_v38  ;;  %2568 = vmatmul.bf16.gmra.mxu2 %v5521_v53 }
 0x309   : > { %v2298_v54 = vadd.f32 %v2297_v30, %v6034_v43  ;;  %2886 = vmatpush.bf16.msra.mxu2 %v4304_v2 }
 0x30b   : > { %v6157_v35 = vadd.f32 %v2386_v10, %v2298_v54  ;;  %v2253_v13 = vpop.f32.mrf.mxu2  ;;  %2425 = vmatmul.bf16.gmra.mxu0 %v5685_v4 }
 0x30c   : > { %v4600_v50 = vpop.eup %4599  ;;  %v2254_v33 = vadd.f32 %v2253_v13, %v2165_v1 }
 0x30d   : > { %v3485_v60 = vpack.c.bf16 %v4600_v50, %v4598_v46  ;;  %v2166_v24 = vpop.f32.mrf.mxu1  ;;  %v4602_v30 = vpop.eup %4601 }
 0x30e   : > { %4603 = vtanh.f32 %v2254_v33  ;;  %v2167_v56 = vadd.f32 %v2166_v24, %v5738_v63  ;;  %v4103_v33 = vld [vmem:[%s6974_s5 + $0x1d0] sm:$0xf] }
 0x30f   : > { %3614 = vst [vmem:[%s5770_s29 + $0x2f4] sm:$0xff] %v3485_v60  ;;  %4605 = vtanh.f32 %v6008_v41  ;;  %v4408_v60 = vld [vmem:[%s6974_s5 + $0x1e8] sm:$0xf0] }
 0x310   : > { %v2299_v19 = vpop.f32.mrf.mxu3  ;;  %v2388_v58 = vpop.f32.mrf.mxu0  ;;  %v4104_v24 = vor.u32 %v4408_v60, %v4103_v33 }
 0x311   : > { %v2300_v23 = vadd.f32 %v2299_v19, %v6034_v43 }
 0x312   : > { %2715 = vmatpush.bf16.msrb.mxu0 %v4104_v24 }
 0x313   : > { %v6170_v10 = vadd.f32 %v2388_v58, %v2300_v23  ;;  %v2255_v54 = vpop.f32.mrf.mxu2 }
 0x314   : > { %v4604_v1 = vpop.eup %4603  ;;  %v2256_v46 = vadd.f32 %v2255_v54, %v2167_v56 }
 0x315   : > { %v3489_v13 = vpack.c.bf16 %v4604_v1, %v4602_v30  ;;  %v2169_v50 = vpop.f32.mrf.mxu1  ;;  %2341 = vmatmul.bf16.gmra.mxu3 %v5701_v57  ;;  %v4606_v58 = vpop.eup %4605 }
 0x316   : > { %4607 = vtanh.f32 %v2256_v46  ;;  %v2170_v19 = vadd.f32 %v2169_v50, %v5738_v63  ;;  %v4083_v46 = vld [vmem:[%s6974_s5 + $0x1a0] sm:$0xf] }
 0x317   : > { %3618 = vst [vmem:[%s5770_s29 + $0x310] sm:$0xff] %v3489_v13  ;;  %4609 = vtanh.f32 %v6017_v47  ;;  %v4402_v13 = vld [vmem:[%s6974_s5 + $0x1b8] sm:$0xf0] }
 0x318   : > { %v2302_v5 = vpop.f32.mrf.mxu3  ;;  %v2391_v15 = vpop.f32.mrf.mxu0  ;;  %2484 = vmatmul.bf16.gmra.mxu1 %v7005_v21  ;;  %2573 = vmatmul.bf16.gmra.mxu2 %v7006_v26  ;;  %v4084_v60 = vor.u32 %v4402_v13, %v4083_v46 }
 0x319   : > { %v2303_v41 = vadd.f32 %v2302_v5, %v6034_v43 }
 0x31a   : > { %2975 = vmatpush.bf16.msra.mxu3 %v4084_v60 }
 0x31b   : > { %v6185_v2 = vadd.f32 %v2391_v15, %v2303_v41  ;;  %v2258_v23 = vpop.f32.mrf.mxu2  ;;  %2430 = vmatmul.bf16.gmra.mxu0 %v5715_v40 }
 0x31c   : > { %v4608_v56 = vpop.eup %4607  ;;  %v2259_v30 = vadd.f32 %v2258_v23, %v2170_v19 }
 0x31d   : > { %v3493_v54 = vpack.c.bf16 %v4608_v56, %v4606_v58  ;;  %v2171_v1 = vpop.f32.mrf.mxu1  ;;  %v4610_v5 = vpop.eup %4609 }
 0x31e   : > { %4611 = vtanh.f32 %v2259_v30  ;;  %v2172_v47 = vadd.f32 %v2171_v1, %v5738_v63  ;;  %v6203_v30 = vperm.slane %v6031_v6, 3  ;;  %v4398_v63 = vld [vmem:[%s6974_s5 + $0x19c] sm:$0xf] }
 0x31f   : > { %3622 = vst [vmem:[%s5770_s29 + $0x32c] sm:$0xff] %v3493_v54  ;;  %4613 = vtanh.f32 %v6024_v36  ;;  %v4077_v54 = vld [vmem:[%s6974_s5 + $0x1b4] sm:$0xf0] }
 0x320   : > { %v2304_v50 = vpop.f32.mrf.mxu3  ;;  %v2393_v33 = vpop.f32.mrf.mxu0  ;;  %v4080_v36 = vor.u32 %v4398_v63, %v4077_v54 }
 0x321   : > { %v2305_v24 = vadd.f32 %v2304_v50, %v6034_v43 }
 0x322   : > { %2797 = vmatpush.bf16.msra.mxu1 %v4080_v36 }
 0x323   : > { %v6198_v15 = vadd.f32 %v2393_v33, %v2305_v24  ;;  %v2260_v41 = vpop.f32.mrf.mxu2 }
 0x324   : > { %v4612_v19 = vpop.eup %4611  ;;  %v2261_v58 = vadd.f32 %v2260_v41, %v2172_v47 }
 0x325   : > { %v3497_v23 = vpack.c.bf16 %v4612_v19, %v4610_v5  ;;  %2346 = vmatmul.bf16.gmra.mxu3 %v5731_v27  ;;  %v2450_v56 = vpop.f32.mrf.mxu1  ;;  %v4614_v50 = vpop.eup %4613  ;;  %v4447_v19 = vld [vmem:[%s6974_s5 + $0x324] sm:$0xf] }
 0x326   : > { %4615 = vtanh.f32 %v2261_v58  ;;  %v2451_v13 = vadd.f32 %v2450_v56, %v6203_v30  ;;  %v4273_v58 = vld [vmem:[%s6974_s5 + $0x33c] sm:$0xf0] }
 0x327   : > { %3626 = vst [vmem:[%s5770_s29 + $0x348] sm:$0xff] %v3497_v23  ;;  %4617 = vtanh.f32 %v6047_v18  ;;  %v4276_v63 = vor.u32 %v4447_v19, %v4273_v58 }
 0x328   : > { %v2307_v1 = vpop.f32.mrf.mxu3  ;;  %v2396_v46 = vpop.f32.mrf.mxu0  ;;  %2489 = vmatmul.bf16.gmra.mxu1 %v5550_v32  ;;  %2578 = vmatmul.bf16.gmra.mxu2 %v5565_v49 }
 0x329   : > { %v2308_v6 = vadd.f32 %v2307_v1, %v6034_v43  ;;  %2887 = vmatpush.bf16.msra.mxu2 %v4276_v63 }
 0x32b   : > { %v6216_v33 = vadd.f32 %v2396_v46, %v2308_v6  ;;  %2435 = vmatmul.bf16.gmra.mxu0 %v5748_v31  ;;  %v2539_v60 = vpop.f32.mrf.mxu2 }
 0x32c   : > { %v4616_v24 = vpop.eup %4615  ;;  %v2540_v47 = vadd.f32 %v2539_v60, %v2451_v13 }
 0x32d   : > { %v3501_v5 = vpack.c.bf16 %v4616_v24, %v4614_v50  ;;  %v2452_v41 = vpop.f32.mrf.mxu1  ;;  %v4618_v1 = vpop.eup %4617  ;;  %v4307_v24 = vld [vmem:[%s6974_s5 + $0x360] sm:$0xf] }
 0x32e   : > { %4619 = vtanh.f32 %v2540_v47  ;;  %v2453_v18 = vadd.f32 %v2452_v41, %v6203_v30  ;;  %v4458_v47 = vld [vmem:[%s6974_s5 + $0x378] sm:$0xf0] }
 0x32f   : > { %3630 = vst [vmem:[%s5770_s29 + $0x364] sm:$0xff] %v3501_v5  ;;  %4621 = vtanh.f32 %v6060_v45  ;;  %v6242_v45 = vor.u32 %v4458_v47, %v4307_v24 }
 0x330   : > { %v2309_v23 = vpop.f32.mrf.mxu3  ;;  %v2398_v56 = vpop.f32.mrf.mxu0 }
 0x331   : > { %v2310_v54 = vadd.f32 %v2309_v23, %v6034_v43  ;;  %3064 = vmatpush.bf16.msra.mxu0 %v6242_v45 }
 0x333   : > { %v6229_v46 = vadd.f32 %v2398_v56, %v2310_v54  ;;  %v2541_v36 = vpop.f32.mrf.mxu2  ;;  %v7007_v54 = vld [vmem:[#allocation2_spill] sm:$0xff] }
 0x334   : > { %v4620_v6 = vpop.eup %4619  ;;  %v2542_v13 = vadd.f32 %v2541_v36, %v2453_v18 }
 0x335   : > { %v3378_v50 = vpack.c.bf16 %v4620_v6, %v4618_v1  ;;  %v2455_v60 = vpop.f32.mrf.mxu1  ;;  %2627 = vmatmul.bf16.vlgmr.msrb.gmra.mxu3 %v5313_v44  ;;  %v4622_v23 = vpop.eup %4621 }
 0x336   : > { %4623 = vtanh.f32 %v2542_v13  ;;  %v2456_v58 = vadd.f32 %v2455_v60, %v6203_v30  ;;  %v4055_v13 = vld [vmem:[%s6974_s5 + $0x168] sm:$0xf] }
 0x337   : > { %3506 = vst [vmem:[%s5770_s29 + $0x8] sm:$0xff] %v3378_v50  ;;  %4625 = vtanh.f32 %v6069_v9  ;;  %v4395_v50 = vld [vmem:[%s6974_s5 + $0x180] sm:$0xf0] }
 0x338   : > { %v2312_v5 = vpop.f32.mrf.mxu3  ;;  %v2401_v41 = vpop.f32.mrf.mxu0  ;;  %2494 = vmatmul.bf16.gmra.mxu1 %v5581_v51  ;;  %2583 = vmatmul.bf16.gmra.mxu2 %v5589_v28  ;;  %v4056_v47 = vor.u32 %v4395_v50, %v4055_v13 }
 0x339   : > { %v2313_v19 = vadd.f32 %v2312_v5, %v6034_v43 }
 0x33a   : > { %2976 = vmatpush.bf16.msra.mxu3 %v4056_v47 }
 0x33b   : > { %v6247_v56 = vadd.f32 %v2401_v41, %v2313_v19  ;;  %v2544_v63 = vpop.f32.mrf.mxu2  ;;  %2716 = vmatmul.bf16.vlgmr.msrb.gmra.mxu0 %v7007_v54 }
 0x33c   : > { %v4624_v18 = vpop.eup %4623  ;;  %v2545_v1 = vadd.f32 %v2544_v63, %v2456_v58 }
 0x33d   : > { %v3382_v36 = vpack.c.bf16 %v4624_v18, %v4622_v23  ;;  %v2457_v6 = vpop.f32.mrf.mxu1  ;;  %v4626_v41 = vpop.eup %4625 }
 0x33e   : > { %4627 = vtanh.f32 %v2545_v1  ;;  %v2458_v9 = vadd.f32 %v2457_v6, %v6203_v30  ;;  %v4049_v6 = vld [vmem:[%s6974_s5 + $0x17c] sm:$0xf0] }
 0x33f   : > { %3511 = vst [vmem:[%s5770_s29 + $0x24] sm:$0xff] %v3382_v36  ;;  %4629 = vtanh.f32 %v6076_v12  ;;  %v4391_v36 = vld [vmem:[%s6974_s5 + $0x164] sm:$0xf] }
 0x340   : > { %v2314_v60 = vpop.f32.mrf.mxu3  ;;  %v2403_v24 = vpop.f32.mrf.mxu0  ;;  %v4052_v12 = vor.u32 %v4391_v36, %v4049_v6 }
 0x341   : > { %v2315_v5 = vadd.f32 %v2314_v60, %v6034_v43 }
 0x342   : > { %2798 = vmatpush.bf16.msra.mxu1 %v4052_v12 }
 0x343   : > { %v6260_v19 = vadd.f32 %v2403_v24, %v2315_v5  ;;  %v2546_v58 = vpop.f32.mrf.mxu2 }
 0x344   : > { %v4628_v23 = vpop.eup %4627  ;;  %v2547_v63 = vadd.f32 %v2546_v58, %v2458_v9 }
 0x345   : > { %v3386_v18 = vpack.c.bf16 %v4628_v23, %v4626_v41  ;;  %v2460_v1 = vpop.f32.mrf.mxu1  ;;  %2632 = vmatmul.bf16.gmra.mxu3 %v5347_v16  ;;  %v4630_v47 = vpop.eup %4629 }
 0x346   : > { %4631 = vtanh.f32 %v2547_v63  ;;  %v2461_v24 = vadd.f32 %v2460_v1, %v6203_v30  ;;  %v4245_v1 = vld [vmem:[%s6974_s5 + $0x304] sm:$0xf0] }
 0x347   : > { %3515 = vst [vmem:[%s5770_s29 + $0x40] sm:$0xff] %v3386_v18  ;;  %4633 = vtanh.f32 %v6091_v59  ;;  %v4440_v18 = vld [vmem:[%s6974_s5 + $0x2ec] sm:$0xf] }
 0x348   : > { %v2317_v13 = vpop.f32.mrf.mxu3  ;;  %v2406_v50 = vpop.f32.mrf.mxu0  ;;  %2499 = vmatmul.bf16.gmra.mxu1 %v5599_v52  ;;  %2588 = vmatmul.bf16.gmra.mxu2 %v5613_v37 }
 0x349   : > { %v2318_v60 = vadd.f32 %v2317_v13, %v6034_v43  ;;  %v4248_v13 = vor.u32 %v4440_v18, %v4245_v1 }
 0x34b   : > { %v6275_v5 = vadd.f32 %v2406_v50, %v2318_v60  ;;  %v2549_v9 = vpop.f32.mrf.mxu2  ;;  %2721 = vmatmul.bf16.gmra.mxu0 %v5352_v29  ;;  %2888 = vmatpush.bf16.msra.mxu2 %v4248_v13 }
 0x34c   : > { %v4632_v41 = vpop.eup %4631  ;;  %v2550_v58 = vadd.f32 %v2549_v9, %v2461_v24 }
 0x34d   : > { %v3390_v23 = vpack.c.bf16 %v4632_v41, %v4630_v47  ;;  %v2462_v63 = vpop.f32.mrf.mxu1  ;;  %v4634_v12 = vpop.eup %4633 }
 0x34e   : > { %4635 = vtanh.f32 %v2550_v58  ;;  %v2463_v59 = vadd.f32 %v2462_v63, %v6203_v30  ;;  %v4451_v63 = vld [vmem:[%s6974_s5 + $0x340] sm:$0xf0] }
 0x34f   : > { %3519 = vst [vmem:[%s5770_s29 + $0x5c] sm:$0xff] %v3390_v23  ;;  %4637 = vtanh.f32 %v6104_v11  ;;  %v4279_v23 = vld [vmem:[%s6974_s5 + $0x328] sm:$0xf] }
 0x350   : > { %v2319_v36 = vpop.f32.mrf.mxu3  ;;  %v2408_v6 = vpop.f32.mrf.mxu0  ;;  %v6301_v11 = vor.u32 %v4451_v63, %v4279_v23  ;;  %v4388_v23 = vld [vmem:[%s6974_s5 + $0x148] sm:$0xf0] }
 0x351   : > { %v2320_v50 = vadd.f32 %v2319_v36, %v6034_v43 }
 0x352   : > { %3065 = vmatpush.bf16.msra.mxu0 %v6301_v11 }
 0x353   : > { %v6288_v60 = vadd.f32 %v2408_v6, %v2320_v50  ;;  %v2551_v24 = vpop.f32.mrf.mxu2 }
 0x354   : > { %v4636_v47 = vpop.eup %4635  ;;  %v2552_v9 = vadd.f32 %v2551_v24, %v2463_v59 }
 0x355   : > { %v3394_v41 = vpack.c.bf16 %v4636_v47, %v4634_v12  ;;  %v2465_v58 = vpop.f32.mrf.mxu1  ;;  %2637 = vmatmul.bf16.gmra.mxu3 %v5368_v48  ;;  %v4638_v13 = vpop.eup %4637  ;;  %v7008_v12 = vld [vmem:[#allocation3_spill] sm:$0xff] }
 0x356   : > { %4639 = vtanh.f32 %v2552_v9  ;;  %v2466_v6 = vadd.f32 %v2465_v58, %v6203_v30  ;;  %v4027_v58 = vld [vmem:[%s6974_s5 + $0x130] sm:$0xf] }
 0x357   : > { %3523 = vst [vmem:[%s5770_s29 + $0x78] sm:$0xff] %v3394_v41  ;;  %4641 = vtanh.f32 %v6113_v8 }
 0x358   : > { %v2322_v18 = vpop.f32.mrf.mxu3  ;;  %v2411_v1 = vpop.f32.mrf.mxu0  ;;  %2504 = vmatmul.bf16.gmra.mxu1 %v5629_v7  ;;  %2593 = vmatmul.bf16.gmra.mxu2 %v5637_v3 }
 0x359   : > { %v2323_v36 = vadd.f32 %v2322_v18, %v6034_v43 }
 0x35b   : > { %v6306_v50 = vadd.f32 %v2411_v1, %v2323_v36  ;;  %v2554_v59 = vpop.f32.mrf.mxu2  ;;  %2726 = vmatmul.bf16.gmra.mxu0 %v7008_v12  ;;  %v4028_v1 = vor.u32 %v4388_v23, %v4027_v58  ;;  %v4384_v58 = vld [vmem:[%s6974_s5 + $0x12c] sm:$0xf] }
 0x35c   : > { %v4640_v24 = vpop.eup %4639  ;;  %v2555_v47 = vadd.f32 %v2554_v59, %v2466_v6 }
 0x35d   : > { %v3398_v9 = vpack.c.bf16 %v4640_v24, %v4638_v13  ;;  %v2467_v41 = vpop.f32.mrf.mxu1  ;;  %2977 = vmatpush.bf16.msra.mxu3 %v4028_v1  ;;  %v4642_v6 = vpop.eup %4641 }
 0x35e   : > { %4643 = vtanh.f32 %v2555_v47  ;;  %v2468_v8 = vadd.f32 %v2467_v41, %v6203_v30  ;;  %v4021_v41 = vld [vmem:[%s6974_s5 + $0x144] sm:$0xf0] }
 0x35f   : > { %3527 = vst [vmem:[%s5770_s29 + $0x94] sm:$0xff] %v3398_v9  ;;  %4645 = vtanh.f32 %v6120_v55  ;;  %v4024_v55 = vor.u32 %v4384_v58, %v4021_v41  ;;  %v4433_v58 = vld [vmem:[%s6974_s5 + $0x2b4] sm:$0xf] }
 0x360   : > { %v2324_v63 = vpop.f32.mrf.mxu3  ;;  %v2413_v18 = vpop.f32.mrf.mxu0 }
 0x361   : > { %v2325_v36 = vadd.f32 %v2324_v63, %v6034_v43  ;;  %2799 = vmatpush.bf16.msra.mxu1 %v4024_v55 }
 0x363   : > { %v6319_v13 = vadd.f32 %v2413_v18, %v2325_v36  ;;  %v2556_v59 = vpop.f32.mrf.mxu2 }
 0x364   : > { %v4644_v24 = vpop.eup %4643  ;;  %v2557_v47 = vadd.f32 %v2556_v59, %v2468_v8 }
 0x365   : > { %v3402_v9 = vpack.c.bf16 %v4644_v24, %v4642_v6  ;;  %v2470_v3 = vpop.f32.mrf.mxu1  ;;  %2642 = vmatmul.bf16.gmra.mxu3 %v5399_v25  ;;  %v4646_v36 = vpop.eup %4645 }
 0x366   : > { %4647 = vtanh.f32 %v2557_v47  ;;  %v2471_v1 = vadd.f32 %v2470_v3, %v6203_v30  ;;  %v4217_v3 = vld [vmem:[%s6974_s5 + $0x2cc] sm:$0xf0] }
 0x367   : > { %3531 = vst [vmem:[%s5770_s29 + $0xb0] sm:$0xff] %v3402_v9  ;;  %4649 = vtanh.f32 %v6135_v14  ;;  %v4377_v14 = vld [vmem:[%s6974_s5 + $0xf4] sm:$0xf] }
 0x368   : > { %v2327_v23 = vpop.f32.mrf.mxu3  ;;  %v2416_v63 = vpop.f32.mrf.mxu0  ;;  %2509 = vmatmul.bf16.gmra.mxu1 %v5647_v34  ;;  %2598 = vmatmul.bf16.gmra.mxu2 %v5661_v62 }
 0x369   : > { %v2328_v18 = vadd.f32 %v2327_v23, %v6034_v43 }
 0x36b   : > { %v6334_v8 = vadd.f32 %v2416_v63, %v2328_v18  ;;  %v2559_v6 = vpop.f32.mrf.mxu2  ;;  %2731 = vmatmul.bf16.gmra.mxu0 %v5404_v39  ;;  %v4220_v63 = vor.u32 %v4433_v58, %v4217_v3 }
 0x36c   : > { %v4648_v59 = vpop.eup %4647  ;;  %v2560_v24 = vadd.f32 %v2559_v6, %v2471_v1  ;;  %v3993_v1 = vld [vmem:[%s6974_s5 + $0x10c] sm:$0xf0] }
 0x36d   : > { %v3406_v47 = vpack.c.bf16 %v4648_v59, %v4646_v36  ;;  %v2472_v9 = vpop.f32.mrf.mxu1  ;;  %2889 = vmatpush.bf16.msra.mxu2 %v4220_v63  ;;  %v4650_v36 = vpop.eup %4649  ;;  %v4426_v63 = vld [vmem:[%s6974_s5 + $0x27c] sm:$0xf] }
 0x36e   : > { %4651 = vtanh.f32 %v2560_v24  ;;  %v2473_v18 = vadd.f32 %v2472_v9, %v6203_v30  ;;  %v3996_v24 = vor.u32 %v4377_v14, %v3993_v1 }
 0x36f   : > { %3535 = vst [vmem:[%s5770_s29 + $0xcc] sm:$0xff] %v3406_v47  ;;  %4653 = vtanh.f32 %v6148_v20  ;;  %v4251_v20 = vld [vmem:[%s6974_s5 + $0x2f0] sm:$0xf] }
 0x370   : > { %v2329_v41 = vpop.f32.mrf.mxu3  ;;  %v2418_v23 = vpop.f32.mrf.mxu0  ;;  %2800 = vmatpush.bf16.msra.mxu1 %v3996_v24 }
 0x371   : > { %v2330_v55 = vadd.f32 %v2329_v41, %v6034_v43  ;;  %v4370_v41 = vld [vmem:[%s6974_s5 + $0xbc] sm:$0xf] }
 0x373   : > { %v6353_v6 = vadd.f32 %v2418_v23, %v2330_v55  ;;  %v2561_v59 = vpop.f32.mrf.mxu2  ;;  %v3965_v23 = vld [vmem:[%s6974_s5 + $0xd4] sm:$0xf0]  ;;  %v4444_v55 = vld [vmem:[%s6974_s5 + $0x308] sm:$0xf0] }
 0x374   : > { %v4652_v47 = vpop.eup %4651  ;;  %v2562_v58 = vadd.f32 %v2561_v59, %v2473_v18  ;;  %v3968_v18 = vor.u32 %v4370_v41, %v3965_v23  ;;  %v4189_v59 = vld [vmem:[%s6974_s5 + $0x294] sm:$0xf0]  ;;  %v3937_v41 = vld [vmem:[%s6974_s5 + $0x9c] sm:$0xf0]  ;;  %v4419_v23 = vld [vmem:[%s6974_s5 + $0x244] sm:$0xf] }
 0x375   : > { %v3410_v9 = vpack.c.bf16 %v4652_v47, %v4650_v36  ;;  %v2475_v3 = vpop.f32.mrf.mxu1  ;;  %2647 = vmatmul.bf16.gmra.mxu3 %v5424_v61  ;;  %v6375_v36 = vor.u32 %v4444_v55, %v4251_v20  ;;  %v4192_v47 = vor.u32 %v4426_v63, %v4189_v59  ;;  %v4654_v20 = vpop.eup %4653 }
 0x376   : > { %4655 = vtanh.f32 %v2562_v58  ;;  %2801 = vmatpush.bf16.msra.mxu1 %v3968_v18  ;;  %v2476_v58 = vadd.f32 %v2475_v3, %v6203_v30  ;;  %v4161_v18 = vld [vmem:[%s6974_s5 + $0x25c] sm:$0xf0] }
 0x377   : > { %3539 = vst [vmem:[%s5770_s29 + $0xe8] sm:$0xff] %v3410_v9  ;;  %3066 = vmatpush.bf16.msra.mxu0 %v6375_v36  ;;  %v4363_v9 = vld [vmem:[%s6974_s5 + $0x84] sm:$0xf]  ;;  %2890 = vmatpush.bf16.msra.mxu2 %v4192_v47  ;;  %4657 = vtanh.f32 %v6157_v35  ;;  %v4412_v47 = vld [vmem:[%s6974_s5 + $0x20c] sm:$0xf] }
 0x378   : > { %v2332_v14 = vpop.f32.mrf.mxu3  ;;  %v2421_v1 = vpop.f32.mrf.mxu0  ;;  %2514 = vmatmul.bf16.gmra.mxu1 %v5677_v42  ;;  %2603 = vmatmul.bf16.gmra.mxu2 %v5685_v4  ;;  %v3940_v3 = vor.u32 %v4363_v9, %v3937_v41  ;;  %v4164_v4 = vor.u32 %v4419_v23, %v4161_v18  ;;  %v3999_v35 = vld [vmem:[%s6974_s5 + $0xf8] sm:$0xf] }
 0x379   : > { %v2333_v24 = vadd.f32 %v2332_v14, %v6034_v43 }
 0x37a   : > { %2802 = vmatpush.bf16.msra.mxu1 %v3940_v3 }
 0x37b   : > { %v6392_v55 = vadd.f32 %v2421_v1, %v2333_v24  ;;  %v2564_v63 = vpop.f32.mrf.mxu2  ;;  %2736 = vmatmul.bf16.gmra.mxu0 %v5447_v22  ;;  %v4356_v1 = vld [vmem:[%s6974_s5 + $0x4c] sm:$0xf]  ;;  %v3909_v24 = vld [vmem:[%s6974_s5 + $0x64] sm:$0xf0]  ;;  %2891 = vmatpush.bf16.msra.mxu2 %v4164_v4  ;;  %v3881_v4 = vld [vmem:[%s6974_s5 + $0x2c] sm:$0xf0] }
 0x37c   : > { %v4656_v14 = vpop.eup %4655  ;;  %v2565_v59 = vadd.f32 %v2564_v63, %v2476_v58  ;;  %v4381_v58 = vld [vmem:[%s6974_s5 + $0x110] sm:$0xf0]  ;;  %v3912_v9 = vor.u32 %v4356_v1, %v3909_v24  ;;  %v4133_v63 = vld [vmem:[%s6974_s5 + $0x224] sm:$0xf0] }
 0x37d   : > { %v3414_v42 = vpack.c.bf16 %v4656_v14, %v4654_v20  ;;  %v2477_v62 = vpop.f32.mrf.mxu1  ;;  %v4000_v20 = vor.u32 %v4381_v58, %v3999_v35  ;;  %v4349_v14 = vld [vmem:[%s6974_s5 + $0x14] sm:$0xf]  ;;  %v4658_v1 = vpop.eup %4657  ;;  %v4105_v35 = vld [vmem:[%s6974_s5 + $0x1ec] sm:$0xf0] }
 0x37e   : > { %4659 = vtanh.f32 %v2565_v59  ;;  %2803 = vmatpush.bf16.msra.mxu1 %v3912_v9  ;;  %v2478_v18 = vadd.f32 %v2477_v62, %v6203_v30  ;;  %v4405_v59 = vld [vmem:[%s6974_s5 + $0x1d4] sm:$0xf]  ;;  %v3884_v62 = vor.u32 %v4349_v14, %v3881_v4 }
 0x37f   : > { %3543 = vst [vmem:[%s5770_s29 + $0x104] sm:$0xff] %v3414_v42  ;;  %v4136_v42 = vor.u32 %v4412_v47, %v4133_v63  ;;  %2978 = vmatpush.bf16.msra.mxu3 %v4000_v20  ;;  %4661 = vtanh.f32 %v6170_v10 }
 0x380   : > { %v2334_v41 = vpop.f32.mrf.mxu3  ;;  %v2423_v23 = vpop.f32.mrf.mxu0 }
 0x381   : > { %v2335_v3 = vadd.f32 %v2334_v41, %v6034_v43  ;;  %2892 = vmatpush.bf16.msra.mxu2 %v4136_v42  ;;  %v4108_v41 = vor.u32 %v4405_v59, %v4105_v35 }
 0x382   : > { %2804 = vmatpush.bf16.msra.mxu1 %v3884_v62 }
 0x383   : > { %v6429_v24 = vadd.f32 %v2423_v23, %v2335_v3  ;;  %v2566_v47 = vpop.f32.mrf.mxu2 }
 0x384   : > { %v4660_v58 = vpop.eup %4659  ;;  %v2567_v9 = vadd.f32 %v2566_v47, %v2478_v18 }
 0x385   : > { %v3418_v20 = vpack.c.bf16 %v4660_v58, %v4658_v1  ;;  %v2480_v63 = vpop.f32.mrf.mxu1  ;;  %2652 = vmatmul.bf16.gmra.mxu3 %v5494_v0  ;;  %2893 = vmatpush.bf16.msra.mxu2 %v4108_v41  ;;  %v4662_v18 = vpop.eup %4661 }
 0x386   : > { %4663 = vtanh.f32 %v2567_v9  ;;  %v2481_v10 = vadd.f32 %v2480_v63, %v6203_v30 }
 0x387   : > { %3547 = vst [vmem:[%s5770_s29 + $0x120] sm:$0xff] %v3418_v20  ;;  %4665 = vtanh.f32 %v6185_v2 }
 0x388   : > { %v2337_v23 = vpop.f32.mrf.mxu3  ;;  %v2426_v3 = vpop.f32.mrf.mxu0  ;;  %2519 = vmatmul.bf16.gmra.mxu1 %v5701_v57  ;;  %2608 = vmatmul.bf16.gmra.mxu2 %v5715_v40 }
 0x389   : > { %v2338_v42 = vadd.f32 %v2337_v23, %v6034_v43  ;;  %4471 = vmatpush.bf16.msrb.mxu2 %v6242_v45 }
 0x38b   : > { %v6442_v14 = vadd.f32 %v2426_v3, %v2338_v42  ;;  %v2569_v4 = vpop.f32.mrf.mxu2  ;;  %2741 = vmatmul.bf16.gmra.mxu0 %v5503_v17  ;;  %v4437_v42 = vld [vmem:[%s6974_s5 + $0x2d0] sm:$0xf0] }
 0x38c   : > { %v4664_v59 = vpop.eup %4663  ;;  %v2570_v1 = vadd.f32 %v2569_v4, %v2481_v10 }
 0x38d   : > { %v3422_v47 = vpack.c.bf16 %v4664_v59, %v4662_v18  ;;  %v2482_v62 = vpop.f32.mrf.mxu1  ;;  %4472 = vmatpush.bf16.msrb.mxu2 %v6301_v11  ;;  %v4666_v41 = vpop.eup %4665 }
 0x38e   : > { %4667 = vtanh.f32 %v2570_v1  ;;  %v2483_v9 = vadd.f32 %v2482_v62, %v6203_v30 }
 0x38f   : > { %3551 = vst [vmem:[%s5770_s29 + $0x13c] sm:$0xff] %v3422_v47  ;;  %4669 = vtanh.f32 %v6198_v15 }
 0x390   : > { %v2339_v45 = vpop.f32.mrf.mxu3  ;;  %v2428_v35 = vpop.f32.mrf.mxu0 }
 0x391   : > { %v2340_v58 = vadd.f32 %v2339_v45, %v6034_v43  ;;  %4473 = vmatpush.bf16.msrb.mxu2 %v6375_v36  ;;  %v4223_v36 = vld [vmem:[%s6974_s5 + $0x2b8] sm:$0xf] }
 0x392   : > { %v4224_v15 = vor.u32 %v4437_v42, %v4223_v36 }
 0x393   : > { %v6451_v20 = vadd.f32 %v2428_v35, %v2340_v58  ;;  %v2571_v63 = vpop.f32.mrf.mxu2 }
 0x394   : > { %v4668_v2 = vpop.eup %4667  ;;  %v2572_v23 = vadd.f32 %v2571_v63, %v2483_v9  ;;  %3067 = vmatpush.bf16.msra.mxu0 %v4224_v15  ;;  %v4374_v63 = vld [vmem:[%s6974_s5 + $0xd8] sm:$0xf0] }
 0x395   : > { %v3426_v11 = vpack.c.bf16 %v4668_v2, %v4666_v41  ;;  %v2485_v3 = vpop.f32.mrf.mxu1  ;;  %2657 = vmatmul.bf16.gmra.mxu3 %v5511_v38  ;;  %4474 = vmatpush.bf16.msrb.mxu2 %v4224_v15  ;;  %v4670_v1 = vpop.eup %4669  ;;  %v3971_v41 = vld [vmem:[%s6974_s5 + $0xc0] sm:$0xf] }
 0x396   : > { %4671 = vtanh.f32 %v2572_v23  ;;  %v2486_v59 = vadd.f32 %v2485_v3, %v6203_v30 }
 0x397   : > { %3555 = vst [vmem:[%s5770_s29 + $0x158] sm:$0xff] %v3426_v11  ;;  %4673 = vtanh.f32 %v6216_v33  ;;  %v3972_v11 = vor.u32 %v4374_v63, %v3971_v41 }
 0x398   : > { %v2342_v10 = vpop.f32.mrf.mxu3  ;;  %v2431_v18 = vpop.f32.mrf.mxu0  ;;  %2524 = vmatmul.bf16.gmra.mxu1 %v5731_v27  ;;  %2613 = vmatmul.bf16.gmra.mxu2 %v5748_v31 }
 0x399   : > { %v2343_v4 = vadd.f32 %v2342_v10, %v6034_v43  ;;  %2979 = vmatpush.bf16.msra.mxu3 %v3972_v11 }
 0x39b   : > { %v6466_v47 = vadd.f32 %v2431_v18, %v2343_v4  ;;  %v2574_v62 = vpop.f32.mrf.mxu2  ;;  %2746 = vmatmul.bf16.gmra.mxu0 %v5521_v53 }
 0x39c   : > { %v4672_v45 = vpop.eup %4671  ;;  %v2575_v35 = vadd.f32 %v2574_v62, %v2486_v59 }
 0x39d   : > { %v3430_v58 = vpack.c.bf16 %v4672_v45, %v4670_v1  ;;  %v2487_v9 = vpop.f32.mrf.mxu1  ;;  %v4674_v36 = vpop.eup %4673 }
 0x39e   : > { %4675 = vtanh.f32 %v2575_v35  ;;  %v2488_v33 = vadd.f32 %v2487_v9, %v6203_v30 }
 0x39f   : > { %3559 = vst [vmem:[%s5770_s29 + $0x174] sm:$0xff] %v3430_v58  ;;  %4677 = vtanh.f32 %v6229_v46 }
 0x3a0   : > { %v2344_v2 = vpop.f32.mrf.mxu3  ;;  %v2433_v23 = vpop.f32.mrf.mxu0 }
 0x3a1   : > { %v2345_v3 = vadd.f32 %v2344_v2, %v6034_v43 }
 0x3a3   : > { %v6479_v42 = vadd.f32 %v2433_v23, %v2345_v3  ;;  %v2576_v10 = vpop.f32.mrf.mxu2 }
 0x3a4   : > { %v4676_v18 = vpop.eup %4675  ;;  %v2577_v15 = vadd.f32 %v2576_v10, %v2488_v33 }
 0x3a5   : > { %v3434_v4 = vpack.c.bf16 %v4676_v18, %v4674_v36  ;;  %v2490_v59 = vpop.f32.mrf.mxu1  ;;  %2662 = vmatmul.bf16.gmra.mxu3 %v7005_v21  ;;  %v4678_v58 = vpop.eup %4677 }
 0x3a6   : > { %4679 = vtanh.f32 %v2577_v15  ;;  %v2491_v35 = vadd.f32 %v2490_v59, %v6203_v30 }
 0x3a7   : > { %3563 = vst [vmem:[%s5770_s29 + $0x190] sm:$0xff] %v3434_v4  ;;  %4681 = vtanh.f32 %v6247_v56 }
 0x3a8   : > { %v2347_v1 = vpop.f32.mrf.mxu3  ;;  %v2436_v62 = vpop.f32.mrf.mxu0  ;;  %2805 = vmatmul.bf16.vlgmr.msra.gmra.mxu1 %v5313_v44  ;;  %2894 = vmatmul.bf16.vlgmr.msra.gmra.mxu2 %v7007_v54 }
 0x3a9   : > { %v2348_v45 = vadd.f32 %v2347_v1, %v6034_v43 }
 0x3ab   : > { %v6488_v9 = vadd.f32 %v2436_v62, %v2348_v45  ;;  %v2579_v46 = vpop.f32.mrf.mxu2  ;;  %2751 = vmatmul.bf16.gmra.mxu0 %v7006_v26  ;;  %v6502_v62 = vld [vmem:[%s6975_s6] sm:$0x7f] }
 0x3ac   : > { %v4680_v41 = vpop.eup %4679  ;;  %v2580_v63 = vadd.f32 %v2579_v46, %v2491_v35  ;;  %v4195_v45 = vld [vmem:[%s6974_s5 + $0x280] sm:$0xf] }
 0x3ad   : > { %v3438_v2 = vpack.c.bf16 %v4680_v41, %v4678_v58  ;;  %v2492_v23 = vpop.f32.mrf.mxu1  ;;  %v4682_v10 = vpop.eup %4681 }
 0x3ae   : > { %4683 = vtanh.f32 %v2580_v63  ;;  %v2493_v36 = vadd.f32 %v2492_v23, %v6203_v30 }
 0x3af   : > { %3567 = vst [vmem:[%s5770_s29 + $0x1ac] sm:$0xff] %v3438_v2  ;;  %4685 = vtanh.f32 %v6260_v19  ;;  %v4430_v19 = vld [vmem:[%s6974_s5 + $0x298] sm:$0xf0] }
 0x3b0   : > { %v2349_v11 = vpop.f32.mrf.mxu3  ;;  %v2438_v3 = vpop.f32.mrf.mxu0  ;;  %v4196_v46 = vor.u32 %v4430_v19, %v4195_v45 }
 0x3b1   : > { %v2350_v33 = vadd.f32 %v2349_v11, %v6034_v43  ;;  %v6505_v43 = vperm.slane %v6502_v62, 4 }
 0x3b2   : > { %3068 = vmatpush.bf16.msra.mxu0 %v4196_v46  ;;  %4475 = vmatpush.bf16.msrb.mxu2 %v4196_v46 }
 0x3b3   : > { %v6495_v18 = vadd.f32 %v2438_v3, %v2350_v33  ;;  %v2581_v15 = vpop.f32.mrf.mxu2 }
 0x3b4   : > { %v4684_v4 = vpop.eup %4683  ;;  %v2582_v59 = vadd.f32 %v2581_v15, %v2493_v36  ;;  %v3943_v15 = vld [vmem:[%s6974_s5 + $0x88] sm:$0xf] }
 0x3b5   : > { %v3442_v56 = vpack.c.bf16 %v4684_v4, %v4682_v10  ;;  %v2495_v1 = vpop.f32.mrf.mxu1  ;;  %2667 = vmatmul.bf16.gmra.mxu3 %v5550_v32  ;;  %v4686_v2 = vpop.eup %4685  ;;  %v4367_v4 = vld [vmem:[%s6974_s5 + $0xa0] sm:$0xf0] }
 0x3b6   : > { %4687 = vtanh.f32 %v2582_v59  ;;  %v2496_v63 = vadd.f32 %v2495_v1, %v6203_v30  ;;  %v3944_v1 = vor.u32 %v4367_v4, %v3943_v15 }
 0x3b7   : > { %3571 = vst [vmem:[%s5770_s29 + $0x1c8] sm:$0xff] %v3442_v56  ;;  %4689 = vtanh.f32 %v6275_v5 }
 0x3b8   : > { %v2628_v35 = vpop.f32.mrf.mxu3  ;;  %v2717_v58 = vpop.f32.mrf.mxu0  ;;  %2810 = vmatmul.bf16.gmra.mxu1 %v5347_v16  ;;  %2899 = vmatmul.bf16.gmra.mxu2 %v5352_v29 }
 0x3b9   : > { %v2629_v41 = vadd.f32 %v2628_v35, %v6505_v43  ;;  %2980 = vmatpush.bf16.msra.mxu3 %v3944_v1 }
 0x3bb   : > { %v6518_v23 = vadd.f32 %v2717_v58, %v2629_v41  ;;  %v2584_v11 = vpop.f32.mrf.mxu2  ;;  %2756 = vmatmul.bf16.gmra.mxu0 %v5565_v49 }
 0x3bc   : > { %v4688_v3 = vpop.eup %4687  ;;  %v2585_v33 = vadd.f32 %v2584_v11, %v2496_v63 }
 0x3bd   : > { %v3446_v36 = vpack.c.bf16 %v4688_v3, %v4686_v2  ;;  %v2497_v10 = vpop.f32.mrf.mxu1  ;;  %v4690_v19 = vpop.eup %4689 }
 0x3be   : > { %4691 = vtanh.f32 %v2585_v33  ;;  %v2498_v5 = vadd.f32 %v2497_v10, %v6203_v30 }
 0x3bf   : > { %3575 = vst [vmem:[%s5770_s29 + $0x1e4] sm:$0xff] %v3446_v36  ;;  %4693 = vtanh.f32 %v6288_v60 }
 0x3c0   : > { %v2630_v59 = vpop.f32.mrf.mxu3  ;;  %v2719_v56 = vpop.f32.mrf.mxu0 }
 0x3c1   : > { %v2631_v45 = vadd.f32 %v2630_v59, %v6505_v43 }
 0x3c3   : > { %v6531_v35 = vadd.f32 %v2719_v56, %v2631_v45  ;;  %v2586_v58 = vpop.f32.mrf.mxu2 }
 0x3c4   : > { %v4692_v46 = vpop.eup %4691  ;;  %v2587_v41 = vadd.f32 %v2586_v58, %v2498_v5 }
 0x3c5   : > { %v3450_v63 = vpack.c.bf16 %v4692_v46, %v4690_v19  ;;  %v2500_v2 = vpop.f32.mrf.mxu1  ;;  %2672 = vmatmul.bf16.gmra.mxu3 %v5581_v51  ;;  %v4694_v10 = vpop.eup %4693 }
 0x3c6   : > { %4695 = vtanh.f32 %v2587_v41  ;;  %v2501_v36 = vadd.f32 %v2500_v2, %v6203_v30 }
 0x3c7   : > { %3579 = vst [vmem:[%s5770_s29 + $0x200] sm:$0xff] %v3450_v63  ;;  %4697 = vtanh.f32 %v6306_v50 }
 0x3c8   : > { %v2633_v11 = vpop.f32.mrf.mxu3  ;;  %v2722_v3 = vpop.f32.mrf.mxu0  ;;  %2815 = vmatmul.bf16.gmra.mxu1 %v5368_v48  ;;  %2904 = vmatmul.bf16.gmra.mxu2 %v7008_v12 }
 0x3c9   : > { %v2634_v33 = vadd.f32 %v2633_v11, %v6505_v43 }
 0x3cb   : > { %v6540_v15 = vadd.f32 %v2722_v3, %v2634_v33  ;;  %v2589_v60 = vpop.f32.mrf.mxu2  ;;  %2761 = vmatmul.bf16.gmra.mxu0 %v5589_v28  ;;  %v4167_v33 = vld [vmem:[%s6974_s5 + $0x248] sm:$0xf] }
 0x3cc   : > { %v4696_v4 = vpop.eup %4695  ;;  %v2590_v59 = vadd.f32 %v2589_v60, %v2501_v36  ;;  %v4423_v36 = vld [vmem:[%s6974_s5 + $0x260] sm:$0xf0] }
 0x3cd   : > { %v3454_v56 = vpack.c.bf16 %v4696_v4, %v4694_v10  ;;  %v2502_v1 = vpop.f32.mrf.mxu1  ;;  %v4698_v46 = vpop.eup %4697 }
 0x3ce   : > { %4699 = vtanh.f32 %v2590_v59  ;;  %v2503_v58 = vadd.f32 %v2502_v1, %v6203_v30 }
 0x3cf   : > { %3583 = vst [vmem:[%s5770_s29 + $0x21c] sm:$0xff] %v3454_v56  ;;  %4701 = vtanh.f32 %v6319_v13  ;;  %v4168_v13 = vor.u32 %v4423_v36, %v4167_v33 }
 0x3d0   : > { %v2635_v45 = vpop.f32.mrf.mxu3  ;;  %v2724_v5 = vpop.f32.mrf.mxu0 }
 0x3d1   : > { %v2636_v19 = vadd.f32 %v2635_v45, %v6505_v43  ;;  %3069 = vmatpush.bf16.msra.mxu0 %v4168_v13  ;;  %4476 = vmatpush.bf16.msrb.mxu2 %v4168_v13 }
 0x3d3   : > { %v6547_v41 = vadd.f32 %v2724_v5, %v2636_v19  ;;  %v2591_v63 = vpop.f32.mrf.mxu2 }
 0x3d4   : > { %v4700_v2 = vpop.eup %4699  ;;  %v2592_v11 = vadd.f32 %v2591_v63, %v2503_v58  ;;  %v3915_v63 = vld [vmem:[%s6974_s5 + $0x50] sm:$0xf] }
 0x3d5   : > { %v3458_v50 = vpack.c.bf16 %v4700_v2, %v4698_v46  ;;  %v2505_v3 = vpop.f32.mrf.mxu1  ;;  %2677 = vmatmul.bf16.gmra.mxu3 %v5599_v52  ;;  %v4702_v56 = vpop.eup %4701  ;;  %v4360_v2 = vld [vmem:[%s6974_s5 + $0x68] sm:$0xf0] }
 0x3d6   : > { %4703 = vtanh.f32 %v2592_v11  ;;  %v2506_v59 = vadd.f32 %v2505_v3, %v6203_v30  ;;  %v3916_v3 = vor.u32 %v4360_v2, %v3915_v63  ;;  %v7009_v2 = vld [vmem:[#allocation8_spill] sm:$0xff] }
 0x3d7   : > { %3587 = vst [vmem:[%s5770_s29 + $0x238] sm:$0xff] %v3458_v50  ;;  %4705 = vtanh.f32 %v6334_v8 }
 0x3d8   : > { %v2638_v10 = vpop.f32.mrf.mxu3  ;;  %v2727_v60 = vpop.f32.mrf.mxu0  ;;  %2820 = vmatmul.bf16.gmra.mxu1 %v5399_v25  ;;  %2909 = vmatmul.bf16.gmra.mxu2 %v5404_v39 }
 0x3d9   : > { %v2639_v4 = vadd.f32 %v2638_v10, %v6505_v43  ;;  %2981 = vmatpush.bf16.msra.mxu3 %v3916_v3 }
 0x3db   : > { %v6562_v1 = vadd.f32 %v2727_v60, %v2639_v4  ;;  %v2594_v45 = vpop.f32.mrf.mxu2  ;;  %2766 = vmatmul.bf16.gmra.mxu0 %v5613_v37 }
 0x3dc   : > { %v4704_v5 = vpop.eup %4703  ;;  %v2595_v19 = vadd.f32 %v2594_v45, %v2506_v59 }
 0x3dd   : > { %v3462_v58 = vpack.c.bf16 %v4704_v5, %v4702_v56  ;;  %v2507_v46 = vpop.f32.mrf.mxu1  ;;  %v4706_v36 = vpop.eup %4705 }
 0x3de   : > { %4707 = vtanh.f32 %v2595_v19  ;;  %v2508_v8 = vadd.f32 %v2507_v46, %v6203_v30 }
 0x3df   : > { %3591 = vst [vmem:[%s5770_s29 + $0x254] sm:$0xff] %v3462_v58  ;;  %4709 = vtanh.f32 %v6353_v6 }
 0x3e0   : > { %v2640_v11 = vpop.f32.mrf.mxu3  ;;  %v2729_v50 = vpop.f32.mrf.mxu0 }
 0x3e1   : > { %v2641_v33 = vadd.f32 %v2640_v11, %v6505_v43 }
 0x3e3   : > { %v6575_v10 = vadd.f32 %v2729_v50, %v2641_v33  ;;  %v2596_v60 = vpop.f32.mrf.mxu2 }
 0x3e4   : > { %v4708_v13 = vpop.eup %4707  ;;  %v2597_v4 = vadd.f32 %v2596_v60, %v2508_v8 }
 0x3e5   : > { %v3466_v59 = vpack.c.bf16 %v4708_v13, %v4706_v36  ;;  %v2510_v56 = vpop.f32.mrf.mxu1  ;;  %2682 = vmatmul.bf16.gmra.mxu3 %v5629_v7  ;;  %v4710_v46 = vpop.eup %4709 }
 0x3e6   : > { %4711 = vtanh.f32 %v2597_v4  ;;  %v2511_v58 = vadd.f32 %v2510_v56, %v6203_v30 }
 0x3e7   : > { %3595 = vst [vmem:[%s5770_s29 + $0x270] sm:$0xff] %v3466_v59  ;;  %4713 = vtanh.f32 %v6392_v55 }
 0x3e8   : > { %v2643_v45 = vpop.f32.mrf.mxu3  ;;  %v2732_v5 = vpop.f32.mrf.mxu0  ;;  %2825 = vmatmul.bf16.gmra.mxu1 %v5424_v61  ;;  %2914 = vmatmul.bf16.gmra.mxu2 %v5447_v22 }
 0x3e9   : > { %v2644_v19 = vadd.f32 %v2643_v45, %v6505_v43 }
 0x3eb   : > { %v6584_v63 = vadd.f32 %v2732_v5, %v2644_v19  ;;  %v2599_v6 = vpop.f32.mrf.mxu2  ;;  %2771 = vmatmul.bf16.gmra.mxu0 %v7009_v2 }
 0x3ec   : > { %v4712_v11 = vpop.eup %4711  ;;  %v2600_v50 = vadd.f32 %v2599_v6, %v2511_v58  ;;  %v4139_v58 = vld [vmem:[%s6974_s5 + $0x210] sm:$0xf] }
 0x3ed   : > { %v3470_v3 = vpack.c.bf16 %v4712_v11, %v4710_v46  ;;  %v2512_v33 = vpop.f32.mrf.mxu1  ;;  %v4714_v4 = vpop.eup %4713  ;;  %v4416_v46 = vld [vmem:[%s6974_s5 + $0x228] sm:$0xf0] }
 0x3ee   : > { %4715 = vtanh.f32 %v2600_v50  ;;  %v2513_v13 = vadd.f32 %v2512_v33, %v6203_v30 }
 0x3ef   : > { %3599 = vst [vmem:[%s5770_s29 + $0x28c] sm:$0xff] %v3470_v3  ;;  %4717 = vtanh.f32 %v6429_v24  ;;  %v4140_v24 = vor.u32 %v4416_v46, %v4139_v58 }
 0x3f0   : > { %v2645_v8 = vpop.f32.mrf.mxu3  ;;  %v2734_v36 = vpop.f32.mrf.mxu0 }
 0x3f1   : > { %v2646_v60 = vadd.f32 %v2645_v8, %v6505_v43  ;;  %3070 = vmatpush.bf16.msra.mxu0 %v4140_v24  ;;  %4477 = vmatpush.bf16.msrb.mxu2 %v4140_v24 }
 0x3f3   : > { %v6591_v59 = vadd.f32 %v2734_v36, %v2646_v60  ;;  %v2601_v56 = vpop.f32.mrf.mxu2  ;;  %v7010_v60 = vld [vmem:[#allocation9_spill] sm:$0xff] }
 0x3f4   : > { %v4716_v45 = vpop.eup %4715  ;;  %v2602_v5 = vadd.f32 %v2601_v56, %v2513_v13 }
 0x3f5   : > { %v3474_v55 = vpack.c.bf16 %v4716_v45, %v4714_v4  ;;  %v2515_v19 = vpop.f32.mrf.mxu1  ;;  %2687 = vmatmul.bf16.gmra.mxu3 %v5647_v34  ;;  %v4718_v33 = vpop.eup %4717 }
 0x3f6   : > { %4719 = vtanh.f32 %v2602_v5  ;;  %v2516_v3 = vadd.f32 %v2515_v19, %v6203_v30  ;;  %v3887_v5 = vld [vmem:[%s6974_s5 + $0x18] sm:$0xf] }
 0x3f7   : > { %3603 = vst [vmem:[%s5770_s29 + $0x2a8] sm:$0xff] %v3474_v55  ;;  %4721 = vtanh.f32 %v6442_v14  ;;  %v4353_v55 = vld [vmem:[%s6974_s5 + $0x30] sm:$0xf0] }
 0x3f8   : > { %v2648_v6 = vpop.f32.mrf.mxu3  ;;  %v2737_v11 = vpop.f32.mrf.mxu0  ;;  %2830 = vmatmul.bf16.gmra.mxu1 %v5494_v0  ;;  %2919 = vmatmul.bf16.gmra.mxu2 %v5503_v17  ;;  %v3888_v46 = vor.u32 %v4353_v55, %v3887_v5 }
 0x3f9   : > { %v2649_v50 = vadd.f32 %v2648_v6, %v6505_v43 }
 0x3fa   : > { %2982 = vmatpush.bf16.msra.mxu3 %v3888_v46  ;;  %v7012_v46 = vld [vmem:[#allocation11_spill] sm:$0xff] }
 0x3fb   : > { %v6606_v8 = vadd.f32 %v2737_v11, %v2649_v50  ;;  %v2604_v36 = vpop.f32.mrf.mxu2  ;;  %2776 = vmatmul.bf16.gmra.mxu0 %v7010_v60 }
 0x3fc   : > { %v4720_v13 = vpop.eup %4719  ;;  %v2605_v4 = vadd.f32 %v2604_v36, %v2516_v3 }
 0x3fd   : > { %v3478_v56 = vpack.c.bf16 %v4720_v13, %v4718_v33  ;;  %v2517_v45 = vpop.f32.mrf.mxu1  ;;  %v4722_v11 = vpop.eup %4721 }
 0x3fe   : > { %4723 = vtanh.f32 %v2605_v4  ;;  %v2518_v14 = vadd.f32 %v2517_v45, %v6203_v30  ;;  %v7011_v4 = vld [vmem:[#allocation10_spill] sm:$0xff] }
 0x3ff   : > { %3607 = vst [vmem:[%s5770_s29 + $0x2c4] sm:$0xff] %v3478_v56  ;;  %4725 = vtanh.f32 %v6451_v20 }
 0x400   : > { %v2650_v19 = vpop.f32.mrf.mxu3  ;;  %v2739_v58 = vpop.f32.mrf.mxu0 }
 0x401   : > { %v2651_v6 = vadd.f32 %v2650_v19, %v6505_v43 }
 0x403   : > { %v6619_v24 = vadd.f32 %v2739_v58, %v2651_v6  ;;  %v2606_v50 = vpop.f32.mrf.mxu2 }
 0x404   : > { %v4724_v3 = vpop.eup %4723  ;;  %v2607_v33 = vadd.f32 %v2606_v50, %v2518_v14 }
 0x405   : > { %v3482_v36 = vpack.c.bf16 %v4724_v3, %v4722_v11  ;;  %v2520_v13 = vpop.f32.mrf.mxu1  ;;  %2692 = vmatmul.bf16.gmra.mxu3 %v7011_v4  ;;  %v4726_v19 = vpop.eup %4725 }
 0x406   : > { %4727 = vtanh.f32 %v2607_v33  ;;  %v2521_v55 = vadd.f32 %v2520_v13, %v6203_v30 }
 0x407   : > { %3611 = vst [vmem:[%s5770_s29 + $0x2e0] sm:$0xff] %v3482_v36  ;;  %4729 = vtanh.f32 %v6466_v47 }
 0x408   : > { %v2653_v56 = vpop.f32.mrf.mxu3  ;;  %v2742_v5 = vpop.f32.mrf.mxu0  ;;  %2835 = vmatmul.bf16.gmra.mxu1 %v5511_v38  ;;  %2924 = vmatmul.bf16.gmra.mxu2 %v5521_v53 }
 0x409   : > { %v2654_v45 = vadd.f32 %v2653_v56, %v6505_v43 }
 0x40b   : > { %v6628_v58 = vadd.f32 %v2742_v5, %v2654_v45  ;;  %v2609_v20 = vpop.f32.mrf.mxu2  ;;  %2781 = vmatmul.bf16.gmra.mxu0 %v7012_v46 }
 0x40c   : > { %v4728_v6 = vpop.eup %4727  ;;  %v2610_v14 = vadd.f32 %v2609_v20, %v2521_v55  ;;  %v4409_v20 = vld [vmem:[%s6974_s5 + $0x1f0] sm:$0xf0] }
 0x40d   : > { %v3486_v11 = vpack.c.bf16 %v4728_v6, %v4726_v19  ;;  %v2522_v50 = vpop.f32.mrf.mxu1  ;;  %v4730_v56 = vpop.eup %4729  ;;  %v4111_v19 = vld [vmem:[%s6974_s5 + $0x1d8] sm:$0xf] }
 0x40e   : > { %4731 = vtanh.f32 %v2610_v14  ;;  %v2523_v13 = vadd.f32 %v2522_v50, %v6203_v30  ;;  %v4112_v6 = vor.u32 %v4409_v20, %v4111_v19 }
 0x40f   : > { %3615 = vst [vmem:[%s5770_s29 + $0x2fc] sm:$0xff] %v3486_v11  ;;  %4733 = vtanh.f32 %v6479_v42 }
 0x410   : > { %v2655_v3 = vpop.f32.mrf.mxu3  ;;  %v2744_v33 = vpop.f32.mrf.mxu0  ;;  %3071 = vmatpush.bf16.msra.mxu0 %v4112_v6  ;;  %4478 = vmatpush.bf16.msrb.mxu2 %v4112_v6 }
 0x411   : > { %v2656_v36 = vadd.f32 %v2655_v3, %v6505_v43 }
 0x413   : > { %v6635_v5 = vadd.f32 %v2744_v33, %v2656_v36  ;;  %v2611_v45 = vpop.f32.mrf.mxu2 }
 0x414   : > { %v4732_v53 = vpop.eup %4731  ;;  %v2612_v38 = vadd.f32 %v2611_v45, %v2523_v13 }
 0x415   : > { %v3490_v47 = vpack.c.bf16 %v4732_v53, %v4730_v56  ;;  %v2525_v55 = vpop.f32.mrf.mxu1  ;;  %2697 = vmatmul.bf16.gmra.mxu3 %v5701_v57  ;;  %v4734_v50 = vpop.eup %4733 }
 0x416   : > { %4735 = vtanh.f32 %v2612_v38  ;;  %v2526_v42 = vadd.f32 %v2525_v55, %v6203_v30 }
 0x417   : > { %3619 = vst [vmem:[%s5770_s29 + $0x318] sm:$0xff] %v3490_v47  ;;  %4737 = vtanh.f32 %v6488_v9 }
 0x418   : > { %v2658_v14 = vpop.f32.mrf.mxu3  ;;  %v2747_v11 = vpop.f32.mrf.mxu0  ;;  %2840 = vmatmul.bf16.gmra.mxu1 %v7005_v21  ;;  %2929 = vmatmul.bf16.gmra.mxu2 %v7006_v26 }
 0x419   : > { %v2659_v53 = vadd.f32 %v2658_v14, %v6505_v43 }
 0x41b   : > { %v6650_v3 = vadd.f32 %v2747_v11, %v2659_v53  ;;  %v2614_v33 = vpop.f32.mrf.mxu2  ;;  %2786 = vmatmul.bf16.gmra.mxu0 %v5715_v40 }
 0x41c   : > { %v4736_v38 = vpop.eup %4735  ;;  %v2615_v36 = vadd.f32 %v2614_v33, %v2526_v42 }
 0x41d   : > { %v3494_v13 = vpack.c.bf16 %v4736_v38, %v4734_v50  ;;  %v2527_v56 = vpop.f32.mrf.mxu1  ;;  %v4738_v20 = vpop.eup %4737  ;;  %v6662_v50 = vperm.slane %v6502_v62, 5 }
 0x41e   : > { %4739 = vtanh.f32 %v2615_v36  ;;  %v2528_v55 = vadd.f32 %v2527_v56, %v6203_v30 }
 0x41f   : > { %3623 = vst [vmem:[%s5770_s29 + $0x334] sm:$0xff] %v3494_v13  ;;  %4741 = vtanh.f32 %v6495_v18 }
 0x420   : > { %v2660_v45 = vpop.f32.mrf.mxu3  ;;  %v2749_v47 = vpop.f32.mrf.mxu0 }
 0x421   : > { %v2661_v19 = vadd.f32 %v2660_v45, %v6505_v43 }
 0x423   : > { %v6657_v6 = vadd.f32 %v2749_v47, %v2661_v19  ;;  %v2616_v14 = vpop.f32.mrf.mxu2 }
 0x424   : > { %v4740_v11 = vpop.eup %4739  ;;  %v2617_v53 = vadd.f32 %v2616_v14, %v2528_v55 }
 0x425   : > { %v3498_v9 = vpack.c.bf16 %v4740_v11, %v4738_v20  ;;  %2702 = vmatmul.bf16.gmra.mxu3 %v5731_v27  ;;  %v2806_v42 = vpop.f32.mrf.mxu1  ;;  %v4742_v36 = vpop.eup %4741 }
 0x426   : > { %4743 = vtanh.f32 %v2617_v53  ;;  %v2807_v18 = vadd.f32 %v2806_v42, %v6662_v50 }
 0x427   : > { %3627 = vst [vmem:[%s5770_s29 + $0x350] sm:$0xff] %v3498_v9  ;;  %4745 = vtanh.f32 %v6518_v23 }
 0x428   : > { %v2663_v33 = vpop.f32.mrf.mxu3  ;;  %v2752_v30 = vpop.f32.mrf.mxu0  ;;  %2845 = vmatmul.bf16.gmra.mxu1 %v5550_v32  ;;  %2934 = vmatmul.bf16.gmra.mxu2 %v5565_v49 }
 0x429   : > { %v2664_v38 = vadd.f32 %v2663_v33, %v6505_v43 }
 0x42b   : > { %v6669_v13 = vadd.f32 %v2752_v30, %v2664_v38  ;;  %2791 = vmatmul.bf16.gmra.mxu0 %v5748_v31  ;;  %v2895_v56 = vpop.f32.mrf.mxu2 }
 0x42c   : > { %v4744_v62 = vpop.eup %4743  ;;  %v2896_v45 = vadd.f32 %v2895_v56, %v2807_v18 }
 0x42d   : > { %v3502_v47 = vpack.c.bf16 %v4744_v62, %v4742_v36  ;;  %v2808_v19 = vpop.f32.mrf.mxu1  ;;  %v4746_v53 = vpop.eup %4745 }
 0x42e   : > { %4747 = vtanh.f32 %v2896_v45  ;;  %v2809_v11 = vadd.f32 %v2808_v19, %v6662_v50 }
 0x42f   : > { %3631 = vst [vmem:[%s5770_s29 + $0x36c] sm:$0xff] %v3502_v47  ;;  %4749 = vtanh.f32 %v6531_v35 }
 0x430   : > { %v2665_v55 = vpop.f32.mrf.mxu3  ;;  %v2754_v20 = vpop.f32.mrf.mxu0 }
 0x431   : > { %v2666_v14 = vadd.f32 %v2665_v55, %v6505_v43 }
 0x433   : > { %v6676_v9 = vadd.f32 %v2754_v20, %v2666_v14  ;;  %v2897_v42 = vpop.f32.mrf.mxu2 }
 0x434   : > { %v4748_v33 = vpop.eup %4747  ;;  %v2898_v30 = vadd.f32 %v2897_v42, %v2809_v11 }
 0x435   : > { %v3379_v23 = vpack.c.bf16 %v4748_v33, %v4746_v53  ;;  %v2811_v38 = vpop.f32.mrf.mxu1  ;;  %2983 = vmatmul.bf16.vlgmr.msra.gmra.mxu3 %v5313_v44  ;;  %v4750_v45 = vpop.eup %4749 }
 0x436   : > { %4751 = vtanh.f32 %v2898_v30  ;;  %v2812_v62 = vadd.f32 %v2811_v38, %v6662_v50 }
 0x437   : > { %3507 = vst [vmem:[%s5770_s29 + $0x10] sm:$0xff] %v3379_v23  ;;  %4753 = vtanh.f32 %v6540_v15 }
 0x438   : > { %v2668_v18 = vpop.f32.mrf.mxu3  ;;  %v2757_v36 = vpop.f32.mrf.mxu0  ;;  %2850 = vmatmul.bf16.gmra.mxu1 %v5581_v51  ;;  %2939 = vmatmul.bf16.gmra.mxu2 %v5589_v28 }
 0x439   : > { %v2669_v56 = vadd.f32 %v2668_v18, %v6505_v43 }
 0x43b   : > { %v6685_v47 = vadd.f32 %v2757_v36, %v2669_v56  ;;  %v2900_v35 = vpop.f32.mrf.mxu2  ;;  %3072 = vmatmul.bf16.vlgmr.msra.gmra.mxu0 %v7007_v54 }
 0x43c   : > { %v4752_v44 = vpop.eup %4751  ;;  %v2901_v19 = vadd.f32 %v2900_v35, %v2812_v62 }
 0x43d   : > { %v3383_v55 = vpack.c.bf16 %v4752_v44, %v4750_v45  ;;  %v2813_v20 = vpop.f32.mrf.mxu1  ;;  %v4754_v33 = vpop.eup %4753 }
 0x43e   : > { %4755 = vtanh.f32 %v2901_v19  ;;  %v2814_v42 = vadd.f32 %v2813_v20, %v6662_v50 }
 0x43f   : > { %3512 = vst [vmem:[%s5770_s29 + $0x2c] sm:$0xff] %v3383_v55  ;;  %4757 = vtanh.f32 %v6547_v41 }
 0x440   : > { %v2670_v14 = vpop.f32.mrf.mxu3  ;;  %v2759_v11 = vpop.f32.mrf.mxu0 }
 0x441   : > { %v2671_v53 = vadd.f32 %v2670_v14, %v6505_v43 }
 0x443   : > { %v6692_v30 = vadd.f32 %v2759_v11, %v2671_v53  ;;  %v2902_v23 = vpop.f32.mrf.mxu2 }
 0x444   : > { %v4756_v54 = vpop.eup %4755  ;;  %v2903_v38 = vadd.f32 %v2902_v23, %v2814_v42 }
 0x445   : > { %v3387_v15 = vpack.c.bf16 %v4756_v54, %v4754_v33  ;;  %v2816_v18 = vpop.f32.mrf.mxu1  ;;  %2988 = vmatmul.bf16.gmra.mxu3 %v5347_v16  ;;  %v4758_v35 = vpop.eup %4757 }
 0x446   : > { %4759 = vtanh.f32 %v2903_v38  ;;  %v2817_v45 = vadd.f32 %v2816_v18, %v6662_v50 }
 0x447   : > { %3516 = vst [vmem:[%s5770_s29 + $0x48] sm:$0xff] %v3387_v15  ;;  %4761 = vtanh.f32 %v6562_v1 }
 0x448   : > { %v2673_v36 = vpop.f32.mrf.mxu3  ;;  %v2762_v56 = vpop.f32.mrf.mxu0  ;;  %2855 = vmatmul.bf16.gmra.mxu1 %v5599_v52  ;;  %2944 = vmatmul.bf16.gmra.mxu2 %v5613_v37 }
 0x449   : > { %v2674_v62 = vadd.f32 %v2673_v36, %v6505_v43 }
 0x44b   : > { %v6701_v44 = vadd.f32 %v2762_v56, %v2674_v62  ;;  %v2905_v41 = vpop.f32.mrf.mxu2  ;;  %3077 = vmatmul.bf16.gmra.mxu0 %v5352_v29 }
 0x44c   : > { %v4760_v16 = vpop.eup %4759  ;;  %v2906_v19 = vadd.f32 %v2905_v41, %v2817_v45 }
 0x44d   : > { %v3391_v55 = vpack.c.bf16 %v4760_v16, %v4758_v35  ;;  %v2818_v20 = vpop.f32.mrf.mxu1  ;;  %v4762_v33 = vpop.eup %4761 }
 0x44e   : > { %4763 = vtanh.f32 %v2906_v19  ;;  %v2819_v42 = vadd.f32 %v2818_v20, %v6662_v50 }
 0x44f   : > { %3520 = vst [vmem:[%s5770_s29 + $0x64] sm:$0xff] %v3391_v55  ;;  %4765 = vtanh.f32 %v6575_v10 }
 0x450   : > { %v2675_v14 = vpop.f32.mrf.mxu3  ;;  %v2764_v11 = vpop.f32.mrf.mxu0 }
 0x451   : > { %v2676_v53 = vadd.f32 %v2675_v14, %v6505_v43 }
 0x453   : > { %v6708_v23 = vadd.f32 %v2764_v11, %v2676_v53  ;;  %v2907_v54 = vpop.f32.mrf.mxu2 }
 0x454   : > { %v4764_v29 = vpop.eup %4763  ;;  %v2908_v38 = vadd.f32 %v2907_v54, %v2819_v42 }
 0x455   : > { %v3395_v1 = vpack.c.bf16 %v4764_v29, %v4762_v33  ;;  %v2821_v15 = vpop.f32.mrf.mxu1  ;;  %2993 = vmatmul.bf16.gmra.mxu3 %v5368_v48  ;;  %v4766_v45 = vpop.eup %4765 }
 0x456   : > { %4767 = vtanh.f32 %v2908_v38  ;;  %v2822_v62 = vadd.f32 %v2821_v15, %v6662_v50 }
 0x457   : > { %3524 = vst [vmem:[%s5770_s29 + $0x80] sm:$0xff] %v3395_v1  ;;  %4769 = vtanh.f32 %v6584_v63 }
 0x458   : > { %v2678_v18 = vpop.f32.mrf.mxu3  ;;  %v2767_v36 = vpop.f32.mrf.mxu0  ;;  %2860 = vmatmul.bf16.gmra.mxu1 %v5629_v7  ;;  %2949 = vmatmul.bf16.gmra.mxu2 %v7009_v2 }
 0x459   : > { %v2679_v56 = vadd.f32 %v2678_v18, %v6505_v43 }
 0x45b   : > { %v6717_v35 = vadd.f32 %v2767_v36, %v2679_v56  ;;  %v2910_v10 = vpop.f32.mrf.mxu2  ;;  %3082 = vmatmul.bf16.gmra.mxu0 %v7008_v12 }
 0x45c   : > { %v4768_v48 = vpop.eup %4767  ;;  %v2911_v41 = vadd.f32 %v2910_v10, %v2822_v62 }
 0x45d   : > { %v3399_v16 = vpack.c.bf16 %v4768_v48, %v4766_v45  ;;  %v2823_v19 = vpop.f32.mrf.mxu1  ;;  %v4770_v53 = vpop.eup %4769 }
 0x45e   : > { %4771 = vtanh.f32 %v2911_v41  ;;  %v2824_v11 = vadd.f32 %v2823_v19, %v6662_v50 }
 0x45f   : > { %3528 = vst [vmem:[%s5770_s29 + $0x9c] sm:$0xff] %v3399_v16  ;;  %4773 = vtanh.f32 %v6591_v59 }
 0x460   : > { %v2680_v55 = vpop.f32.mrf.mxu3  ;;  %v2769_v20 = vpop.f32.mrf.mxu0 }
 0x461   : > { %v2681_v14 = vadd.f32 %v2680_v55, %v6505_v43 }
 0x463   : > { %v6724_v42 = vadd.f32 %v2769_v20, %v2681_v14  ;;  %v2912_v33 = vpop.f32.mrf.mxu2 }
 0x464   : > { %v4772_v12 = vpop.eup %4771  ;;  %v2913_v54 = vadd.f32 %v2912_v33, %v2824_v11 }
 0x465   : > { %v3403_v63 = vpack.c.bf16 %v4772_v12, %v4770_v53  ;;  %v2826_v29 = vpop.f32.mrf.mxu1  ;;  %2998 = vmatmul.bf16.gmra.mxu3 %v5399_v25  ;;  %v4774_v36 = vpop.eup %4773 }
 0x466   : > { %4775 = vtanh.f32 %v2913_v54  ;;  %v2827_v18 = vadd.f32 %v2826_v29, %v6662_v50 }
 0x467   : > { %3532 = vst [vmem:[%s5770_s29 + $0xb8] sm:$0xff] %v3403_v63  ;;  %4777 = vtanh.f32 %v6606_v8 }
 0x468   : > { %v2683_v38 = vpop.f32.mrf.mxu3  ;;  %v2772_v1 = vpop.f32.mrf.mxu0  ;;  %2865 = vmatmul.bf16.gmra.mxu1 %v5647_v34  ;;  %2954 = vmatmul.bf16.gmra.mxu2 %v7010_v60 }
 0x469   : > { %v2684_v15 = vadd.f32 %v2683_v38, %v6505_v43 }
 0x46b   : > { %v6733_v56 = vadd.f32 %v2772_v1, %v2684_v15  ;;  %v2915_v59 = vpop.f32.mrf.mxu2  ;;  %3087 = vmatmul.bf16.gmra.mxu0 %v5404_v39 }
 0x46c   : > { %v4776_v25 = vpop.eup %4775  ;;  %v2916_v62 = vadd.f32 %v2915_v59, %v2827_v18 }
 0x46d   : > { %v3407_v45 = vpack.c.bf16 %v4776_v25, %v4774_v36  ;;  %v2828_v10 = vpop.f32.mrf.mxu1  ;;  %v4778_v55 = vpop.eup %4777 }
 0x46e   : > { %4779 = vtanh.f32 %v2916_v62  ;;  %v2829_v19 = vadd.f32 %v2828_v10, %v6662_v50 }
 0x46f   : > { %3536 = vst [vmem:[%s5770_s29 + $0xd4] sm:$0xff] %v3407_v45  ;;  %4781 = vtanh.f32 %v6619_v24 }
 0x470   : > { %v2685_v48 = vpop.f32.mrf.mxu3  ;;  %v2774_v41 = vpop.f32.mrf.mxu0 }
 0x471   : > { %v2686_v16 = vadd.f32 %v2685_v48, %v6505_v43 }
 0x473   : > { %v6740_v20 = vadd.f32 %v2774_v41, %v2686_v16  ;;  %v2917_v14 = vpop.f32.mrf.mxu2 }
 0x474   : > { %v4780_v39 = vpop.eup %4779  ;;  %v2918_v11 = vadd.f32 %v2917_v14, %v2829_v19 }
 0x475   : > { %v3411_v8 = vpack.c.bf16 %v4780_v39, %v4778_v55  ;;  %v2831_v53 = vpop.f32.mrf.mxu1  ;;  %3003 = vmatmul.bf16.gmra.mxu3 %v5424_v61  ;;  %v4782_v29 = vpop.eup %4781 }
 0x476   : > { %4783 = vtanh.f32 %v2918_v11  ;;  %v2832_v63 = vadd.f32 %v2831_v53, %v6662_v50 }
 0x477   : > { %3540 = vst [vmem:[%s5770_s29 + $0xf0] sm:$0xff] %v3411_v8  ;;  %4785 = vtanh.f32 %v6628_v58 }
 0x478   : > { %v2688_v33 = vpop.f32.mrf.mxu3  ;;  %v2777_v12 = vpop.f32.mrf.mxu0  ;;  %2870 = vmatmul.bf16.gmra.mxu1 %v7011_v4  ;;  %2959 = vmatmul.bf16.gmra.mxu2 %v7012_v46 }
 0x479   : > { %v2689_v54 = vadd.f32 %v2688_v33, %v6505_v43 }
 0x47b   : > { %v6749_v38 = vadd.f32 %v2777_v12, %v2689_v54  ;;  %v2920_v24 = vpop.f32.mrf.mxu2  ;;  %3092 = vmatmul.bf16.gmra.mxu0 %v5447_v22 }
 0x47c   : > { %v4784_v61 = vpop.eup %4783  ;;  %v2921_v1 = vadd.f32 %v2920_v24, %v2832_v63 }
 0x47d   : > { %v3415_v15 = vpack.c.bf16 %v4784_v61, %v4782_v29  ;;  %v2833_v18 = vpop.f32.mrf.mxu1  ;;  %v4786_v45 = vpop.eup %4785 }
 0x47e   : > { %4787 = vtanh.f32 %v2921_v1  ;;  %v2834_v62 = vadd.f32 %v2833_v18, %v6662_v50 }
 0x47f   : > { %3544 = vst [vmem:[%s5770_s29 + $0x10c] sm:$0xff] %v3415_v15  ;;  %4789 = vtanh.f32 %v6635_v5 }
 0x480   : > { %v2690_v36 = vpop.f32.mrf.mxu3  ;;  %v2779_v59 = vpop.f32.mrf.mxu0 }
 0x481   : > { %v2691_v25 = vadd.f32 %v2690_v36, %v6505_v43 }
 0x483   : > { %v6756_v10 = vadd.f32 %v2779_v59, %v2691_v25  ;;  %v2922_v48 = vpop.f32.mrf.mxu2  ;;  %v7013_v59 = vld [vmem:[#allocation4_spill] sm:$0xff] }
 0x484   : > { %v4788_v22 = vpop.eup %4787  ;;  %v2923_v41 = vadd.f32 %v2922_v48, %v2834_v62 }
 0x485   : > { %v3419_v58 = vpack.c.bf16 %v4788_v22, %v4786_v45  ;;  %v2836_v16 = vpop.f32.mrf.mxu1  ;;  %3008 = vmatmul.bf16.gmra.mxu3 %v5494_v0  ;;  %v4790_v11 = vpop.eup %4789 }
 0x486   : > { %4791 = vtanh.f32 %v2923_v41  ;;  %v2837_v39 = vadd.f32 %v2836_v16, %v6662_v50 }
 0x487   : > { %3548 = vst [vmem:[%s5770_s29 + $0x128] sm:$0xff] %v3419_v58  ;;  %4793 = vtanh.f32 %v6650_v3  ;;  %v7014_v58 = vld [vmem:[#allocation5_spill] sm:$0xff] }
 0x488   : > { %v2693_v19 = vpop.f32.mrf.mxu3  ;;  %v2782_v55 = vpop.f32.mrf.mxu0  ;;  %2875 = vmatmul.bf16.gmra.mxu1 %v5701_v57  ;;  %2964 = vmatmul.bf16.gmra.mxu2 %v5715_v40 }
 0x489   : > { %v2694_v14 = vadd.f32 %v2693_v19, %v6505_v43 }
 0x48b   : > { %v6765_v8 = vadd.f32 %v2782_v55, %v2694_v14  ;;  %v2925_v5 = vpop.f32.mrf.mxu2  ;;  %3097 = vmatmul.bf16.gmra.mxu0 %v5503_v17 }
 0x48c   : > { %v4792_v0 = vpop.eup %4791  ;;  %v2926_v53 = vadd.f32 %v2925_v5, %v2837_v39 }
 0x48d   : > { %v3423_v33 = vpack.c.bf16 %v4792_v0, %v4790_v11  ;;  %v2838_v12 = vpop.f32.mrf.mxu1  ;;  %v4794_v61 = vpop.eup %4793 }
 0x48e   : > { %4795 = vtanh.f32 %v2926_v53  ;;  %v2839_v24 = vadd.f32 %v2838_v12, %v6662_v50 }
 0x48f   : > { %3552 = vst [vmem:[%s5770_s29 + $0x144] sm:$0xff] %v3423_v33  ;;  %4797 = vtanh.f32 %v6657_v6 }
 0x490   : > { %v2695_v54 = vpop.f32.mrf.mxu3  ;;  %v2784_v63 = vpop.f32.mrf.mxu0 }
 0x491   : > { %v2696_v29 = vadd.f32 %v2695_v54, %v6505_v43 }
 0x493   : > { %v6772_v1 = vadd.f32 %v2784_v63, %v2696_v29  ;;  %v2927_v15 = vpop.f32.mrf.mxu2 }
 0x494   : > { %v4796_v17 = vpop.eup %4795  ;;  %v2928_v18 = vadd.f32 %v2927_v15, %v2839_v24 }
 0x495   : > { %v3427_v3 = vpack.c.bf16 %v4796_v17, %v4794_v61  ;;  %v2841_v36 = vpop.f32.mrf.mxu1  ;;  %3013 = vmatmul.bf16.gmra.mxu3 %v7013_v59  ;;  %v4798_v22 = vpop.eup %4797 }
 0x496   : > { %4799 = vtanh.f32 %v2928_v18  ;;  %v2842_v48 = vadd.f32 %v2841_v36, %v6662_v50 }
 0x497   : > { %3556 = vst [vmem:[%s5770_s29 + $0x160] sm:$0xff] %v3427_v3  ;;  %4801 = vtanh.f32 %v6669_v13 }
 0x498   : > { %v2698_v25 = vpop.f32.mrf.mxu3  ;;  %v2787_v62 = vpop.f32.mrf.mxu0  ;;  %2880 = vmatmul.bf16.gmra.mxu1 %v5731_v27  ;;  %2969 = vmatmul.bf16.gmra.mxu2 %v5748_v31 }
 0x499   : > { %v2699_v45 = vadd.f32 %v2698_v25, %v6505_v43 }
 0x49b   : > { %v6781_v41 = vadd.f32 %v2787_v62, %v2699_v45  ;;  %v2930_v6 = vpop.f32.mrf.mxu2  ;;  %3102 = vmatmul.bf16.gmra.mxu0 %v7014_v58 }
 0x49c   : > { %v4800_v16 = vpop.eup %4799  ;;  %v2931_v19 = vadd.f32 %v2930_v6, %v2842_v48 }
 0x49d   : > { %v3431_v55 = vpack.c.bf16 %v4800_v16, %v4798_v22  ;;  %v2843_v14 = vpop.f32.mrf.mxu1  ;;  %v4802_v53 = vpop.eup %4801 }
 0x49e   : > { %4803 = vtanh.f32 %v2931_v19  ;;  %v2844_v0 = vadd.f32 %v2843_v14, %v6662_v50 }
 0x49f   : > { %3560 = vst [vmem:[%s5770_s29 + $0x17c] sm:$0xff] %v3431_v55  ;;  %4805 = vtanh.f32 %v6676_v9  ;;  %v4939_v55 = vld [vmem:[%s6975_s6] sm:$0x7f] }
 0x4a0   : > { %v2700_v39 = vpop.f32.mrf.mxu3  ;;  %v2789_v11 = vpop.f32.mrf.mxu0  ;;  %v6810_v14 = vperm.slane %v4939_v55, 6 }
 0x4a1   : > { %v2701_v5 = vadd.f32 %v2700_v39, %v6505_v43 }
 0x4a3   : > { %v6788_v33 = vadd.f32 %v2789_v11, %v2701_v5  ;;  %v2932_v12 = vpop.f32.mrf.mxu2 }
 0x4a4   : > { %v4804_v54 = vpop.eup %4803  ;;  %v2933_v63 = vadd.f32 %v2932_v12, %v2844_v0 }
 0x4a5   : > { %v3435_v13 = vpack.c.bf16 %v4804_v54, %v4802_v53  ;;  %v2846_v29 = vpop.f32.mrf.mxu1  ;;  %3018 = vmatmul.bf16.gmra.mxu3 %v7005_v21  ;;  %v4806_v18 = vpop.eup %4805 }
 0x4a6   : > { %4807 = vtanh.f32 %v2933_v63  ;;  %v2847_v17 = vadd.f32 %v2846_v29, %v6662_v50 }
 0x4a7   : > { %3564 = vst [vmem:[%s5770_s29 + $0x198] sm:$0xff] %v3435_v13  ;;  %4809 = vtanh.f32 %v6685_v47 }
 0x4a8   : > { %v2703_v24 = vpop.f32.mrf.mxu3  ;;  %v2792_v61 = vpop.f32.mrf.mxu0  ;;  %3147 = vmatmul.bf16.vlgmr.msrb.gmra.mxu2 %v5748_v31 }
 0x4a9   : > { %v2704_v15 = vadd.f32 %v2703_v24, %v6505_v43 }
 0x4ab   : > { %v6796_v3 = vadd.f32 %v2792_v61, %v2704_v15  ;;  %v2935_v36 = vpop.f32.mrf.mxu2  ;;  %3107 = vmatmul.bf16.gmra.mxu0 %v7006_v26 }
 0x4ac   : > { %v4808_v9 = vpop.eup %4807  ;;  %v2936_v59 = vadd.f32 %v2935_v36, %v2847_v17 }
 0x4ad   : > { %v3439_v21 = vpack.c.bf16 %v4808_v9, %v4806_v18  ;;  %v2848_v25 = vpop.f32.mrf.mxu1  ;;  %v4810_v22 = vpop.eup %4809 }
 0x4ae   : > { %4811 = vtanh.f32 %v2936_v59  ;;  %v2849_v48 = vadd.f32 %v2848_v25, %v6662_v50 }
 0x4af   : > { %3568 = vst [vmem:[%s5770_s29 + $0x1b4] sm:$0xff] %v3439_v21  ;;  %4813 = vtanh.f32 %v6692_v30 }
 0x4b0   : > { %v2705_v62 = vpop.f32.mrf.mxu3  ;;  %v2794_v31 = vpop.f32.mrf.mxu0 }
 0x4b1   : > { %v2706_v45 = vadd.f32 %v2705_v62, %v6505_v43 }
 0x4b3   : > { %v6803_v6 = vadd.f32 %v2794_v31, %v2706_v45  ;;  %v2937_v58 = vpop.f32.mrf.mxu2 }
 0x4b4   : > { %v4812_v26 = vpop.eup %4811  ;;  %v2938_v16 = vadd.f32 %v2937_v58, %v2849_v48 }
 0x4b5   : > { %v3443_v47 = vpack.c.bf16 %v4812_v26, %v4810_v22  ;;  %v2851_v19 = vpop.f32.mrf.mxu1  ;;  %3023 = vmatmul.bf16.gmra.mxu3 %v5550_v32  ;;  %v4814_v30 = vpop.eup %4813 }
 0x4b6   : > { %4815 = vtanh.f32 %v2938_v16  ;;  %v2852_v5 = vadd.f32 %v2851_v19, %v6662_v50 }
 0x4b7   : > { %3572 = vst [vmem:[%s5770_s29 + $0x1d0] sm:$0xff] %v3443_v47  ;;  %4817 = vtanh.f32 %v6701_v44 }
 0x4b8   : > { %v2984_v43 = vpop.f32.mrf.mxu3  ;;  %v3073_v39 = vpop.f32.mrf.mxu0 }
 0x4b9   : > { %v2985_v11 = vadd.f32 %v2984_v43, %v6810_v14 }
 0x4bb   : > { %v3074_v0 = vadd.f32 %v3073_v39, %v2985_v11  ;;  %v2940_v53 = vpop.f32.mrf.mxu2  ;;  %3112 = vmatmul.bf16.gmra.mxu0 %v5565_v49 }
 0x4bc   : > { %v4816_v32 = vpop.eup %4815  ;;  %v2941_v12 = vadd.f32 %v2940_v53, %v2852_v5 }
 0x4bd   : > { %v3447_v54 = vpack.c.bf16 %v4816_v32, %v4814_v30  ;;  %4819 = vtanh.f32 %v3074_v0  ;;  %v2853_v63 = vpop.f32.mrf.mxu1  ;;  %v4818_v61 = vpop.eup %4817 }
 0x4be   : > { %4821 = vtanh.f32 %v2941_v12  ;;  %v2854_v15 = vadd.f32 %v2853_v63, %v6662_v50 }
 0x4bf   : > { %3576 = vst [vmem:[%s5770_s29 + $0x1ec] sm:$0xff] %v3447_v54  ;;  %4823 = vtanh.f32 %v6708_v23 }
 0x4c0   : > { %v2986_v13 = vpop.f32.mrf.mxu3  ;;  %v3075_v29 = vpop.f32.mrf.mxu0 }
 0x4c1   : > { %v2987_v24 = vadd.f32 %v2986_v13, %v6810_v14 }
 0x4c3   : > { %v4820_v17 = vpop.eup %4819  ;;  %v3076_v49 = vadd.f32 %v3075_v29, %v2987_v24  ;;  %v2942_v18 = vpop.f32.mrf.mxu2 }
 0x4c4   : > { %v4822_v44 = vpop.eup %4821  ;;  %v3380_v36 = vpack.c.bf16 %v4820_v17, %v4820_v17  ;;  %v2943_v9 = vadd.f32 %v2942_v18, %v2854_v15 }
 0x4c5   : > { %v3451_v59 = vpack.c.bf16 %v4822_v44, %v4818_v61  ;;  %4825 = vtanh.f32 %v3076_v49  ;;  %v2856_v21 = vpop.f32.mrf.mxu1  ;;  %3028 = vmatmul.bf16.gmra.mxu3 %v5581_v51  ;;  %v4824_v45 = vpop.eup %4823 }
 0x4c6   : > { %3509 = vst.msk [vmem:[%s5770_s29 + $0x18] sm:$0xf] %vm3508_vm1, %v3380_v36  ;;  %4827 = vtanh.f32 %v2943_v9  ;;  %v2857_v23 = vadd.f32 %v2856_v21, %v6662_v50 }
 0x4c7   : > { %3580 = vst [vmem:[%s5770_s29 + $0x208] sm:$0xff] %v3451_v59  ;;  %4829 = vtanh.f32 %v6717_v35 }
 0x4c8   : > { %v2989_v25 = vpop.f32.mrf.mxu3  ;;  %v3078_v62 = vpop.f32.mrf.mxu0 }
 0x4c9   : > { %v2990_v31 = vadd.f32 %v2989_v25, %v6810_v14 }
 0x4cb   : > { %v4826_v48 = vpop.eup %4825  ;;  %v3079_v22 = vadd.f32 %v3078_v62, %v2990_v31  ;;  %v2945_v58 = vpop.f32.mrf.mxu2  ;;  %3117 = vmatmul.bf16.gmra.mxu0 %v5589_v28 }
 0x4cc   : > { %v4828_v26 = vpop.eup %4827  ;;  %v3384_v51 = vpack.c.bf16 %v4826_v48, %v4826_v48  ;;  %v2946_v16 = vadd.f32 %v2945_v58, %v2857_v23 }
 0x4cd   : > { %v3455_v47 = vpack.c.bf16 %v4828_v26, %v4824_v45  ;;  %4831 = vtanh.f32 %v3079_v22  ;;  %v2858_v19 = vpop.f32.mrf.mxu1  ;;  %v4830_v11 = vpop.eup %4829 }
 0x4ce   : > { %3513 = vst.msk [vmem:[%s5770_s29 + $0x34] sm:$0xf] %vm3508_vm1, %v3384_v51  ;;  %4833 = vtanh.f32 %v2946_v16  ;;  %v2859_v28 = vadd.f32 %v2858_v19, %v6662_v50 }
 0x4cf   : > { %3584 = vst [vmem:[%s5770_s29 + $0x224] sm:$0xff] %v3455_v47  ;;  %4835 = vtanh.f32 %v6724_v42 }
 0x4d0   : > { %v2991_v55 = vpop.f32.mrf.mxu3  ;;  %v3080_v43 = vpop.f32.mrf.mxu0 }
 0x4d1   : > { %v2992_v39 = vadd.f32 %v2991_v55, %v6810_v14 }
 0x4d3   : > { %v4832_v5 = vpop.eup %4831  ;;  %v3081_v35 = vadd.f32 %v3080_v43, %v2992_v39  ;;  %v2947_v30 = vpop.f32.mrf.mxu2 }
 0x4d4   : > { %v4834_v0 = vpop.eup %4833  ;;  %v3388_v53 = vpack.c.bf16 %v4832_v5, %v4832_v5  ;;  %v2948_v32 = vadd.f32 %v2947_v30, %v2859_v28 }
 0x4d5   : > { %v3459_v12 = vpack.c.bf16 %v4834_v0, %v4830_v11  ;;  %4837 = vtanh.f32 %v3081_v35  ;;  %v2861_v54 = vpop.f32.mrf.mxu1  ;;  %3033 = vmatmul.bf16.gmra.mxu3 %v5599_v52  ;;  %v4836_v24 = vpop.eup %4835 }
 0x4d6   : > { %3517 = vst.msk [vmem:[%s5770_s29 + $0x50] sm:$0xf] %vm3508_vm1, %v3388_v53  ;;  %4839 = vtanh.f32 %v2948_v32  ;;  %v2862_v42 = vadd.f32 %v2861_v54, %v6662_v50 }
 0x4d7   : > { %3588 = vst [vmem:[%s5770_s29 + $0x240] sm:$0xff] %v3459_v12  ;;  %4841 = vtanh.f32 %v6733_v56 }
 0x4d8   : > { %v2994_v63 = vpop.f32.mrf.mxu3  ;;  %v3083_v13 = vpop.f32.mrf.mxu0 }
 0x4d9   : > { %v2995_v29 = vadd.f32 %v2994_v63, %v6810_v14 }
 0x4db   : > { %v4838_v61 = vpop.eup %4837  ;;  %v3084_v15 = vadd.f32 %v3083_v13, %v2995_v29  ;;  %v2950_v17 = vpop.f32.mrf.mxu2  ;;  %3122 = vmatmul.bf16.gmra.mxu0 %v5613_v37 }
 0x4dc   : > { %v4840_v49 = vpop.eup %4839  ;;  %v3392_v52 = vpack.c.bf16 %v4838_v61, %v4838_v61  ;;  %v2951_v18 = vadd.f32 %v2950_v17, %v2862_v42 }
 0x4dd   : > { %v3463_v44 = vpack.c.bf16 %v4840_v49, %v4836_v24  ;;  %4843 = vtanh.f32 %v3084_v15  ;;  %v2863_v36 = vpop.f32.mrf.mxu1  ;;  %v4842_v25 = vpop.eup %4841 }
 0x4de   : > { %3521 = vst.msk [vmem:[%s5770_s29 + $0x6c] sm:$0xf] %vm3508_vm1, %v3392_v52  ;;  %4845 = vtanh.f32 %v2951_v18  ;;  %v2864_v37 = vadd.f32 %v2863_v36, %v6662_v50 }
 0x4df   : > { %3592 = vst [vmem:[%s5770_s29 + $0x25c] sm:$0xff] %v3463_v44  ;;  %4847 = vtanh.f32 %v6740_v20 }
 0x4e0   : > { %v2996_v9 = vpop.f32.mrf.mxu3  ;;  %v3085_v59 = vpop.f32.mrf.mxu0 }
 0x4e1   : > { %v2997_v21 = vadd.f32 %v2996_v9, %v6810_v14 }
 0x4e3   : > { %v4844_v62 = vpop.eup %4843  ;;  %v3086_v56 = vadd.f32 %v3085_v59, %v2997_v21  ;;  %v2952_v31 = vpop.f32.mrf.mxu2 }
 0x4e4   : > { %v4846_v45 = vpop.eup %4845  ;;  %v3396_v23 = vpack.c.bf16 %v4844_v62, %v4844_v62  ;;  %v2953_v48 = vadd.f32 %v2952_v31, %v2864_v37 }
 0x4e5   : > { %v3467_v22 = vpack.c.bf16 %v4846_v45, %v4842_v25  ;;  %4849 = vtanh.f32 %v3086_v56  ;;  %v2866_v58 = vpop.f32.mrf.mxu1  ;;  %3038 = vmatmul.bf16.gmra.mxu3 %v5629_v7  ;;  %v4848_v47 = vpop.eup %4847 }
 0x4e6   : > { %3525 = vst.msk [vmem:[%s5770_s29 + $0x88] sm:$0xf] %vm3508_vm1, %v3396_v23  ;;  %4851 = vtanh.f32 %v2953_v48  ;;  %v2867_v20 = vadd.f32 %v2866_v58, %v6662_v50 }
 0x4e7   : > { %3596 = vst [vmem:[%s5770_s29 + $0x278] sm:$0xff] %v3467_v22  ;;  %4853 = vtanh.f32 %v6749_v38 }
 0x4e8   : > { %v2999_v26 = vpop.f32.mrf.mxu3  ;;  %v3088_v51 = vpop.f32.mrf.mxu0 }
 0x4e9   : > { %v3000_v16 = vadd.f32 %v2999_v26, %v6810_v14 }
 0x4eb   : > { %v4850_v19 = vpop.eup %4849  ;;  %v3089_v55 = vadd.f32 %v3088_v51, %v3000_v16  ;;  %v2955_v43 = vpop.f32.mrf.mxu2  ;;  %3127 = vmatmul.bf16.gmra.mxu0 %v7009_v2 }
 0x4ec   : > { %v4852_v39 = vpop.eup %4851  ;;  %v3400_v7 = vpack.c.bf16 %v4850_v19, %v4850_v19  ;;  %v2956_v11 = vadd.f32 %v2955_v43, %v2867_v20 }
 0x4ed   : > { %v3471_v28 = vpack.c.bf16 %v4852_v39, %v4848_v47  ;;  %4855 = vtanh.f32 %v3089_v55  ;;  %v2868_v5 = vpop.f32.mrf.mxu1  ;;  %v4854_v53 = vpop.eup %4853 }
 0x4ee   : > { %3529 = vst.msk [vmem:[%s5770_s29 + $0xa4] sm:$0xf] %vm3508_vm1, %v3400_v7  ;;  %4857 = vtanh.f32 %v2956_v11  ;;  %v2869_v2 = vadd.f32 %v2868_v5, %v6662_v50 }
 0x4ef   : > { %3600 = vst [vmem:[%s5770_s29 + $0x294] sm:$0xff] %v3471_v28  ;;  %4859 = vtanh.f32 %v6756_v10 }
 0x4f0   : > { %v3001_v35 = vpop.f32.mrf.mxu3  ;;  %v3090_v30 = vpop.f32.mrf.mxu0 }
 0x4f1   : > { %v3002_v0 = vadd.f32 %v3001_v35, %v6810_v14 }
 0x4f3   : > { %v4856_v32 = vpop.eup %4855  ;;  %v3091_v38 = vadd.f32 %v3090_v30, %v3002_v0  ;;  %v2957_v12 = vpop.f32.mrf.mxu2 }
 0x4f4   : > { %v4858_v54 = vpop.eup %4857  ;;  %v3404_v63 = vpack.c.bf16 %v4856_v32, %v4856_v32  ;;  %v2958_v13 = vadd.f32 %v2957_v12, %v2869_v2 }
 0x4f5   : > { %v3475_v29 = vpack.c.bf16 %v4858_v54, %v4854_v53  ;;  %4861 = vtanh.f32 %v3091_v38  ;;  %v2871_v24 = vpop.f32.mrf.mxu1  ;;  %3043 = vmatmul.bf16.gmra.mxu3 %v5647_v34  ;;  %v4860_v17 = vpop.eup %4859 }
 0x4f6   : > { %3533 = vst.msk [vmem:[%s5770_s29 + $0xc0] sm:$0xf] %vm3508_vm1, %v3404_v63  ;;  %4863 = vtanh.f32 %v2958_v13  ;;  %v2872_v10 = vadd.f32 %v2871_v24, %v6662_v50 }
 0x4f7   : > { %3604 = vst [vmem:[%s5770_s29 + $0x2b0] sm:$0xff] %v3475_v29  ;;  %4865 = vtanh.f32 %v6765_v8 }
 0x4f8   : > { %v3004_v42 = vpop.f32.mrf.mxu3  ;;  %v3093_v61 = vpop.f32.mrf.mxu0 }
 0x4f9   : > { %v3005_v15 = vadd.f32 %v3004_v42, %v6810_v14 }
 0x4fb   : > { %v4862_v49 = vpop.eup %4861  ;;  %v3094_v52 = vadd.f32 %v3093_v61, %v3005_v15  ;;  %v2960_v18 = vpop.f32.mrf.mxu2  ;;  %3132 = vmatmul.bf16.gmra.mxu0 %v7010_v60 }
 0x4fc   : > { %v4864_v44 = vpop.eup %4863  ;;  %v3408_v34 = vpack.c.bf16 %v4862_v49, %v4862_v49  ;;  %v2961_v36 = vadd.f32 %v2960_v18, %v2872_v10 }
 0x4fd   : > { %v3479_v9 = vpack.c.bf16 %v4864_v44, %v4860_v17  ;;  %4867 = vtanh.f32 %v3094_v52  ;;  %v2873_v59 = vpop.f32.mrf.mxu1  ;;  %v4866_v62 = vpop.eup %4865 }
 0x4fe   : > { %3537 = vst.msk [vmem:[%s5770_s29 + $0xdc] sm:$0xf] %vm3508_vm1, %v3408_v34  ;;  %4869 = vtanh.f32 %v2961_v36  ;;  %v2874_v60 = vadd.f32 %v2873_v59, %v6662_v50 }
 0x4ff   : > { %3608 = vst [vmem:[%s5770_s29 + $0x2cc] sm:$0xff] %v3479_v9  ;;  %4871 = vtanh.f32 %v6772_v1 }
 0x500   : > { %v3006_v21 = vpop.f32.mrf.mxu3  ;;  %v3095_v25 = vpop.f32.mrf.mxu0 }
 0x501   : > { %v3007_v37 = vadd.f32 %v3006_v21, %v6810_v14 }
 0x503   : > { %v4868_v56 = vpop.eup %4867  ;;  %v3096_v8 = vadd.f32 %v3095_v25, %v3007_v37  ;;  %v2962_v31 = vpop.f32.mrf.mxu2 }
 0x504   : > { %v4870_v45 = vpop.eup %4869  ;;  %v3412_v23 = vpack.c.bf16 %v4868_v56, %v4868_v56  ;;  %v2963_v48 = vadd.f32 %v2962_v31, %v2874_v60 }
 0x505   : > { %v3483_v22 = vpack.c.bf16 %v4870_v45, %v4866_v62  ;;  %4873 = vtanh.f32 %v3096_v8  ;;  %v2876_v58 = vpop.f32.mrf.mxu1  ;;  %3048 = vmatmul.bf16.gmra.mxu3 %v7011_v4  ;;  %v4872_v47 = vpop.eup %4871 }
 0x506   : > { %3541 = vst.msk [vmem:[%s5770_s29 + $0xf8] sm:$0xf] %vm3508_vm1, %v3412_v23  ;;  %4875 = vtanh.f32 %v2963_v48  ;;  %v2877_v1 = vadd.f32 %v2876_v58, %v6662_v50 }
 0x507   : > { %3612 = vst [vmem:[%s5770_s29 + $0x2e8] sm:$0xff] %v3483_v22  ;;  %4877 = vtanh.f32 %v6781_v41 }
 0x508   : > { %v3009_v26 = vpop.f32.mrf.mxu3  ;;  %v3098_v51 = vpop.f32.mrf.mxu0 }
 0x509   : > { %v3010_v16 = vadd.f32 %v3009_v26, %v6810_v14 }
 0x50b   : > { %v4874_v20 = vpop.eup %4873  ;;  %v3099_v19 = vadd.f32 %v3098_v51, %v3010_v16  ;;  %v2965_v55 = vpop.f32.mrf.mxu2  ;;  %3137 = vmatmul.bf16.gmra.mxu0 %v7012_v46 }
 0x50c   : > { %v4876_v43 = vpop.eup %4875  ;;  %v3416_v4 = vpack.c.bf16 %v4874_v20, %v4874_v20  ;;  %v2966_v39 = vadd.f32 %v2965_v55, %v2877_v1 }
 0x50d   : > { %v3487_v7 = vpack.c.bf16 %v4876_v43, %v4872_v47  ;;  %4879 = vtanh.f32 %v3099_v19  ;;  %v2878_v11 = vpop.f32.mrf.mxu1  ;;  %v4878_v30 = vpop.eup %4877 }
 0x50e   : > { %3545 = vst.msk [vmem:[%s5770_s29 + $0x114] sm:$0xf] %vm3508_vm1, %v3416_v4  ;;  %4881 = vtanh.f32 %v2966_v39  ;;  %v2879_v46 = vadd.f32 %v2878_v11, %v6662_v50 }
 0x50f   : > { %3616 = vst [vmem:[%s5770_s29 + $0x304] sm:$0xff] %v3487_v7  ;;  %4883 = vtanh.f32 %v6788_v33 }
 0x510   : > { %v3011_v28 = vpop.f32.mrf.mxu3  ;;  %v3100_v5 = vpop.f32.mrf.mxu0 }
 0x511   : > { %v3012_v35 = vadd.f32 %v3011_v28, %v6810_v14 }
 0x513   : > { %v4880_v0 = vpop.eup %4879  ;;  %v3101_v41 = vadd.f32 %v3100_v5, %v3012_v35  ;;  %v2967_v53 = vpop.f32.mrf.mxu2 }
 0x514   : > { %v4882_v2 = vpop.eup %4881  ;;  %v3420_v32 = vpack.c.bf16 %v4880_v0, %v4880_v0  ;;  %v2968_v38 = vadd.f32 %v2967_v53, %v2879_v46 }
 0x515   : > { %v3491_v12 = vpack.c.bf16 %v4882_v2, %v4878_v30  ;;  %4885 = vtanh.f32 %v3101_v41  ;;  %v2881_v54 = vpop.f32.mrf.mxu1  ;;  %3053 = vmatmul.bf16.gmra.mxu3 %v5701_v57  ;;  %v4884_v24 = vpop.eup %4883 }
 0x516   : > { %3549 = vst.msk [vmem:[%s5770_s29 + $0x130] sm:$0xf] %vm3508_vm1, %v3420_v32  ;;  %4887 = vtanh.f32 %v2968_v38  ;;  %v2882_v33 = vadd.f32 %v2881_v54, %v6662_v50 }
 0x517   : > { %3620 = vst [vmem:[%s5770_s29 + $0x320] sm:$0xff] %v3491_v12  ;;  %4889 = vtanh.f32 %v6796_v3 }
 0x518   : > { %v3014_v63 = vpop.f32.mrf.mxu3  ;;  %v3103_v13 = vpop.f32.mrf.mxu0 }
 0x519   : > { %v3015_v29 = vadd.f32 %v3014_v63, %v6810_v14 }
 0x51b   : > { %v4886_v42 = vpop.eup %4885  ;;  %v3104_v61 = vadd.f32 %v3103_v13, %v3015_v29  ;;  %v2970_v15 = vpop.f32.mrf.mxu2  ;;  %3142 = vmatmul.bf16.gmra.mxu0 %v5715_v40 }
 0x51c   : > { %v4888_v17 = vpop.eup %4887  ;;  %v3424_v57 = vpack.c.bf16 %v4886_v42, %v4886_v42  ;;  %v2971_v10 = vadd.f32 %v2970_v15, %v2882_v33 }
 0x51d   : > { %v3495_v49 = vpack.c.bf16 %v4888_v17, %v4884_v24  ;;  %4891 = vtanh.f32 %v3104_v61  ;;  %v2883_v52 = vpop.f32.mrf.mxu1  ;;  %v4890_v36 = vpop.eup %4889 }
 0x51e   : > { %3553 = vst.msk [vmem:[%s5770_s29 + $0x14c] sm:$0xf] %vm3508_vm1, %v3424_v57  ;;  %4893 = vtanh.f32 %v2971_v10  ;;  %v2884_v40 = vadd.f32 %v2883_v52, %v6662_v50 }
 0x51f   : > { %3624 = vst [vmem:[%s5770_s29 + $0x33c] sm:$0xff] %v3495_v49  ;;  %4895 = vtanh.f32 %v6803_v6 }
 0x520   : > { %v3016_v18 = vpop.f32.mrf.mxu3  ;;  %v3105_v44 = vpop.f32.mrf.mxu0 }
 0x521   : > { %v3017_v34 = vadd.f32 %v3016_v18, %v6810_v14 }
 0x523   : > { %v4892_v9 = vpop.eup %4891  ;;  %v3106_v3 = vadd.f32 %v3105_v44, %v3017_v34  ;;  %v2972_v59 = vpop.f32.mrf.mxu2 }
 0x524   : > { %v4894_v21 = vpop.eup %4893  ;;  %v3428_v25 = vpack.c.bf16 %v4892_v9, %v4892_v9  ;;  %v2973_v37 = vadd.f32 %v2972_v59, %v2884_v40 }
 0x525   : > { %v3499_v62 = vpack.c.bf16 %v4894_v21, %v4890_v36  ;;  %4897 = vtanh.f32 %v3106_v3  ;;  %3058 = vmatmul.bf16.gmra.mxu3 %v5731_v27  ;;  %v4896_v8 = vpop.eup %4895 }
 0x526   : > { %3557 = vst.msk [vmem:[%s5770_s29 + $0x168] sm:$0xf] %vm3508_vm1, %v3428_v25  ;;  %4899 = vtanh.f32 %v2973_v37 }
 0x527   : > { %3628 = vst [vmem:[%s5770_s29 + $0x358] sm:$0xff] %v3499_v62 }
 0x528   : > { %v3019_v60 = vpop.f32.mrf.mxu3  ;;  %v3108_v50 = vpop.f32.mrf.mxu0 }
 0x529   : > { %v3020_v56 = vadd.f32 %v3019_v60, %v6810_v14 }
 0x52b   : > { %v4898_v31 = vpop.eup %4897  ;;  %v3109_v6 = vadd.f32 %v3108_v50, %v3020_v56 }
 0x52c   : > { %v4900_v45 = vpop.eup %4899  ;;  %v3432_v23 = vpack.c.bf16 %v4898_v31, %v4898_v31 }
 0x52d   : > { %v3503_v48 = vpack.c.bf16 %v4900_v45, %v4896_v8  ;;  %4901 = vtanh.f32 %v3109_v6 }
 0x52e   : > { %3561 = vst.msk [vmem:[%s5770_s29 + $0x184] sm:$0xf] %vm3508_vm1, %v3432_v23 }
 0x52f   : > { %3632 = vst [vmem:[%s5770_s29 + $0x374] sm:$0xff] %v3503_v48 }
 0x530   : > { %v3021_v27 = vpop.f32.mrf.mxu3  ;;  %v3110_v22 = vpop.f32.mrf.mxu0 }
 0x531   : > { %v3022_v58 = vadd.f32 %v3021_v27, %v6810_v14 }
 0x533   : > { %v4902_v26 = vpop.eup %4901  ;;  %v3111_v51 = vadd.f32 %v3110_v22, %v3022_v58 }
 0x534   : > { %v3436_v16 = vpack.c.bf16 %v4902_v26, %v4902_v26 }
 0x535   : > { %4903 = vtanh.f32 %v3111_v51 }
 0x536   : > { %3565 = vst.msk [vmem:[%s5770_s29 + $0x1a0] sm:$0xf] %vm3508_vm1, %v3436_v16 }
 0x538   : > { %v3024_v47 = vpop.f32.mrf.mxu3  ;;  %v3113_v1 = vpop.f32.mrf.mxu0 }
 0x539   : > { %v3025_v20 = vadd.f32 %v3024_v47, %v6810_v14 }
 0x53b   : > { %v4904_v19 = vpop.eup %4903  ;;  %v3114_v55 = vadd.f32 %v3113_v1, %v3025_v20 }
 0x53c   : > { %v3440_v43 = vpack.c.bf16 %v4904_v19, %v4904_v19 }
 0x53d   : > { %4905 = vtanh.f32 %v3114_v55 }
 0x53e   : > { %3569 = vst.msk [vmem:[%s5770_s29 + $0x1bc] sm:$0xf] %vm3508_vm1, %v3440_v43 }
 0x540   : > { %v3026_v4 = vpop.f32.mrf.mxu3  ;;  %v3115_v39 = vpop.f32.mrf.mxu0 }
 0x541   : > { %v3027_v7 = vadd.f32 %v3026_v4, %v6810_v14 }
 0x543   : > { %v4906_v11 = vpop.eup %4905  ;;  %v3116_v28 = vadd.f32 %v3115_v39, %v3027_v7 }
 0x544   : > { %v3444_v5 = vpack.c.bf16 %v4906_v11, %v4906_v11 }
 0x545   : > { %4907 = vtanh.f32 %v3116_v28 }
 0x546   : > { %3573 = vst.msk [vmem:[%s5770_s29 + $0x1d8] sm:$0xf] %vm3508_vm1, %v3444_v5 }
 0x548   : > { %v3029_v35 = vpop.f32.mrf.mxu3  ;;  %v3118_v30 = vpop.f32.mrf.mxu0 }
 0x549   : > { %v3030_v46 = vadd.f32 %v3029_v35, %v6810_v14 }
 0x54b   : > { %v4908_v0 = vpop.eup %4907  ;;  %v3119_v41 = vadd.f32 %v3118_v30, %v3030_v46 }
 0x54c   : > { %v3448_v53 = vpack.c.bf16 %v4908_v0, %v4908_v0 }
 0x54d   : > { %4909 = vtanh.f32 %v3119_v41 }
 0x54e   : > { %3577 = vst.msk [vmem:[%s5770_s29 + $0x1f4] sm:$0xf] %vm3508_vm1, %v3448_v53 }
 0x550   : > { %v3031_v2 = vpop.f32.mrf.mxu3  ;;  %v3120_v32 = vpop.f32.mrf.mxu0 }
 0x551   : > { %v3032_v38 = vadd.f32 %v3031_v2, %v6810_v14 }
 0x553   : > { %v4910_v12 = vpop.eup %4909  ;;  %v3121_v54 = vadd.f32 %v3120_v32, %v3032_v38 }
 0x554   : > { %v3452_v63 = vpack.c.bf16 %v4910_v12, %v4910_v12  ;;  %v3148_v12 = vpop.f32.mrf.mxu2 }
 0x555   : > { %4911 = vtanh.f32 %v3121_v54 }
 0x556   : > { %3581 = vst.msk [vmem:[%s5770_s29 + $0x210] sm:$0xf] %vm3508_vm1, %v3452_v63 }
 0x558   : > { %v3034_v13 = vpop.f32.mrf.mxu3  ;;  %v3123_v29 = vpop.f32.mrf.mxu0 }
 0x559   : > { %v3035_v24 = vadd.f32 %v3034_v13, %v6810_v14 }
 0x55b   : > { %v4912_v33 = vpop.eup %4911  ;;  %v3124_v42 = vadd.f32 %v3123_v29, %v3035_v24 }
 0x55c   : > { %v3456_v61 = vpack.c.bf16 %v4912_v33, %v4912_v33 }
 0x55d   : > { %4913 = vtanh.f32 %v3124_v42 }
 0x55e   : > { %3585 = vst.msk [vmem:[%s5770_s29 + $0x22c] sm:$0xf] %vm3508_vm1, %v3456_v61  ;;  %v3150_v61 = vpop.f32.mrf.mxu2 }
 0x560   : > { %v3036_v15 = vpop.f32.mrf.mxu3  ;;  %v3125_v17 = vpop.f32.mrf.mxu0 }
 0x561   : > { %v3037_v57 = vadd.f32 %v3036_v15, %v6810_v14 }
 0x563   : > { %v4914_v10 = vpop.eup %4913  ;;  %v3126_v49 = vadd.f32 %v3125_v17, %v3037_v57 }
 0x564   : > { %v3460_v52 = vpack.c.bf16 %v4914_v10, %v4914_v10 }
 0x565   : > { %4915 = vtanh.f32 %v3126_v49 }
 0x566   : > { %3589 = vst.msk [vmem:[%s5770_s29 + $0x248] sm:$0xf] %vm3508_vm1, %v3460_v52 }
 0x568   : > { %v3039_v18 = vpop.f32.mrf.mxu3  ;;  %v3128_v44 = vpop.f32.mrf.mxu0 }
 0x569   : > { %v3040_v34 = vadd.f32 %v3039_v18, %v6810_v14 }
 0x56b   : > { %v4916_v36 = vpop.eup %4915  ;;  %v3129_v40 = vadd.f32 %v3128_v44, %v3040_v34 }
 0x56c   : > { %v3464_v9 = vpack.c.bf16 %v4916_v36, %v4916_v36 }
 0x56d   : > { %4917 = vtanh.f32 %v3129_v40 }
 0x56e   : > { %3593 = vst.msk [vmem:[%s5770_s29 + $0x264] sm:$0xf] %vm3508_vm1, %v3464_v9 }
 0x570   : > { %v3041_v3 = vpop.f32.mrf.mxu3  ;;  %v3130_v59 = vpop.f32.mrf.mxu0 }
 0x571   : > { %v3042_v21 = vadd.f32 %v3041_v3, %v6810_v14 }
 0x573   : > { %v4918_v25 = vpop.eup %4917  ;;  %v3131_v37 = vadd.f32 %v3130_v59, %v3042_v21 }
 0x574   : > { %v3468_v62 = vpack.c.bf16 %v4918_v25, %v4918_v25 }
 0x575   : > { %4919 = vtanh.f32 %v3131_v37 }
 0x576   : > { %3597 = vst.msk [vmem:[%s5770_s29 + $0x280] sm:$0xf] %vm3508_vm1, %v3468_v62 }
 0x578   : > { %v3044_v60 = vpop.f32.mrf.mxu3  ;;  %v3133_v50 = vpop.f32.mrf.mxu0 }
 0x579   : > { %v3045_v56 = vadd.f32 %v3044_v60, %v6810_v14 }
 0x57b   : > { %v4920_v8 = vpop.eup %4919  ;;  %v3134_v31 = vadd.f32 %v3133_v50, %v3045_v56 }
 0x57c   : > { %v3472_v6 = vpack.c.bf16 %v4920_v8, %v4920_v8 }
 0x57d   : > { %4921 = vtanh.f32 %v3134_v31 }
 0x57e   : > { %3601 = vst.msk [vmem:[%s5770_s29 + $0x29c] sm:$0xf] %vm3508_vm1, %v3472_v6 }
 0x580   : > { %v3046_v45 = vpop.f32.mrf.mxu3  ;;  %v3135_v23 = vpop.f32.mrf.mxu0 }
 0x581   : > { %v3047_v48 = vadd.f32 %v3046_v45, %v6810_v14 }
 0x583   : > { %v4922_v27 = vpop.eup %4921  ;;  %v3136_v22 = vadd.f32 %v3135_v23, %v3047_v48 }
 0x584   : > { %v3476_v58 = vpack.c.bf16 %v4922_v27, %v4922_v27 }
 0x585   : > { %4923 = vtanh.f32 %v3136_v22 }
 0x586   : > { %3605 = vst.msk [vmem:[%s5770_s29 + $0x2b8] sm:$0xf] %vm3508_vm1, %v3476_v58 }
 0x588   : > { %v3049_v26 = vpop.f32.mrf.mxu3  ;;  %v3138_v51 = vpop.f32.mrf.mxu0 }
 0x589   : > { %v3050_v16 = vadd.f32 %v3049_v26, %v6810_v14 }
 0x58b   : > { %v4924_v47 = vpop.eup %4923  ;;  %v3139_v1 = vadd.f32 %v3138_v51, %v3050_v16 }
 0x58c   : > { %v3480_v20 = vpack.c.bf16 %v4924_v47, %v4924_v47 }
 0x58d   : > { %4925 = vtanh.f32 %v3139_v1 }
 0x58e   : > { %3609 = vst.msk [vmem:[%s5770_s29 + $0x2d4] sm:$0xf] %vm3508_vm1, %v3480_v20 }
 0x590   : > { %v3051_v19 = vpop.f32.mrf.mxu3  ;;  %v3140_v55 = vpop.f32.mrf.mxu0 }
 0x591   : > { %v3052_v43 = vadd.f32 %v3051_v19, %v6810_v14 }
 0x593   : > { %v4926_v4 = vpop.eup %4925  ;;  %v3141_v39 = vadd.f32 %v3140_v55, %v3052_v43 }
 0x594   : > { %v3484_v7 = vpack.c.bf16 %v4926_v4, %v4926_v4 }
 0x595   : > { %4927 = vtanh.f32 %v3141_v39 }
 0x596   : > { %3613 = vst.msk [vmem:[%s5770_s29 + $0x2f0] sm:$0xf] %vm3508_vm1, %v3484_v7 }
 0x598   : > { %v3054_v11 = vpop.f32.mrf.mxu3  ;;  %v3143_v28 = vpop.f32.mrf.mxu0 }
 0x599   : > { %v3055_v5 = vadd.f32 %v3054_v11, %v6810_v14 }
 0x59b   : > { %v4928_v35 = vpop.eup %4927  ;;  %v3144_v30 = vadd.f32 %v3143_v28, %v3055_v5 }
 0x59c   : > { %v3488_v46 = vpack.c.bf16 %v4928_v35, %v4928_v35 }
 0x59d   : > { %4929 = vtanh.f32 %v3144_v30 }
 0x59e   : > { %3617 = vst.msk [vmem:[%s5770_s29 + $0x30c] sm:$0xf] %vm3508_vm1, %v3488_v46 }
 0x5a0   : > { %v3056_v0 = vpop.f32.mrf.mxu3  ;;  %v3145_v53 = vpop.f32.mrf.mxu0 }
 0x5a1   : > { %v3057_v41 = vadd.f32 %v3056_v0, %v6810_v14 }
 0x5a3   : > { %v4930_v2 = vpop.eup %4929  ;;  %v3146_v32 = vadd.f32 %v3145_v53, %v3057_v41 }
 0x5a4   : > { %v3492_v38 = vpack.c.bf16 %v4930_v2, %v4930_v2 }
 0x5a5   : > { %4931 = vtanh.f32 %v3146_v32 }
 0x5a6   : > { %3621 = vst.msk [vmem:[%s5770_s29 + $0x328] sm:$0xf] %vm3508_vm1, %v3492_v38 }
 0x5a8   : > { %v3059_v54 = vpop.f32.mrf.mxu3 }
 0x5a9   : > { %v3060_v63 = vadd.f32 %v3059_v54, %v6810_v14 }
 0x5ab   : > { %v4932_v13 = vpop.eup %4931  ;;  %v3149_v29 = vadd.f32 %v3148_v12, %v3060_v63 }
 0x5ac   : > { %v3496_v24 = vpack.c.bf16 %v4932_v13, %v4932_v13 }
 0x5ad   : > { %4933 = vtanh.f32 %v3149_v29 }
 0x5ae   : > { %3625 = vst.msk [vmem:[%s5770_s29 + $0x344] sm:$0xf] %vm3508_vm1, %v3496_v24 }
 0x5b0   : > { %v3061_v33 = vpop.f32.mrf.mxu3 }
 0x5b1   : > { %v3062_v42 = vadd.f32 %v3061_v33, %v6810_v14 }
 0x5b3   : > { %v4934_v15 = vpop.eup %4933  ;;  %v3151_v17 = vadd.f32 %v3150_v61, %v3062_v42 }
 0x5b4   : > { %v3500_v57 = vpack.c.bf16 %v4934_v15, %v4934_v15 }
 0x5b5   : > { %4935 = vtanh.f32 %v3151_v17 }
 0x5b6   : > { %3629 = vst.msk [vmem:[%s5770_s29 + $0x360] sm:$0xf] %vm3508_vm1, %v3500_v57 }
 0x5bb   : > { %v4936_v10 = vpop.eup %4935 }
 0x5bc   : > { %v3504_v49 = vpack.c.bf16 %v4936_v10, %v4936_v10 }
 0x5be   : > { %3633 = vst.msk [vmem:[%s5770_s29 + $0x37c] sm:$0xf] %vm3508_vm1, %v3504_v49 }
 0x5bf PF: > { %s17_s24 = sadd.s32 1, %s4946_s24  }
 0x5c0   : > { %p14_p4 = scmp.ge.s32.totalorder %s17_s24, 4  }
 0x5c2   :  { %16 = sbr.rel (!%p14_p4) target bundleno = 1 (0x1), region = 78 }

</bundles_post_ra>
